<compile_context>
chip_gen: v7x
topology: tpu7x:2x2x1
jax: 0.10.0
libtpu: 0.0.40
codegen_flags: <defaults>
</compile_context>

<pallas_src>
import functools
import math

import jax
import jax.numpy as jnp
from jax.experimental import pallas as pl
from jax.experimental.pallas import tpu as pltpu

EPS = 1e-5


def _layernorm(x, w, b):
    mu = jnp.mean(x, axis=-1, keepdims=True)
    var = jnp.mean(jnp.square(x - mu), axis=-1, keepdims=True)
    return (x - mu) * jax.lax.rsqrt(var + EPS) * w + b


def transformer_layer_kernel(
    x_ref,                                     # (L, C) f32, full sequence, one batch elem
    wq_ref, bq_ref,                            # (C, C) bf16 (scale folded), (1, C) f32
    wkv_ref, bkv_ref,                          # (C, 2C) bf16, (1, 2C) f32
    wo_ref, bo_ref,                            # (C, C) bf16 (out_proj^T), (1, C) f32
    ln1w_ref, ln1b_ref, ln2w_ref, ln2b_ref,    # (1, C) f32
    w1_ref, w2_ref,                            # (C, C) bf16 (fc1^T / fc2^T)
    o_ref,                                     # (tq, C) f32, one query tile
    *, num_heads: int,
):
    f32, bf16 = jnp.float32, jnp.bfloat16
    L, C = x_ref.shape
    tq = o_ref.shape[0]
    H = num_heads
    dh = C // H

    t = pl.program_id(1)
    row0 = pl.multiple_of(t * tq, tq)

    # --- LayerNorm 1 (f32) ----------------------------------------------------
    # Full sequence is needed for K/V; the query tile is re-normalized from the
    # ref slice (cheap) so no dynamic value-slice of xn_full is required.
    xn_full = _layernorm(x_ref[...], ln1w_ref[...], ln1b_ref[...])          # (L, C)
    x_t = x_ref[pl.ds(row0, tq), :]                                          # (tq, C)
    xn_t = _layernorm(x_t, ln1w_ref[...], ln1b_ref[...])

    # --- fused full-width projections (outer q/k/v Linear folded into in-proj) -
    kv = jnp.dot(xn_full.astype(bf16), wkv_ref[...],
                 preferred_element_type=f32) + bkv_ref[...]                  # (L, 2C)
    q = jnp.dot(xn_t.astype(bf16), wq_ref[...],
                preferred_element_type=f32) + bq_ref[...]                    # (tq, C), pre-scaled
    qb = q.astype(bf16)
    kb = kv[:, :C].astype(bf16)                                              # (L, C)
    vb = kv[:, C:].astype(bf16)                                              # (L, C)

    # --- per-head attention (static unrolled loop; MXU shapes are identical to
    #     a batched head einsum, but no lane-splitting reshape is needed) -------
    heads = []
    for h in range(H):
        sl = slice(h * dh, (h + 1) * dh)
        s = jax.lax.dot_general(qb[:, sl], kb[:, sl],
                                (((1,), (1,)), ((), ())),
                                preferred_element_type=f32)                  # (tq, L)
        s = s - jnp.max(s, axis=-1, keepdims=True)
        p = jnp.exp(s)                                                       # f32 exp (all gens)
        p = p * pl.reciprocal(jnp.sum(p, axis=-1, keepdims=True))            # exact recip
        heads.append(jnp.dot(p.astype(bf16), vb[:, sl],
                             preferred_element_type=f32))                    # (tq, dh)
    att = jnp.concatenate(heads, axis=-1)                                    # (tq, C)

    # --- out-projection: single full-depth matmul + bias + residual 1 ----------
    y = jnp.dot(att.astype(bf16), wo_ref[...], preferred_element_type=f32) + bo_ref[...]
    x1 = y + x_t

    # --- LayerNorm 2 + feed-forward; residual adds the POST-LN2 value ----------
    # (intentional: matches the ultralytics module, not standard pre-LN)
    x2 = _layernorm(x1, ln2w_ref[...], ln2b_ref[...])
    ff = jnp.dot(x2.astype(bf16), w1_ref[...], preferred_element_type=f32)
    ff = jnp.dot(ff.astype(bf16), w2_ref[...], preferred_element_type=f32)
    o_ref[...] = (ff + x2).astype(o_ref.dtype)


def _prepare_params(params, c, num_heads):
    """Offline (XLA) weight prep: fold outer q/k/v into the MHA in-projection,
    fold the 1/sqrt(dh) scale into Wq/bq, pre-transpose to (in, out), cast."""
    f32, bf16 = jnp.float32, jnp.bfloat16
    dh = c // num_heads
    scale = 1.0 / math.sqrt(dh)

    def fold(w_outer, w_in):
        # x_ @ w_outer.T @ w_in.T + b  ==  x_ @ (w_in @ w_outer).T + b
        return (w_in @ w_outer).T                                            # (C_in, C_out)

    wq_t = (fold(params["wq"], params["wiq"]) * scale).astype(bf16)          # (C, C)
    bq = (params["biq"].reshape(1, c) * scale).astype(f32)
    wkv = jnp.concatenate([fold(params["wk"], params["wik"]),
                           fold(params["wv"], params["wiv"])], axis=1).astype(bf16)  # (C, 2C)
    bkv = jnp.concatenate([params["bik"].reshape(1, c),
                           params["biv"].reshape(1, c)], axis=1).astype(f32)  # (1, 2C)
    return [
        wq_t, bq, wkv, bkv,
        params["wo"].T.astype(bf16), params["bo"].reshape(1, c).astype(f32),
        params["ln1_w"].reshape(1, c).astype(f32), params["ln1_b"].reshape(1, c).astype(f32),
        params["ln2_w"].reshape(1, c).astype(f32), params["ln2_b"].reshape(1, c).astype(f32),
        params["w1"].T.astype(bf16), params["w2"].T.astype(bf16),
    ]


def transformer_layer(x_lnc, params, num_heads, q_block=None):
    """x_lnc: (L, N, C) float32, PyTorch nn.MultiheadAttention seq-first layout."""
    L, N, C = x_lnc.shape
    assert C % num_heads == 0, "embed dim must be divisible by num_heads"

    ordered = _prepare_params(params, C, num_heads)

    # Query-tile size: single tile for short sequences; tile long sequences so the
    # (tq, L) score/softmax working set stays bounded (v7x: only 64 MiB VMEM/TC).
    if q_block is None:
        q_block = L if L <= 512 else next(
            (t for t in (512, 256, 128, 64, 32, 16, 8) if L % t == 0), L)
    assert L % q_block == 0, "seq length must be divisible by q_block"
    n_qt = L // q_block

    # Seq-first -> batch-first once in XLA so each grid step streams a contiguous
    # (L, C) slab (one dense DMA per batch element, revisited across query tiles).
    x_nlc = jnp.transpose(x_lnc, (1, 0, 2))

    # --- VMEM budget: weights (maybe double-buffered) + activation transients ---
    weight_bytes = sum(int(p.size) * p.dtype.itemsize for p in ordered)
    act_bytes = 4 * (6 * L * C + 10 * q_block * C + num_heads * q_block * L)
    io_bytes = 4 * (2 * L * C + 2 * q_block * C)
    try:
        vmem_cap = int(pltpu.get_tpu_info().vmem_capacity_bytes)
    except Exception:
        vmem_cap = 64 * 2**20
    vmem_limit = int(min(int(0.75 * vmem_cap),
                         max(16 * 2**20, 2 * weight_bytes + act_bytes + io_bytes)))

    def const_spec(p, single_buffer):
        nd = p.ndim
        if single_buffer:
            # Constant blocks (index_map never changes): one resident copy is enough.
            return pl.BlockSpec(p.shape, lambda b, t: (0,) * nd,
                                pipeline_mode=pl.Buffered(buffer_count=1))
        return pl.BlockSpec(p.shape, lambda b, t: (0,) * nd)

    def run(single_buffer):
        in_specs = [pl.BlockSpec((None, L, C), lambda b, t: (b, 0, 0))]
        in_specs += [const_spec(p, single_buffer) for p in ordered]
        return pl.pallas_call(
            functools.partial(transformer_layer_kernel, num_heads=num_heads),
            out_shape=jax.ShapeDtypeStruct((N, L, C), jnp.float32),
            grid_spec=pltpu.PrefetchScalarGridSpec(
                num_scalar_prefetch=0,
                grid=(N, n_qt),
                in_specs=in_specs,
                out_specs=pl.BlockSpec((None, q_block, C), lambda b, t: (b, t, 0)),
            ),
            compiler_params=pltpu.CompilerParams(
                dimension_semantics=("parallel", "parallel"),
                vmem_limit_bytes=vmem_limit,
            ),
        )(x_nlc, *ordered)

    try:
        out = jax.block_until_ready(run(True))
    except Exception:
        # Fallback if this JAX build rejects single-buffered constant blocks.
        out = jax.block_until_ready(run(False))

    return jnp.transpose(out, (1, 0, 2))        # back to (L, N, C)


def _reference(x, params, num_heads):
    """Pure-JAX (f32) replica of the PyTorch TransformerLayer forward."""
    L, N, C = x.shape
    H, dh = num_heads, C // num_heads

    def ln(t, w, b):
        mu = t.mean(-1, keepdims=True)
        var = ((t - mu) ** 2).mean(-1, keepdims=True)
        return (t - mu) / jnp.sqrt(var + EPS) * w.reshape(C) + b.reshape(C)

    x_ = ln(x, params["ln1_w"], params["ln1_b"])
    qp = (x_ @ params["wq"].T) @ params["wiq"].T + params["biq"].reshape(C)
    kp = (x_ @ params["wk"].T) @ params["wik"].T + params["bik"].reshape(C)
    vp = (x_ @ params["wv"].T) @ params["wiv"].T + params["biv"].reshape(C)

    def split(t):  # (L, N, C) -> (N, H, L, dh)
        return jnp.transpose(t.reshape(L, N, H, dh), (1, 2, 0, 3))

    qh = split(qp) / math.sqrt(dh)
    kh, vh = split(kp), split(vp)
    s = jnp.einsum("nhqd,nhkd->nhqk", qh, kh)
    p = jax.nn.softmax(s, axis=-1)
    att = jnp.einsum("nhqk,nhkd->nhqd", p, vh)
    att = jnp.transpose(att, (2, 0, 1, 3)).reshape(L, N, C)
    att = att @ params["wo"].T + params["bo"].reshape(C)
    x = att + x
    x = ln(x, params["ln2_w"], params["ln2_b"])
    return x @ params["w1"].T @ params["w2"].T + x


def init_params(key, c):
    ks = jax.random.split(key, 12)
    nrm = lambda k, shape, s=0.1: (jax.random.normal(k, shape, jnp.float32) * s)
    return {
        # LayerNorm params (PyTorch default init: weight=1, bias=0)
        "ln1_w": jnp.ones((1, c), jnp.float32),
        "ln1_b": jnp.zeros((1, c), jnp.float32),
        "ln2_w": jnp.ones((1, c), jnp.float32),
        "ln2_b": jnp.zeros((1, c), jnp.float32),
        # outer q/k/v Linear (bias=False), weights (out, in) like PyTorch
        "wq": nrm(ks[0], (c, c)),
        "wk": nrm(ks[1], (c, c)),
        "wv": nrm(ks[2], (c, c)),
        # MultiheadAttention in_proj (split into 3 (c,c) blocks) + bias
        "wiq": nrm(ks[3], (c, c)),
        "wik": nrm(ks[4], (c, c)),
        "wiv": nrm(ks[5], (c, c)),
        "biq": nrm(ks[6], (1, c), 0.01),
        "bik": nrm(ks[7], (1, c), 0.01),
        "biv": nrm(ks[8], (1, c), 0.01),
        # MultiheadAttention out_proj (with bias)
        "wo": nrm(ks[9], (c, c)),
        "bo": nrm(ks[10], (1, c), 0.01),
        # feed-forward fc1 / fc2 (bias=False)
        "w1": nrm(ks[11], (c, c)),
        "w2": nrm(jax.random.fold_in(key, 99), (c, c)),
    }


if __name__ == "__main__":
    L, N, C, H = 16, 2, 32, 4          # seq, batch, channels, heads
    key = jax.random.PRNGKey(0)
    kx, kp = jax.random.split(key)
    x = jax.random.normal(kx, (L, N, C), jnp.float32)
    params = init_params(kp, C)

    # q_block=8 exercises the query-tiled path (grid = (N, 2)).
    y = jax.block_until_ready(transformer_layer(x, params, num_heads=H, q_block=8))
    assert y.shape == (L, N, C) and y.dtype == jnp.float32

    y_ref = _reference(x, params, H)
    max_err = float(jnp.max(jnp.abs(y - y_ref)))
    assert bool(jnp.all(jnp.isfinite(y))) and max_err < 1e-1, max_err
    print("KERNEL_OK")
</pallas_src>

<mosaic_0001>
module attributes {stable_mosaic.version = 11 : i64} {
  func.func @transformer_layer_kernel(%arg0: i32, %arg1: i32, %arg2: memref<1x16x32xf32, #tpu.memory_space<vmem>>, %arg3: memref<32x32xbf16, #tpu.memory_space<vmem>>, %arg4: memref<1x32xf32, #tpu.memory_space<vmem>>, %arg5: memref<32x64xbf16, #tpu.memory_space<vmem>>, %arg6: memref<1x64xf32, #tpu.memory_space<vmem>>, %arg7: memref<32x32xbf16, #tpu.memory_space<vmem>>, %arg8: memref<1x32xf32, #tpu.memory_space<vmem>>, %arg9: memref<1x32xf32, #tpu.memory_space<vmem>>, %arg10: memref<1x32xf32, #tpu.memory_space<vmem>>, %arg11: memref<1x32xf32, #tpu.memory_space<vmem>>, %arg12: memref<1x32xf32, #tpu.memory_space<vmem>>, %arg13: memref<32x32xbf16, #tpu.memory_space<vmem>>, %arg14: memref<32x32xbf16, #tpu.memory_space<vmem>>, %arg15: memref<1x8x32xf32, #tpu.memory_space<vmem>>) attributes {dimension_semantics = [#tpu.dimension_semantics<parallel>, #tpu.dimension_semantics<parallel>], iteration_bounds = array<i64: 2, 2>, scalar_prefetch = 0 : i64, scratch_operands = 0 : i64, tpu.core_type = #tpu.core_type<tc>, window_params = [{transform_indices = @transform_0, window_bounds = array<i64: 1, 16, 32>}, {pipeline_mode = #tpu.pipeline_mode<synchronous>, transform_indices = @transform_1, window_bounds = array<i64: 32, 32>}, {pipeline_mode = #tpu.pipeline_mode<synchronous>, transform_indices = @transform_2, window_bounds = array<i64: 1, 32>}, {pipeline_mode = #tpu.pipeline_mode<synchronous>, transform_indices = @transform_3, window_bounds = array<i64: 32, 64>}, {pipeline_mode = #tpu.pipeline_mode<synchronous>, transform_indices = @transform_4, window_bounds = array<i64: 1, 64>}, {pipeline_mode = #tpu.pipeline_mode<synchronous>, transform_indices = @transform_5, window_bounds = array<i64: 32, 32>}, {pipeline_mode = #tpu.pipeline_mode<synchronous>, transform_indices = @transform_6, window_bounds = array<i64: 1, 32>}, {pipeline_mode = #tpu.pipeline_mode<synchronous>, transform_indices = @transform_7, window_bounds = array<i64: 1, 32>}, {pipeline_mode = #tpu.pipeline_mode<synchronous>, transform_indices = @transform_8, window_bounds = array<i64: 1, 32>}, {pipeline_mode = #tpu.pipeline_mode<synchronous>, transform_indices = @transform_9, window_bounds = array<i64: 1, 32>}, {pipeline_mode = #tpu.pipeline_mode<synchronous>, transform_indices = @transform_10, window_bounds = array<i64: 1, 32>}, {pipeline_mode = #tpu.pipeline_mode<synchronous>, transform_indices = @transform_11, window_bounds = array<i64: 32, 32>}, {pipeline_mode = #tpu.pipeline_mode<synchronous>, transform_indices = @transform_12, window_bounds = array<i64: 32, 32>}, {transform_indices = @transform_13, window_bounds = array<i64: 1, 8, 32>}]} {
    %c8_i32 = arith.constant 8 : i32
    %0 = arith.muli %arg1, %c8_i32 : i32
    %1 = tpu.assume_multiple %0, 8 : i32
    %c0 = arith.constant 0 : index
    %c0_0 = arith.constant 0 : index
    %c0_1 = arith.constant 0 : index
    %2 = vector.load %arg2[%c0, %c0_0, %c0_1] : memref<1x16x32xf32, #tpu.memory_space<vmem>>, vector<1x16x32xf32>
    %3 = vector.shape_cast %2 : vector<1x16x32xf32> to vector<16x32xf32>
    %c0_2 = arith.constant 0 : index
    %c0_3 = arith.constant 0 : index
    %4 = vector.load %arg9[%c0_2, %c0_3] : memref<1x32xf32, #tpu.memory_space<vmem>>, vector<1x32xf32>
    %c0_4 = arith.constant 0 : index
    %c0_5 = arith.constant 0 : index
    %5 = vector.load %arg10[%c0_4, %c0_5] : memref<1x32xf32, #tpu.memory_space<vmem>>, vector<1x32xf32>
    %cst = arith.constant dense<0.000000e+00> : vector<16xf32>
    %6 = vector.multi_reduction <add>, %3, %cst [1] : vector<16x32xf32> to vector<16xf32>
    %7 = vector.shape_cast %6 : vector<16xf32> to vector<16x1xf32>
    %cst_6 = arith.constant 3.200000e+01 : f32
    %8 = vector.broadcast %cst_6 : f32 to vector<16x1xf32>
    %9 = arith.divf %7, %8 : vector<16x1xf32>
    %10 = vector.broadcast %9 : vector<16x1xf32> to vector<16x32xf32>
    %11 = arith.subf %3, %10 : vector<16x32xf32>
    %12 = arith.mulf %11, %11 : vector<16x32xf32>
    %cst_7 = arith.constant dense<0.000000e+00> : vector<16xf32>
    %13 = vector.multi_reduction <add>, %12, %cst_7 [1] : vector<16x32xf32> to vector<16xf32>
    %14 = vector.shape_cast %13 : vector<16xf32> to vector<16x1xf32>
    %cst_8 = arith.constant 3.200000e+01 : f32
    %15 = vector.broadcast %cst_8 : f32 to vector<16x1xf32>
    %16 = arith.divf %14, %15 : vector<16x1xf32>
    %17 = vector.broadcast %9 : vector<16x1xf32> to vector<16x32xf32>
    %18 = arith.subf %3, %17 : vector<16x32xf32>
    %cst_9 = arith.constant 9.99999974E-6 : f32
    %19 = vector.broadcast %cst_9 : f32 to vector<16x1xf32>
    %20 = arith.addf %16, %19 : vector<16x1xf32>
    %21 = math.rsqrt %20 : vector<16x1xf32>
    %22 = vector.broadcast %21 : vector<16x1xf32> to vector<16x32xf32>
    %23 = arith.mulf %18, %22 : vector<16x32xf32>
    %24 = vector.broadcast %4 : vector<1x32xf32> to vector<16x32xf32>
    %25 = arith.mulf %23, %24 : vector<16x32xf32>
    %26 = vector.broadcast %5 : vector<1x32xf32> to vector<16x32xf32>
    %27 = arith.addf %25, %26 : vector<16x32xf32>
    %c0_10 = arith.constant 0 : index
    %28 = arith.index_cast %1 : i32 to index
    %c0_11 = arith.constant 0 : index
    %29 = vector.load %arg2[%c0_10, %28, %c0_11] : memref<1x16x32xf32, #tpu.memory_space<vmem>>, vector<1x8x32xf32>
    %30 = vector.shape_cast %29 : vector<1x8x32xf32> to vector<8x32xf32>
    %c0_12 = arith.constant 0 : index
    %c0_13 = arith.constant 0 : index
    %31 = vector.load %arg9[%c0_12, %c0_13] : memref<1x32xf32, #tpu.memory_space<vmem>>, vector<1x32xf32>
    %c0_14 = arith.constant 0 : index
    %c0_15 = arith.constant 0 : index
    %32 = vector.load %arg10[%c0_14, %c0_15] : memref<1x32xf32, #tpu.memory_space<vmem>>, vector<1x32xf32>
    %cst_16 = arith.constant dense<0.000000e+00> : vector<8xf32>
    %33 = vector.multi_reduction <add>, %30, %cst_16 [1] : vector<8x32xf32> to vector<8xf32>
    %34 = vector.shape_cast %33 : vector<8xf32> to vector<8x1xf32>
    %cst_17 = arith.constant 3.200000e+01 : f32
    %35 = vector.broadcast %cst_17 : f32 to vector<8x1xf32>
    %36 = arith.divf %34, %35 : vector<8x1xf32>
    %37 = vector.broadcast %36 : vector<8x1xf32> to vector<8x32xf32>
    %38 = arith.subf %30, %37 : vector<8x32xf32>
    %39 = arith.mulf %38, %38 : vector<8x32xf32>
    %cst_18 = arith.constant dense<0.000000e+00> : vector<8xf32>
    %40 = vector.multi_reduction <add>, %39, %cst_18 [1] : vector<8x32xf32> to vector<8xf32>
    %41 = vector.shape_cast %40 : vector<8xf32> to vector<8x1xf32>
    %cst_19 = arith.constant 3.200000e+01 : f32
    %42 = vector.broadcast %cst_19 : f32 to vector<8x1xf32>
    %43 = arith.divf %41, %42 : vector<8x1xf32>
    %44 = vector.broadcast %36 : vector<8x1xf32> to vector<8x32xf32>
    %45 = arith.subf %30, %44 : vector<8x32xf32>
    %cst_20 = arith.constant 9.99999974E-6 : f32
    %46 = vector.broadcast %cst_20 : f32 to vector<8x1xf32>
    %47 = arith.addf %43, %46 : vector<8x1xf32>
    %48 = math.rsqrt %47 : vector<8x1xf32>
    %49 = vector.broadcast %48 : vector<8x1xf32> to vector<8x32xf32>
    %50 = arith.mulf %45, %49 : vector<8x32xf32>
    %51 = vector.broadcast %31 : vector<1x32xf32> to vector<8x32xf32>
    %52 = arith.mulf %50, %51 : vector<8x32xf32>
    %53 = vector.broadcast %32 : vector<1x32xf32> to vector<8x32xf32>
    %54 = arith.addf %52, %53 : vector<8x32xf32>
    %55 = arith.truncf %27 : vector<16x32xf32> to vector<16x32xbf16>
    %c0_21 = arith.constant 0 : index
    %c0_22 = arith.constant 0 : index
    %56 = vector.load %arg5[%c0_21, %c0_22] : memref<32x64xbf16, #tpu.memory_space<vmem>>, vector<32x64xbf16>
    %cst_23 = arith.constant dense<0.000000e+00> : vector<16x64xf32>
    %57 = tpu.matmul %55, %56, %cst_23 {dimension_numbers = #tpu.dot_dimension_numbers<[1], [0], [0], [1], [0, 0, 1, 1], [], []>} : vector<16x32xbf16>, vector<32x64xbf16>, vector<16x64xf32> -> vector<16x64xf32>
    %c0_24 = arith.constant 0 : index
    %c0_25 = arith.constant 0 : index
    %58 = vector.load %arg6[%c0_24, %c0_25] : memref<1x64xf32, #tpu.memory_space<vmem>>, vector<1x64xf32>
    %59 = vector.broadcast %58 : vector<1x64xf32> to vector<16x64xf32>
    %60 = arith.addf %57, %59 : vector<16x64xf32>
    %61 = arith.truncf %54 : vector<8x32xf32> to vector<8x32xbf16>
    %c0_26 = arith.constant 0 : index
    %c0_27 = arith.constant 0 : index
    %62 = vector.load %arg3[%c0_26, %c0_27] : memref<32x32xbf16, #tpu.memory_space<vmem>>, vector<32x32xbf16>
    %cst_28 = arith.constant dense<0.000000e+00> : vector<8x32xf32>
    %63 = tpu.matmul %61, %62, %cst_28 {dimension_numbers = #tpu.dot_dimension_numbers<[1], [0], [0], [1], [0, 0, 1, 1], [], []>} : vector<8x32xbf16>, vector<32x32xbf16>, vector<8x32xf32> -> vector<8x32xf32>
    %c0_29 = arith.constant 0 : index
    %c0_30 = arith.constant 0 : index
    %64 = vector.load %arg4[%c0_29, %c0_30] : memref<1x32xf32, #tpu.memory_space<vmem>>, vector<1x32xf32>
    %65 = vector.broadcast %64 : vector<1x32xf32> to vector<8x32xf32>
    %66 = arith.addf %63, %65 : vector<8x32xf32>
    %67 = arith.truncf %66 : vector<8x32xf32> to vector<8x32xbf16>
    %68 = vector.extract_strided_slice %60 {offsets = [0, 0], sizes = [16, 32], strides = [1, 1]} : vector<16x64xf32> to vector<16x32xf32>
    %69 = arith.truncf %68 : vector<16x32xf32> to vector<16x32xbf16>
    %70 = vector.extract_strided_slice %60 {offsets = [0, 32], sizes = [16, 32], strides = [1, 1]} : vector<16x64xf32> to vector<16x32xf32>
    %71 = arith.truncf %70 : vector<16x32xf32> to vector<16x32xbf16>
    %72 = vector.extract_strided_slice %67 {offsets = [0, 0], sizes = [8, 8], strides = [1, 1]} : vector<8x32xbf16> to vector<8x8xbf16>
    %73 = vector.extract_strided_slice %69 {offsets = [0, 0], sizes = [16, 8], strides = [1, 1]} : vector<16x32xbf16> to vector<16x8xbf16>
    %cst_31 = arith.constant dense<0.000000e+00> : vector<8x16xf32>
    %74 = tpu.matmul %72, %73, %cst_31 {dimension_numbers = #tpu.dot_dimension_numbers<[1], [1], [0], [0], [0, 0, 1, 0], [], []>} : vector<8x8xbf16>, vector<16x8xbf16>, vector<8x16xf32> -> vector<8x16xf32>
    %cst_32 = arith.constant dense<0xFF800000> : vector<8xf32>
    %75 = vector.multi_reduction <maximumf>, %74, %cst_32 [1] : vector<8x16xf32> to vector<8xf32>
    %76 = vector.shape_cast %75 : vector<8xf32> to vector<8x1xf32>
    %77 = vector.broadcast %76 : vector<8x1xf32> to vector<8x16xf32>
    %78 = arith.subf %74, %77 : vector<8x16xf32>
    %79 = math.exp %78 : vector<8x16xf32>
    %cst_33 = arith.constant dense<0.000000e+00> : vector<8xf32>
    %80 = vector.multi_reduction <add>, %79, %cst_33 [1] : vector<8x16xf32> to vector<8xf32>
    %81 = vector.shape_cast %80 : vector<8xf32> to vector<8x1xf32>
    %82 = tpu.reciprocal %81 : vector<8x1xf32> -> vector<8x1xf32>
    %83 = vector.broadcast %82 : vector<8x1xf32> to vector<8x16xf32>
    %84 = arith.mulf %79, %83 : vector<8x16xf32>
    %85 = arith.truncf %84 : vector<8x16xf32> to vector<8x16xbf16>
    %86 = vector.extract_strided_slice %71 {offsets = [0, 0], sizes = [16, 8], strides = [1, 1]} : vector<16x32xbf16> to vector<16x8xbf16>
    %cst_34 = arith.constant dense<0.000000e+00> : vector<8x8xf32>
    %87 = tpu.matmul %85, %86, %cst_34 {dimension_numbers = #tpu.dot_dimension_numbers<[1], [0], [0], [1], [0, 0, 1, 1], [], []>} : vector<8x16xbf16>, vector<16x8xbf16>, vector<8x8xf32> -> vector<8x8xf32>
    %88 = vector.extract_strided_slice %67 {offsets = [0, 8], sizes = [8, 8], strides = [1, 1]} : vector<8x32xbf16> to vector<8x8xbf16>
    %89 = vector.extract_strided_slice %69 {offsets = [0, 8], sizes = [16, 8], strides = [1, 1]} : vector<16x32xbf16> to vector<16x8xbf16>
    %cst_35 = arith.constant dense<0.000000e+00> : vector<8x16xf32>
    %90 = tpu.matmul %88, %89, %cst_35 {dimension_numbers = #tpu.dot_dimension_numbers<[1], [1], [0], [0], [0, 0, 1, 0], [], []>} : vector<8x8xbf16>, vector<16x8xbf16>, vector<8x16xf32> -> vector<8x16xf32>
    %cst_36 = arith.constant dense<0xFF800000> : vector<8xf32>
    %91 = vector.multi_reduction <maximumf>, %90, %cst_36 [1] : vector<8x16xf32> to vector<8xf32>
    %92 = vector.shape_cast %91 : vector<8xf32> to vector<8x1xf32>
    %93 = vector.broadcast %92 : vector<8x1xf32> to vector<8x16xf32>
    %94 = arith.subf %90, %93 : vector<8x16xf32>
    %95 = math.exp %94 : vector<8x16xf32>
    %cst_37 = arith.constant dense<0.000000e+00> : vector<8xf32>
    %96 = vector.multi_reduction <add>, %95, %cst_37 [1] : vector<8x16xf32> to vector<8xf32>
    %97 = vector.shape_cast %96 : vector<8xf32> to vector<8x1xf32>
    %98 = tpu.reciprocal %97 : vector<8x1xf32> -> vector<8x1xf32>
    %99 = vector.broadcast %98 : vector<8x1xf32> to vector<8x16xf32>
    %100 = arith.mulf %95, %99 : vector<8x16xf32>
    %101 = arith.truncf %100 : vector<8x16xf32> to vector<8x16xbf16>
    %102 = vector.extract_strided_slice %71 {offsets = [0, 8], sizes = [16, 8], strides = [1, 1]} : vector<16x32xbf16> to vector<16x8xbf16>
    %cst_38 = arith.constant dense<0.000000e+00> : vector<8x8xf32>
    %103 = tpu.matmul %101, %102, %cst_38 {dimension_numbers = #tpu.dot_dimension_numbers<[1], [0], [0], [1], [0, 0, 1, 1], [], []>} : vector<8x16xbf16>, vector<16x8xbf16>, vector<8x8xf32> -> vector<8x8xf32>
    %104 = vector.extract_strided_slice %67 {offsets = [0, 16], sizes = [8, 8], strides = [1, 1]} : vector<8x32xbf16> to vector<8x8xbf16>
    %105 = vector.extract_strided_slice %69 {offsets = [0, 16], sizes = [16, 8], strides = [1, 1]} : vector<16x32xbf16> to vector<16x8xbf16>
    %cst_39 = arith.constant dense<0.000000e+00> : vector<8x16xf32>
    %106 = tpu.matmul %104, %105, %cst_39 {dimension_numbers = #tpu.dot_dimension_numbers<[1], [1], [0], [0], [0, 0, 1, 0], [], []>} : vector<8x8xbf16>, vector<16x8xbf16>, vector<8x16xf32> -> vector<8x16xf32>
    %cst_40 = arith.constant dense<0xFF800000> : vector<8xf32>
    %107 = vector.multi_reduction <maximumf>, %106, %cst_40 [1] : vector<8x16xf32> to vector<8xf32>
    %108 = vector.shape_cast %107 : vector<8xf32> to vector<8x1xf32>
    %109 = vector.broadcast %108 : vector<8x1xf32> to vector<8x16xf32>
    %110 = arith.subf %106, %109 : vector<8x16xf32>
    %111 = math.exp %110 : vector<8x16xf32>
    %cst_41 = arith.constant dense<0.000000e+00> : vector<8xf32>
    %112 = vector.multi_reduction <add>, %111, %cst_41 [1] : vector<8x16xf32> to vector<8xf32>
    %113 = vector.shape_cast %112 : vector<8xf32> to vector<8x1xf32>
    %114 = tpu.reciprocal %113 : vector<8x1xf32> -> vector<8x1xf32>
    %115 = vector.broadcast %114 : vector<8x1xf32> to vector<8x16xf32>
    %116 = arith.mulf %111, %115 : vector<8x16xf32>
    %117 = arith.truncf %116 : vector<8x16xf32> to vector<8x16xbf16>
    %118 = vector.extract_strided_slice %71 {offsets = [0, 16], sizes = [16, 8], strides = [1, 1]} : vector<16x32xbf16> to vector<16x8xbf16>
    %cst_42 = arith.constant dense<0.000000e+00> : vector<8x8xf32>
    %119 = tpu.matmul %117, %118, %cst_42 {dimension_numbers = #tpu.dot_dimension_numbers<[1], [0], [0], [1], [0, 0, 1, 1], [], []>} : vector<8x16xbf16>, vector<16x8xbf16>, vector<8x8xf32> -> vector<8x8xf32>
    %120 = vector.extract_strided_slice %67 {offsets = [0, 24], sizes = [8, 8], strides = [1, 1]} : vector<8x32xbf16> to vector<8x8xbf16>
    %121 = vector.extract_strided_slice %69 {offsets = [0, 24], sizes = [16, 8], strides = [1, 1]} : vector<16x32xbf16> to vector<16x8xbf16>
    %cst_43 = arith.constant dense<0.000000e+00> : vector<8x16xf32>
    %122 = tpu.matmul %120, %121, %cst_43 {dimension_numbers = #tpu.dot_dimension_numbers<[1], [1], [0], [0], [0, 0, 1, 0], [], []>} : vector<8x8xbf16>, vector<16x8xbf16>, vector<8x16xf32> -> vector<8x16xf32>
    %cst_44 = arith.constant dense<0xFF800000> : vector<8xf32>
    %123 = vector.multi_reduction <maximumf>, %122, %cst_44 [1] : vector<8x16xf32> to vector<8xf32>
    %124 = vector.shape_cast %123 : vector<8xf32> to vector<8x1xf32>
    %125 = vector.broadcast %124 : vector<8x1xf32> to vector<8x16xf32>
    %126 = arith.subf %122, %125 : vector<8x16xf32>
    %127 = math.exp %126 : vector<8x16xf32>
    %cst_45 = arith.constant dense<0.000000e+00> : vector<8xf32>
    %128 = vector.multi_reduction <add>, %127, %cst_45 [1] : vector<8x16xf32> to vector<8xf32>
    %129 = vector.shape_cast %128 : vector<8xf32> to vector<8x1xf32>
    %130 = tpu.reciprocal %129 : vector<8x1xf32> -> vector<8x1xf32>
    %131 = vector.broadcast %130 : vector<8x1xf32> to vector<8x16xf32>
    %132 = arith.mulf %127, %131 : vector<8x16xf32>
    %133 = arith.truncf %132 : vector<8x16xf32> to vector<8x16xbf16>
    %134 = vector.extract_strided_slice %71 {offsets = [0, 24], sizes = [16, 8], strides = [1, 1]} : vector<16x32xbf16> to vector<16x8xbf16>
    %cst_46 = arith.constant dense<0.000000e+00> : vector<8x8xf32>
    %135 = tpu.matmul %133, %134, %cst_46 {dimension_numbers = #tpu.dot_dimension_numbers<[1], [0], [0], [1], [0, 0, 1, 1], [], []>} : vector<8x16xbf16>, vector<16x8xbf16>, vector<8x8xf32> -> vector<8x8xf32>
    %136 = tpu.concatenate %87, %103, %119, %135 in 1 : vector<8x8xf32>, vector<8x8xf32>, vector<8x8xf32>, vector<8x8xf32> -> vector<8x32xf32>
    %137 = arith.truncf %136 : vector<8x32xf32> to vector<8x32xbf16>
    %c0_47 = arith.constant 0 : index
    %c0_48 = arith.constant 0 : index
    %138 = vector.load %arg7[%c0_47, %c0_48] : memref<32x32xbf16, #tpu.memory_space<vmem>>, vector<32x32xbf16>
    %cst_49 = arith.constant dense<0.000000e+00> : vector<8x32xf32>
    %139 = tpu.matmul %137, %138, %cst_49 {dimension_numbers = #tpu.dot_dimension_numbers<[1], [0], [0], [1], [0, 0, 1, 1], [], []>} : vector<8x32xbf16>, vector<32x32xbf16>, vector<8x32xf32> -> vector<8x32xf32>
    %c0_50 = arith.constant 0 : index
    %c0_51 = arith.constant 0 : index
    %140 = vector.load %arg8[%c0_50, %c0_51] : memref<1x32xf32, #tpu.memory_space<vmem>>, vector<1x32xf32>
    %141 = vector.broadcast %140 : vector<1x32xf32> to vector<8x32xf32>
    %142 = arith.addf %139, %141 : vector<8x32xf32>
    %143 = arith.addf %142, %30 : vector<8x32xf32>
    %c0_52 = arith.constant 0 : index
    %c0_53 = arith.constant 0 : index
    %144 = vector.load %arg11[%c0_52, %c0_53] : memref<1x32xf32, #tpu.memory_space<vmem>>, vector<1x32xf32>
    %c0_54 = arith.constant 0 : index
    %c0_55 = arith.constant 0 : index
    %145 = vector.load %arg12[%c0_54, %c0_55] : memref<1x32xf32, #tpu.memory_space<vmem>>, vector<1x32xf32>
    %cst_56 = arith.constant dense<0.000000e+00> : vector<8xf32>
    %146 = vector.multi_reduction <add>, %143, %cst_56 [1] : vector<8x32xf32> to vector<8xf32>
    %147 = vector.shape_cast %146 : vector<8xf32> to vector<8x1xf32>
    %cst_57 = arith.constant 3.200000e+01 : f32
    %148 = vector.broadcast %cst_57 : f32 to vector<8x1xf32>
    %149 = arith.divf %147, %148 : vector<8x1xf32>
    %150 = vector.broadcast %149 : vector<8x1xf32> to vector<8x32xf32>
    %151 = arith.subf %143, %150 : vector<8x32xf32>
    %152 = arith.mulf %151, %151 : vector<8x32xf32>
    %cst_58 = arith.constant dense<0.000000e+00> : vector<8xf32>
    %153 = vector.multi_reduction <add>, %152, %cst_58 [1] : vector<8x32xf32> to vector<8xf32>
    %154 = vector.shape_cast %153 : vector<8xf32> to vector<8x1xf32>
    %cst_59 = arith.constant 3.200000e+01 : f32
    %155 = vector.broadcast %cst_59 : f32 to vector<8x1xf32>
    %156 = arith.divf %154, %155 : vector<8x1xf32>
    %157 = vector.broadcast %149 : vector<8x1xf32> to vector<8x32xf32>
    %158 = arith.subf %143, %157 : vector<8x32xf32>
    %cst_60 = arith.constant 9.99999974E-6 : f32
    %159 = vector.broadcast %cst_60 : f32 to vector<8x1xf32>
    %160 = arith.addf %156, %159 : vector<8x1xf32>
    %161 = math.rsqrt %160 : vector<8x1xf32>
    %162 = vector.broadcast %161 : vector<8x1xf32> to vector<8x32xf32>
    %163 = arith.mulf %158, %162 : vector<8x32xf32>
    %164 = vector.broadcast %144 : vector<1x32xf32> to vector<8x32xf32>
    %165 = arith.mulf %163, %164 : vector<8x32xf32>
    %166 = vector.broadcast %145 : vector<1x32xf32> to vector<8x32xf32>
    %167 = arith.addf %165, %166 : vector<8x32xf32>
    %168 = arith.truncf %167 : vector<8x32xf32> to vector<8x32xbf16>
    %c0_61 = arith.constant 0 : index
    %c0_62 = arith.constant 0 : index
    %169 = vector.load %arg13[%c0_61, %c0_62] : memref<32x32xbf16, #tpu.memory_space<vmem>>, vector<32x32xbf16>
    %cst_63 = arith.constant dense<0.000000e+00> : vector<8x32xf32>
    %170 = tpu.matmul %168, %169, %cst_63 {dimension_numbers = #tpu.dot_dimension_numbers<[1], [0], [0], [1], [0, 0, 1, 1], [], []>} : vector<8x32xbf16>, vector<32x32xbf16>, vector<8x32xf32> -> vector<8x32xf32>
    %171 = arith.truncf %170 : vector<8x32xf32> to vector<8x32xbf16>
    %c0_64 = arith.constant 0 : index
    %c0_65 = arith.constant 0 : index
    %172 = vector.load %arg14[%c0_64, %c0_65] : memref<32x32xbf16, #tpu.memory_space<vmem>>, vector<32x32xbf16>
    %cst_66 = arith.constant dense<0.000000e+00> : vector<8x32xf32>
    %173 = tpu.matmul %171, %172, %cst_66 {dimension_numbers = #tpu.dot_dimension_numbers<[1], [0], [0], [1], [0, 0, 1, 1], [], []>} : vector<8x32xbf16>, vector<32x32xbf16>, vector<8x32xf32> -> vector<8x32xf32>
    %174 = arith.addf %173, %167 : vector<8x32xf32>
    %c0_67 = arith.constant 0 : index
    %c0_68 = arith.constant 0 : index
    %c0_69 = arith.constant 0 : index
    %175 = vector.load %arg15[%c0_67, %c0_68, %c0_69] : memref<1x8x32xf32, #tpu.memory_space<vmem>>, vector<1x8x32xf32>
    %176 = vector.shape_cast %175 : vector<1x8x32xf32> to vector<8x32xf32>
    %177 = vector.shape_cast %174 : vector<8x32xf32> to vector<1x8x32xf32>
    tpu.vector_store %arg15[%c0_67, %c0_68, %c0_69], %177 {strides = array<i32>} : memref<1x8x32xf32, #tpu.memory_space<vmem>>, vector<1x8x32xf32>,
    return
  }
  func.func @transform_0(%arg0: i32, %arg1: i32) -> (i32, i32, i32) {
    %c0_i32 = arith.constant 0 : i32
    %c0_i32_0 = arith.constant 0 : i32
    %c0_i32_1 = arith.constant 0 : i32
    return %arg0, %c0_i32, %c0_i32_0 : i32, i32, i32
  }
  func.func @transform_1(%arg0: i32, %arg1: i32) -> (i32, i32) {
    %c0_i32 = arith.constant 0 : i32
    %c0_i32_0 = arith.constant 0 : i32
    %c0_i32_1 = arith.constant 0 : i32
    return %c0_i32, %c0_i32_0 : i32, i32
  }
  func.func @transform_2(%arg0: i32, %arg1: i32) -> (i32, i32) {
    %c0_i32 = arith.constant 0 : i32
    %c0_i32_0 = arith.constant 0 : i32
    %c0_i32_1 = arith.constant 0 : i32
    return %c0_i32, %c0_i32_0 : i32, i32
  }
  func.func @transform_3(%arg0: i32, %arg1: i32) -> (i32, i32) {
    %c0_i32 = arith.constant 0 : i32
    %c0_i32_0 = arith.constant 0 : i32
    %c0_i32_1 = arith.constant 0 : i32
    return %c0_i32, %c0_i32_0 : i32, i32
  }
  func.func @transform_4(%arg0: i32, %arg1: i32) -> (i32, i32) {
    %c0_i32 = arith.constant 0 : i32
    %c0_i32_0 = arith.constant 0 : i32
    %c0_i32_1 = arith.constant 0 : i32
    return %c0_i32, %c0_i32_0 : i32, i32
  }
  func.func @transform_5(%arg0: i32, %arg1: i32) -> (i32, i32) {
    %c0_i32 = arith.constant 0 : i32
    %c0_i32_0 = arith.constant 0 : i32
    %c0_i32_1 = arith.constant 0 : i32
    return %c0_i32, %c0_i32_0 : i32, i32
  }
  func.func @transform_6(%arg0: i32, %arg1: i32) -> (i32, i32) {
    %c0_i32 = arith.constant 0 : i32
    %c0_i32_0 = arith.constant 0 : i32
    %c0_i32_1 = arith.constant 0 : i32
    return %c0_i32, %c0_i32_0 : i32, i32
  }
  func.func @transform_7(%arg0: i32, %arg1: i32) -> (i32, i32) {
    %c0_i32 = arith.constant 0 : i32
    %c0_i32_0 = arith.constant 0 : i32
    %c0_i32_1 = arith.constant 0 : i32
    return %c0_i32, %c0_i32_0 : i32, i32
  }
  func.func @transform_8(%arg0: i32, %arg1: i32) -> (i32, i32) {
    %c0_i32 = arith.constant 0 : i32
    %c0_i32_0 = arith.constant 0 : i32
    %c0_i32_1 = arith.constant 0 : i32
    return %c0_i32, %c0_i32_0 : i32, i32
  }
  func.func @transform_9(%arg0: i32, %arg1: i32) -> (i32, i32) {
    %c0_i32 = arith.constant 0 : i32
    %c0_i32_0 = arith.constant 0 : i32
    %c0_i32_1 = arith.constant 0 : i32
    return %c0_i32, %c0_i32_0 : i32, i32
  }
  func.func @transform_10(%arg0: i32, %arg1: i32) -> (i32, i32) {
    %c0_i32 = arith.constant 0 : i32
    %c0_i32_0 = arith.constant 0 : i32
    %c0_i32_1 = arith.constant 0 : i32
    return %c0_i32, %c0_i32_0 : i32, i32
  }
  func.func @transform_11(%arg0: i32, %arg1: i32) -> (i32, i32) {
    %c0_i32 = arith.constant 0 : i32
    %c0_i32_0 = arith.constant 0 : i32
    %c0_i32_1 = arith.constant 0 : i32
    return %c0_i32, %c0_i32_0 : i32, i32
  }
  func.func @transform_12(%arg0: i32, %arg1: i32) -> (i32, i32) {
    %c0_i32 = arith.constant 0 : i32
    %c0_i32_0 = arith.constant 0 : i32
    %c0_i32_1 = arith.constant 0 : i32
    return %c0_i32, %c0_i32_0 : i32, i32
  }
  func.func @transform_13(%arg0: i32, %arg1: i32) -> (i32, i32, i32) {
    %c0_i32 = arith.constant 0 : i32
    %c0_i32_0 = arith.constant 0 : i32
    return %arg0, %arg1, %c0_i32 : i32, i32, i32
  }
}

module attributes {stable_mosaic.version = 11 : i64} {
  func.func @transformer_layer_kernel(%arg0: i32, %arg1: i32, %arg2: memref<1x16x32xf32, #tpu.memory_space<vmem>>, %arg3: memref<32x32xbf16, #tpu.memory_space<vmem>>, %arg4: memref<1x32xf32, #tpu.memory_space<vmem>>, %arg5: memref<32x64xbf16, #tpu.memory_space<vmem>>, %arg6: memref<1x64xf32, #tpu.memory_space<vmem>>, %arg7: memref<32x32xbf16, #tpu.memory_space<vmem>>, %arg8: memref<1x32xf32, #tpu.memory_space<vmem>>, %arg9: memref<1x32xf32, #tpu.memory_space<vmem>>, %arg10: memref<1x32xf32, #tpu.memory_space<vmem>>, %arg11: memref<1x32xf32, #tpu.memory_space<vmem>>, %arg12: memref<1x32xf32, #tpu.memory_space<vmem>>, %arg13: memref<32x32xbf16, #tpu.memory_space<vmem>>, %arg14: memref<32x32xbf16, #tpu.memory_space<vmem>>, %arg15: memref<1x8x32xf32, #tpu.memory_space<vmem>>) attributes {dimension_semantics = [#tpu.dimension_semantics<parallel>, #tpu.dimension_semantics<parallel>], iteration_bounds = array<i64: 2, 2>, scalar_prefetch = 0 : i64, scratch_operands = 0 : i64, tpu.core_type = #tpu.core_type<tc>, window_params = [{transform_indices = @transform_0, window_bounds = array<i64: 1, 16, 32>}, {pipeline_mode = #tpu.pipeline_mode<synchronous>, transform_indices = @transform_1, window_bounds = array<i64: 32, 32>}, {pipeline_mode = #tpu.pipeline_mode<synchronous>, transform_indices = @transform_2, window_bounds = array<i64: 1, 32>}, {pipeline_mode = #tpu.pipeline_mode<synchronous>, transform_indices = @transform_3, window_bounds = array<i64: 32, 64>}, {pipeline_mode = #tpu.pipeline_mode<synchronous>, transform_indices = @transform_4, window_bounds = array<i64: 1, 64>}, {pipeline_mode = #tpu.pipeline_mode<synchronous>, transform_indices = @transform_5, window_bounds = array<i64: 32, 32>}, {pipeline_mode = #tpu.pipeline_mode<synchronous>, transform_indices = @transform_6, window_bounds = array<i64: 1, 32>}, {pipeline_mode = #tpu.pipeline_mode<synchronous>, transform_indices = @transform_7, window_bounds = array<i64: 1, 32>}, {pipeline_mode = #tpu.pipeline_mode<synchronous>, transform_indices = @transform_8, window_bounds = array<i64: 1, 32>}, {pipeline_mode = #tpu.pipeline_mode<synchronous>, transform_indices = @transform_9, window_bounds = array<i64: 1, 32>}, {pipeline_mode = #tpu.pipeline_mode<synchronous>, transform_indices = @transform_10, window_bounds = array<i64: 1, 32>}, {pipeline_mode = #tpu.pipeline_mode<synchronous>, transform_indices = @transform_11, window_bounds = array<i64: 32, 32>}, {pipeline_mode = #tpu.pipeline_mode<synchronous>, transform_indices = @transform_12, window_bounds = array<i64: 32, 32>}, {transform_indices = @transform_13, window_bounds = array<i64: 1, 8, 32>}]} {
    %c8_i32 = arith.constant 8 : i32
    %0 = arith.muli %arg1, %c8_i32 : i32
    %1 = tpu.assume_multiple %0, 8 : i32
    %c0 = arith.constant 0 : index
    %c0_0 = arith.constant 0 : index
    %c0_1 = arith.constant 0 : index
    %2 = vector.load %arg2[%c0, %c0_0, %c0_1] : memref<1x16x32xf32, #tpu.memory_space<vmem>>, vector<1x16x32xf32>
    %3 = vector.shape_cast %2 : vector<1x16x32xf32> to vector<16x32xf32>
    %c0_2 = arith.constant 0 : index
    %c0_3 = arith.constant 0 : index
    %4 = vector.load %arg9[%c0_2, %c0_3] : memref<1x32xf32, #tpu.memory_space<vmem>>, vector<1x32xf32>
    %c0_4 = arith.constant 0 : index
    %c0_5 = arith.constant 0 : index
    %5 = vector.load %arg10[%c0_4, %c0_5] : memref<1x32xf32, #tpu.memory_space<vmem>>, vector<1x32xf32>
    %cst = arith.constant dense<0.000000e+00> : vector<16xf32>
    %6 = vector.multi_reduction <add>, %3, %cst [1] : vector<16x32xf32> to vector<16xf32>
    %7 = vector.shape_cast %6 : vector<16xf32> to vector<16x1xf32>
    %cst_6 = arith.constant 3.200000e+01 : f32
    %8 = vector.broadcast %cst_6 : f32 to vector<16x1xf32>
    %9 = arith.divf %7, %8 : vector<16x1xf32>
    %10 = vector.broadcast %9 : vector<16x1xf32> to vector<16x32xf32>
    %11 = arith.subf %3, %10 : vector<16x32xf32>
    %12 = arith.mulf %11, %11 : vector<16x32xf32>
    %cst_7 = arith.constant dense<0.000000e+00> : vector<16xf32>
    %13 = vector.multi_reduction <add>, %12, %cst_7 [1] : vector<16x32xf32> to vector<16xf32>
    %14 = vector.shape_cast %13 : vector<16xf32> to vector<16x1xf32>
    %cst_8 = arith.constant 3.200000e+01 : f32
    %15 = vector.broadcast %cst_8 : f32 to vector<16x1xf32>
    %16 = arith.divf %14, %15 : vector<16x1xf32>
    %17 = vector.broadcast %9 : vector<16x1xf32> to vector<16x32xf32>
    %18 = arith.subf %3, %17 : vector<16x32xf32>
    %cst_9 = arith.constant 9.99999974E-6 : f32
    %19 = vector.broadcast %cst_9 : f32 to vector<16x1xf32>
    %20 = arith.addf %16, %19 : vector<16x1xf32>
    %21 = math.rsqrt %20 : vector<16x1xf32>
    %22 = vector.broadcast %21 : vector<16x1xf32> to vector<16x32xf32>
    %23 = arith.mulf %18, %22 : vector<16x32xf32>
    %24 = vector.broadcast %4 : vector<1x32xf32> to vector<16x32xf32>
    %25 = arith.mulf %23, %24 : vector<16x32xf32>
    %26 = vector.broadcast %5 : vector<1x32xf32> to vector<16x32xf32>
    %27 = arith.addf %25, %26 : vector<16x32xf32>
    %c0_10 = arith.constant 0 : index
    %28 = arith.index_cast %1 : i32 to index
    %c0_11 = arith.constant 0 : index
    %29 = vector.load %arg2[%c0_10, %28, %c0_11] : memref<1x16x32xf32, #tpu.memory_space<vmem>>, vector<1x8x32xf32>
    %30 = vector.shape_cast %29 : vector<1x8x32xf32> to vector<8x32xf32>
    %c0_12 = arith.constant 0 : index
    %c0_13 = arith.constant 0 : index
    %31 = vector.load %arg9[%c0_12, %c0_13] : memref<1x32xf32, #tpu.memory_space<vmem>>, vector<1x32xf32>
    %c0_14 = arith.constant 0 : index
    %c0_15 = arith.constant 0 : index
    %32 = vector.load %arg10[%c0_14, %c0_15] : memref<1x32xf32, #tpu.memory_space<vmem>>, vector<1x32xf32>
    %cst_16 = arith.constant dense<0.000000e+00> : vector<8xf32>
    %33 = vector.multi_reduction <add>, %30, %cst_16 [1] : vector<8x32xf32> to vector<8xf32>
    %34 = vector.shape_cast %33 : vector<8xf32> to vector<8x1xf32>
    %cst_17 = arith.constant 3.200000e+01 : f32
    %35 = vector.broadcast %cst_17 : f32 to vector<8x1xf32>
    %36 = arith.divf %34, %35 : vector<8x1xf32>
    %37 = vector.broadcast %36 : vector<8x1xf32> to vector<8x32xf32>
    %38 = arith.subf %30, %37 : vector<8x32xf32>
    %39 = arith.mulf %38, %38 : vector<8x32xf32>
    %cst_18 = arith.constant dense<0.000000e+00> : vector<8xf32>
    %40 = vector.multi_reduction <add>, %39, %cst_18 [1] : vector<8x32xf32> to vector<8xf32>
    %41 = vector.shape_cast %40 : vector<8xf32> to vector<8x1xf32>
    %cst_19 = arith.constant 3.200000e+01 : f32
    %42 = vector.broadcast %cst_19 : f32 to vector<8x1xf32>
    %43 = arith.divf %41, %42 : vector<8x1xf32>
    %44 = vector.broadcast %36 : vector<8x1xf32> to vector<8x32xf32>
    %45 = arith.subf %30, %44 : vector<8x32xf32>
    %cst_20 = arith.constant 9.99999974E-6 : f32
    %46 = vector.broadcast %cst_20 : f32 to vector<8x1xf32>
    %47 = arith.addf %43, %46 : vector<8x1xf32>
    %48 = math.rsqrt %47 : vector<8x1xf32>
    %49 = vector.broadcast %48 : vector<8x1xf32> to vector<8x32xf32>
    %50 = arith.mulf %45, %49 : vector<8x32xf32>
    %51 = vector.broadcast %31 : vector<1x32xf32> to vector<8x32xf32>
    %52 = arith.mulf %50, %51 : vector<8x32xf32>
    %53 = vector.broadcast %32 : vector<1x32xf32> to vector<8x32xf32>
    %54 = arith.addf %52, %53 : vector<8x32xf32>
    %55 = arith.truncf %27 : vector<16x32xf32> to vector<16x32xbf16>
    %c0_21 = arith.constant 0 : index
    %c0_22 = arith.constant 0 : index
    %56 = vector.load %arg5[%c0_21, %c0_22] : memref<32x64xbf16, #tpu.memory_space<vmem>>, vector<32x64xbf16>
    %cst_23 = arith.constant dense<0.000000e+00> : vector<16x64xf32>
    %57 = tpu.matmul %55, %56, %cst_23 {dimension_numbers = #tpu.dot_dimension_numbers<[1], [0], [0], [1], [0, 0, 1, 1], [], []>} : vector<16x32xbf16>, vector<32x64xbf16>, vector<16x64xf32> -> vector<16x64xf32>
    %c0_24 = arith.constant 0 : index
    %c0_25 = arith.constant 0 : index
    %58 = vector.load %arg6[%c0_24, %c0_25] : memref<1x64xf32, #tpu.memory_space<vmem>>, vector<1x64xf32>
    %59 = vector.broadcast %58 : vector<1x64xf32> to vector<16x64xf32>
    %60 = arith.addf %57, %59 : vector<16x64xf32>
    %61 = arith.truncf %54 : vector<8x32xf32> to vector<8x32xbf16>
    %c0_26 = arith.constant 0 : index
    %c0_27 = arith.constant 0 : index
    %62 = vector.load %arg3[%c0_26, %c0_27] : memref<32x32xbf16, #tpu.memory_space<vmem>>, vector<32x32xbf16>
    %cst_28 = arith.constant dense<0.000000e+00> : vector<8x32xf32>
    %63 = tpu.matmul %61, %62, %cst_28 {dimension_numbers = #tpu.dot_dimension_numbers<[1], [0], [0], [1], [0, 0, 1, 1], [], []>} : vector<8x32xbf16>, vector<32x32xbf16>, vector<8x32xf32> -> vector<8x32xf32>
    %c0_29 = arith.constant 0 : index
    %c0_30 = arith.constant 0 : index
    %64 = vector.load %arg4[%c0_29, %c0_30] : memref<1x32xf32, #tpu.memory_space<vmem>>, vector<1x32xf32>
    %65 = vector.broadcast %64 : vector<1x32xf32> to vector<8x32xf32>
    %66 = arith.addf %63, %65 : vector<8x32xf32>
    %67 = arith.truncf %66 : vector<8x32xf32> to vector<8x32xbf16>
    %68 = vector.extract_strided_slice %60 {offsets = [0, 0], sizes = [16, 32], strides = [1, 1]} : vector<16x64xf32> to vector<16x32xf32>
    %69 = arith.truncf %68 : vector<16x32xf32> to vector<16x32xbf16>
    %70 = vector.extract_strided_slice %60 {offsets = [0, 32], sizes = [16, 32], strides = [1, 1]} : vector<16x64xf32> to vector<16x32xf32>
    %71 = arith.truncf %70 : vector<16x32xf32> to vector<16x32xbf16>
    %72 = vector.extract_strided_slice %67 {offsets = [0, 0], sizes = [8, 8], strides = [1, 1]} : vector<8x32xbf16> to vector<8x8xbf16>
    %73 = vector.extract_strided_slice %69 {offsets = [0, 0], sizes = [16, 8], strides = [1, 1]} : vector<16x32xbf16> to vector<16x8xbf16>
    %cst_31 = arith.constant dense<0.000000e+00> : vector<8x16xf32>
    %74 = tpu.matmul %72, %73, %cst_31 {dimension_numbers = #tpu.dot_dimension_numbers<[1], [1], [0], [0], [0, 0, 1, 0], [], []>} : vector<8x8xbf16>, vector<16x8xbf16>, vector<8x16xf32> -> vector<8x16xf32>
    %cst_32 = arith.constant dense<0xFF800000> : vector<8xf32>
    %75 = vector.multi_reduction <maximumf>, %74, %cst_32 [1] : vector<8x16xf32> to vector<8xf32>
    %76 = vector.shape_cast %75 : vector<8xf32> to vector<8x1xf32>
    %77 = vector.broadcast %76 : vector<8x1xf32> to vector<8x16xf32>
    %78 = arith.subf %74, %77 : vector<8x16xf32>
    %79 = math.exp %78 : vector<8x16xf32>
    %cst_33 = arith.constant dense<0.000000e+00> : vector<8xf32>
    %80 = vector.multi_reduction <add>, %79, %cst_33 [1] : vector<8x16xf32> to vector<8xf32>
    %81 = vector.shape_cast %80 : vector<8xf32> to vector<8x1xf32>
    %82 = tpu.reciprocal %81 : vector<8x1xf32> -> vector<8x1xf32>
    %83 = vector.broadcast %82 : vector<8x1xf32> to vector<8x16xf32>
    %84 = arith.mulf %79, %83 : vector<8x16xf32>
    %85 = arith.truncf %84 : vector<8x16xf32> to vector<8x16xbf16>
    %86 = vector.extract_strided_slice %71 {offsets = [0, 0], sizes = [16, 8], strides = [1, 1]} : vector<16x32xbf16> to vector<16x8xbf16>
    %cst_34 = arith.constant dense<0.000000e+00> : vector<8x8xf32>
    %87 = tpu.matmul %85, %86, %cst_34 {dimension_numbers = #tpu.dot_dimension_numbers<[1], [0], [0], [1], [0, 0, 1, 1], [], []>} : vector<8x16xbf16>, vector<16x8xbf16>, vector<8x8xf32> -> vector<8x8xf32>
    %88 = vector.extract_strided_slice %67 {offsets = [0, 8], sizes = [8, 8], strides = [1, 1]} : vector<8x32xbf16> to vector<8x8xbf16>
    %89 = vector.extract_strided_slice %69 {offsets = [0, 8], sizes = [16, 8], strides = [1, 1]} : vector<16x32xbf16> to vector<16x8xbf16>
    %cst_35 = arith.constant dense<0.000000e+00> : vector<8x16xf32>
    %90 = tpu.matmul %88, %89, %cst_35 {dimension_numbers = #tpu.dot_dimension_numbers<[1], [1], [0], [0], [0, 0, 1, 0], [], []>} : vector<8x8xbf16>, vector<16x8xbf16>, vector<8x16xf32> -> vector<8x16xf32>
    %cst_36 = arith.constant dense<0xFF800000> : vector<8xf32>
    %91 = vector.multi_reduction <maximumf>, %90, %cst_36 [1] : vector<8x16xf32> to vector<8xf32>
    %92 = vector.shape_cast %91 : vector<8xf32> to vector<8x1xf32>
    %93 = vector.broadcast %92 : vector<8x1xf32> to vector<8x16xf32>
    %94 = arith.subf %90, %93 : vector<8x16xf32>
    %95 = math.exp %94 : vector<8x16xf32>
    %cst_37 = arith.constant dense<0.000000e+00> : vector<8xf32>
    %96 = vector.multi_reduction <add>, %95, %cst_37 [1] : vector<8x16xf32> to vector<8xf32>
    %97 = vector.shape_cast %96 : vector<8xf32> to vector<8x1xf32>
    %98 = tpu.reciprocal %97 : vector<8x1xf32> -> vector<8x1xf32>
    %99 = vector.broadcast %98 : vector<8x1xf32> to vector<8x16xf32>
    %100 = arith.mulf %95, %99 : vector<8x16xf32>
    %101 = arith.truncf %100 : vector<8x16xf32> to vector<8x16xbf16>
    %102 = vector.extract_strided_slice %71 {offsets = [0, 8], sizes = [16, 8], strides = [1, 1]} : vector<16x32xbf16> to vector<16x8xbf16>
    %cst_38 = arith.constant dense<0.000000e+00> : vector<8x8xf32>
    %103 = tpu.matmul %101, %102, %cst_38 {dimension_numbers = #tpu.dot_dimension_numbers<[1], [0], [0], [1], [0, 0, 1, 1], [], []>} : vector<8x16xbf16>, vector<16x8xbf16>, vector<8x8xf32> -> vector<8x8xf32>
    %104 = vector.extract_strided_slice %67 {offsets = [0, 16], sizes = [8, 8], strides = [1, 1]} : vector<8x32xbf16> to vector<8x8xbf16>
    %105 = vector.extract_strided_slice %69 {offsets = [0, 16], sizes = [16, 8], strides = [1, 1]} : vector<16x32xbf16> to vector<16x8xbf16>
    %cst_39 = arith.constant dense<0.000000e+00> : vector<8x16xf32>
    %106 = tpu.matmul %104, %105, %cst_39 {dimension_numbers = #tpu.dot_dimension_numbers<[1], [1], [0], [0], [0, 0, 1, 0], [], []>} : vector<8x8xbf16>, vector<16x8xbf16>, vector<8x16xf32> -> vector<8x16xf32>
    %cst_40 = arith.constant dense<0xFF800000> : vector<8xf32>
    %107 = vector.multi_reduction <maximumf>, %106, %cst_40 [1] : vector<8x16xf32> to vector<8xf32>
    %108 = vector.shape_cast %107 : vector<8xf32> to vector<8x1xf32>
    %109 = vector.broadcast %108 : vector<8x1xf32> to vector<8x16xf32>
    %110 = arith.subf %106, %109 : vector<8x16xf32>
    %111 = math.exp %110 : vector<8x16xf32>
    %cst_41 = arith.constant dense<0.000000e+00> : vector<8xf32>
    %112 = vector.multi_reduction <add>, %111, %cst_41 [1] : vector<8x16xf32> to vector<8xf32>
    %113 = vector.shape_cast %112 : vector<8xf32> to vector<8x1xf32>
    %114 = tpu.reciprocal %113 : vector<8x1xf32> -> vector<8x1xf32>
    %115 = vector.broadcast %114 : vector<8x1xf32> to vector<8x16xf32>
    %116 = arith.mulf %111, %115 : vector<8x16xf32>
    %117 = arith.truncf %116 : vector<8x16xf32> to vector<8x16xbf16>
    %118 = vector.extract_strided_slice %71 {offsets = [0, 16], sizes = [16, 8], strides = [1, 1]} : vector<16x32xbf16> to vector<16x8xbf16>
    %cst_42 = arith.constant dense<0.000000e+00> : vector<8x8xf32>
    %119 = tpu.matmul %117, %118, %cst_42 {dimension_numbers = #tpu.dot_dimension_numbers<[1], [0], [0], [1], [0, 0, 1, 1], [], []>} : vector<8x16xbf16>, vector<16x8xbf16>, vector<8x8xf32> -> vector<8x8xf32>
    %120 = vector.extract_strided_slice %67 {offsets = [0, 24], sizes = [8, 8], strides = [1, 1]} : vector<8x32xbf16> to vector<8x8xbf16>
    %121 = vector.extract_strided_slice %69 {offsets = [0, 24], sizes = [16, 8], strides = [1, 1]} : vector<16x32xbf16> to vector<16x8xbf16>
    %cst_43 = arith.constant dense<0.000000e+00> : vector<8x16xf32>
    %122 = tpu.matmul %120, %121, %cst_43 {dimension_numbers = #tpu.dot_dimension_numbers<[1], [1], [0], [0], [0, 0, 1, 0], [], []>} : vector<8x8xbf16>, vector<16x8xbf16>, vector<8x16xf32> -> vector<8x16xf32>
    %cst_44 = arith.constant dense<0xFF800000> : vector<8xf32>
    %123 = vector.multi_reduction <maximumf>, %122, %cst_44 [1] : vector<8x16xf32> to vector<8xf32>
    %124 = vector.shape_cast %123 : vector<8xf32> to vector<8x1xf32>
    %125 = vector.broadcast %124 : vector<8x1xf32> to vector<8x16xf32>
    %126 = arith.subf %122, %125 : vector<8x16xf32>
    %127 = math.exp %126 : vector<8x16xf32>
    %cst_45 = arith.constant dense<0.000000e+00> : vector<8xf32>
    %128 = vector.multi_reduction <add>, %127, %cst_45 [1] : vector<8x16xf32> to vector<8xf32>
    %129 = vector.shape_cast %128 : vector<8xf32> to vector<8x1xf32>
    %130 = tpu.reciprocal %129 : vector<8x1xf32> -> vector<8x1xf32>
    %131 = vector.broadcast %130 : vector<8x1xf32> to vector<8x16xf32>
    %132 = arith.mulf %127, %131 : vector<8x16xf32>
    %133 = arith.truncf %132 : vector<8x16xf32> to vector<8x16xbf16>
    %134 = vector.extract_strided_slice %71 {offsets = [0, 24], sizes = [16, 8], strides = [1, 1]} : vector<16x32xbf16> to vector<16x8xbf16>
    %cst_46 = arith.constant dense<0.000000e+00> : vector<8x8xf32>
    %135 = tpu.matmul %133, %134, %cst_46 {dimension_numbers = #tpu.dot_dimension_numbers<[1], [0], [0], [1], [0, 0, 1, 1], [], []>} : vector<8x16xbf16>, vector<16x8xbf16>, vector<8x8xf32> -> vector<8x8xf32>
    %136 = tpu.concatenate %87, %103, %119, %135 in 1 : vector<8x8xf32>, vector<8x8xf32>, vector<8x8xf32>, vector<8x8xf32> -> vector<8x32xf32>
    %137 = arith.truncf %136 : vector<8x32xf32> to vector<8x32xbf16>
    %c0_47 = arith.constant 0 : index
    %c0_48 = arith.constant 0 : index
    %138 = vector.load %arg7[%c0_47, %c0_48] : memref<32x32xbf16, #tpu.memory_space<vmem>>, vector<32x32xbf16>
    %cst_49 = arith.constant dense<0.000000e+00> : vector<8x32xf32>
    %139 = tpu.matmul %137, %138, %cst_49 {dimension_numbers = #tpu.dot_dimension_numbers<[1], [0], [0], [1], [0, 0, 1, 1], [], []>} : vector<8x32xbf16>, vector<32x32xbf16>, vector<8x32xf32> -> vector<8x32xf32>
    %c0_50 = arith.constant 0 : index
    %c0_51 = arith.constant 0 : index
    %140 = vector.load %arg8[%c0_50, %c0_51] : memref<1x32xf32, #tpu.memory_space<vmem>>, vector<1x32xf32>
    %141 = vector.broadcast %140 : vector<1x32xf32> to vector<8x32xf32>
    %142 = arith.addf %139, %141 : vector<8x32xf32>
    %143 = arith.addf %142, %30 : vector<8x32xf32>
    %c0_52 = arith.constant 0 : index
    %c0_53 = arith.constant 0 : index
    %144 = vector.load %arg11[%c0_52, %c0_53] : memref<1x32xf32, #tpu.memory_space<vmem>>, vector<1x32xf32>
    %c0_54 = arith.constant 0 : index
    %c0_55 = arith.constant 0 : index
    %145 = vector.load %arg12[%c0_54, %c0_55] : memref<1x32xf32, #tpu.memory_space<vmem>>, vector<1x32xf32>
    %cst_56 = arith.constant dense<0.000000e+00> : vector<8xf32>
    %146 = vector.multi_reduction <add>, %143, %cst_56 [1] : vector<8x32xf32> to vector<8xf32>
    %147 = vector.shape_cast %146 : vector<8xf32> to vector<8x1xf32>
    %cst_57 = arith.constant 3.200000e+01 : f32
    %148 = vector.broadcast %cst_57 : f32 to vector<8x1xf32>
    %149 = arith.divf %147, %148 : vector<8x1xf32>
    %150 = vector.broadcast %149 : vector<8x1xf32> to vector<8x32xf32>
    %151 = arith.subf %143, %150 : vector<8x32xf32>
    %152 = arith.mulf %151, %151 : vector<8x32xf32>
    %cst_58 = arith.constant dense<0.000000e+00> : vector<8xf32>
    %153 = vector.multi_reduction <add>, %152, %cst_58 [1] : vector<8x32xf32> to vector<8xf32>
    %154 = vector.shape_cast %153 : vector<8xf32> to vector<8x1xf32>
    %cst_59 = arith.constant 3.200000e+01 : f32
    %155 = vector.broadcast %cst_59 : f32 to vector<8x1xf32>
    %156 = arith.divf %154, %155 : vector<8x1xf32>
    %157 = vector.broadcast %149 : vector<8x1xf32> to vector<8x32xf32>
    %158 = arith.subf %143, %157 : vector<8x32xf32>
    %cst_60 = arith.constant 9.99999974E-6 : f32
    %159 = vector.broadcast %cst_60 : f32 to vector<8x1xf32>
    %160 = arith.addf %156, %159 : vector<8x1xf32>
    %161 = math.rsqrt %160 : vector<8x1xf32>
    %162 = vector.broadcast %161 : vector<8x1xf32> to vector<8x32xf32>
    %163 = arith.mulf %158, %162 : vector<8x32xf32>
    %164 = vector.broadcast %144 : vector<1x32xf32> to vector<8x32xf32>
    %165 = arith.mulf %163, %164 : vector<8x32xf32>
    %166 = vector.broadcast %145 : vector<1x32xf32> to vector<8x32xf32>
    %167 = arith.addf %165, %166 : vector<8x32xf32>
    %168 = arith.truncf %167 : vector<8x32xf32> to vector<8x32xbf16>
    %c0_61 = arith.constant 0 : index
    %c0_62 = arith.constant 0 : index
    %169 = vector.load %arg13[%c0_61, %c0_62] : memref<32x32xbf16, #tpu.memory_space<vmem>>, vector<32x32xbf16>
    %cst_63 = arith.constant dense<0.000000e+00> : vector<8x32xf32>
    %170 = tpu.matmul %168, %169, %cst_63 {dimension_numbers = #tpu.dot_dimension_numbers<[1], [0], [0], [1], [0, 0, 1, 1], [], []>} : vector<8x32xbf16>, vector<32x32xbf16>, vector<8x32xf32> -> vector<8x32xf32>
    %171 = arith.truncf %170 : vector<8x32xf32> to vector<8x32xbf16>
    %c0_64 = arith.constant 0 : index
    %c0_65 = arith.constant 0 : index
    %172 = vector.load %arg14[%c0_64, %c0_65] : memref<32x32xbf16, #tpu.memory_space<vmem>>, vector<32x32xbf16>
    %cst_66 = arith.constant dense<0.000000e+00> : vector<8x32xf32>
    %173 = tpu.matmul %171, %172, %cst_66 {dimension_numbers = #tpu.dot_dimension_numbers<[1], [0], [0], [1], [0, 0, 1, 1], [], []>} : vector<8x32xbf16>, vector<32x32xbf16>, vector<8x32xf32> -> vector<8x32xf32>
    %174 = arith.addf %173, %167 : vector<8x32xf32>
    %c0_67 = arith.constant 0 : index
    %c0_68 = arith.constant 0 : index
    %c0_69 = arith.constant 0 : index
    %175 = vector.load %arg15[%c0_67, %c0_68, %c0_69] : memref<1x8x32xf32, #tpu.memory_space<vmem>>, vector<1x8x32xf32>
    %176 = vector.shape_cast %175 : vector<1x8x32xf32> to vector<8x32xf32>
    %177 = vector.shape_cast %174 : vector<8x32xf32> to vector<1x8x32xf32>
    tpu.vector_store %arg15[%c0_67, %c0_68, %c0_69], %177 {strides = array<i32>} : memref<1x8x32xf32, #tpu.memory_space<vmem>>, vector<1x8x32xf32>,
    return
  }
  func.func @transform_0(%arg0: i32, %arg1: i32) -> (i32, i32, i32) {
    %c0_i32 = arith.constant 0 : i32
    %c0_i32_0 = arith.constant 0 : i32
    %c0_i32_1 = arith.constant 0 : i32
    return %arg0, %c0_i32, %c0_i32_0 : i32, i32, i32
  }
  func.func @transform_1(%arg0: i32, %arg1: i32) -> (i32, i32) {
    %c0_i32 = arith.constant 0 : i32
    %c0_i32_0 = arith.constant 0 : i32
    %c0_i32_1 = arith.constant 0 : i32
    return %c0_i32, %c0_i32_0 : i32, i32
  }
  func.func @transform_2(%arg0: i32, %arg1: i32) -> (i32, i32) {
    %c0_i32 = arith.constant 0 : i32
    %c0_i32_0 = arith.constant 0 : i32
    %c0_i32_1 = arith.constant 0 : i32
    return %c0_i32, %c0_i32_0 : i32, i32
  }
  func.func @transform_3(%arg0: i32, %arg1: i32) -> (i32, i32) {
    %c0_i32 = arith.constant 0 : i32
    %c0_i32_0 = arith.constant 0 : i32
    %c0_i32_1 = arith.constant 0 : i32
    return %c0_i32, %c0_i32_0 : i32, i32
  }
  func.func @transform_4(%arg0: i32, %arg1: i32) -> (i32, i32) {
    %c0_i32 = arith.constant 0 : i32
    %c0_i32_0 = arith.constant 0 : i32
    %c0_i32_1 = arith.constant 0 : i32
    return %c0_i32, %c0_i32_0 : i32, i32
  }
  func.func @transform_5(%arg0: i32, %arg1: i32) -> (i32, i32) {
    %c0_i32 = arith.constant 0 : i32
    %c0_i32_0 = arith.constant 0 : i32
    %c0_i32_1 = arith.constant 0 : i32
    return %c0_i32, %c0_i32_0 : i32, i32
  }
  func.func @transform_6(%arg0: i32, %arg1: i32) -> (i32, i32) {
    %c0_i32 = arith.constant 0 : i32
    %c0_i32_0 = arith.constant 0 : i32
    %c0_i32_1 = arith.constant 0 : i32
    return %c0_i32, %c0_i32_0 : i32, i32
  }
  func.func @transform_7(%arg0: i32, %arg1: i32) -> (i32, i32) {
    %c0_i32 = arith.constant 0 : i32
    %c0_i32_0 = arith.constant 0 : i32
    %c0_i32_1 = arith.constant 0 : i32
    return %c0_i32, %c0_i32_0 : i32, i32
  }
  func.func @transform_8(%arg0: i32, %arg1: i32) -> (i32, i32) {
    %c0_i32 = arith.constant 0 : i32
    %c0_i32_0 = arith.constant 0 : i32
    %c0_i32_1 = arith.constant 0 : i32
    return %c0_i32, %c0_i32_0 : i32, i32
  }
  func.func @transform_9(%arg0: i32, %arg1: i32) -> (i32, i32) {
    %c0_i32 = arith.constant 0 : i32
    %c0_i32_0 = arith.constant 0 : i32
    %c0_i32_1 = arith.constant 0 : i32
    return %c0_i32, %c0_i32_0 : i32, i32
  }
  func.func @transform_10(%arg0: i32, %arg1: i32) -> (i32, i32) {
    %c0_i32 = arith.constant 0 : i32
    %c0_i32_0 = arith.constant 0 : i32
    %c0_i32_1 = arith.constant 0 : i32
    return %c0_i32, %c0_i32_0 : i32, i32
  }
  func.func @transform_11(%arg0: i32, %arg1: i32) -> (i32, i32) {
    %c0_i32 = arith.constant 0 : i32
    %c0_i32_0 = arith.constant 0 : i32
    %c0_i32_1 = arith.constant 0 : i32
    return %c0_i32, %c0_i32_0 : i32, i32
  }
  func.func @transform_12(%arg0: i32, %arg1: i32) -> (i32, i32) {
    %c0_i32 = arith.constant 0 : i32
    %c0_i32_0 = arith.constant 0 : i32
    %c0_i32_1 = arith.constant 0 : i32
    return %c0_i32, %c0_i32_0 : i32, i32
  }
  func.func @transform_13(%arg0: i32, %arg1: i32) -> (i32, i32, i32) {
    %c0_i32 = arith.constant 0 : i32
    %c0_i32_0 = arith.constant 0 : i32
    return %arg0, %arg1, %c0_i32 : i32, i32, i32
  }
}

</mosaic_0001>

<bundles_post_ra>
// kernel: tpu_custom_call.1
= control target key start
LH: loop header
LB: loop body
LE: loop exit
PB: predicated region body
PF: predicated region fallthrough
CT: control target
= control target key end

     0   :  { %s3005_s0 = inlined_call_operand.hbm [shape: f32[2,16,32], index: 0, kind: input, shape index: {}]   ;;  %s3006_s1 = inlined_call_operand.hbm [shape: bf16[32,32], index: 1, kind: input, shape index: {}]   ;;  %s3007_s2 = inlined_call_operand.vmem [shape: f32[1,32], index: 2, kind: input, shape index: {}]   ;;  %s3008_s3 = inlined_call_operand.hbm [shape: bf16[32,64], index: 3, kind: input, shape index: {}]   ;;  %s3009_s4 = inlined_call_operand.vmem [shape: f32[1,64], index: 4, kind: input, shape index: {}]   ;;  %s3010_s5 = inlined_call_operand.vmem [shape: bf16[32,32], index: 5, kind: input, shape index: {}]   ;;  %s3011_s6 = inlined_call_operand.hbm [shape: f32[1,32], index: 6, kind: input, shape index: {}]   ;;  %s3012_s7 = inlined_call_operand.hbm [shape: f32[1,32], index: 7, kind: input, shape index: {}]   ;;  %s3013_s8 = inlined_call_operand.hbm [shape: f32[1,32], index: 8, kind: input, shape index: {}]   ;;  %s3014_s9 = inlined_call_operand.hbm [shape: f32[1,32], index: 9, kind: input, shape index: {}]   ;;  %s3015_s10 = inlined_call_operand.vmem [shape: f32[1,32], index: 10, kind: input, shape index: {}]   ;;  %s3016_s11 = inlined_call_operand.vmem [shape: bf16[32,32], index: 11, kind: input, shape index: {}]   ;;  %s3017_s12 = inlined_call_operand.hbm [shape: bf16[32,32], index: 12, kind: input, shape index: {}]   ;;  %s3018_s13 = inlined_call_operand.hbm [shape: f32[2,16,32], index: 13, kind: output, shape index: {}]  }
   0x1   :  { %3035 = sst [smem:[#allocation28_spill]] %s3005_s0 }
   0x2   :  { %3036 = sst [smem:[#allocation29_spill]] %s3006_s1 }
   0x3   :  { %3037 = sst [smem:[#allocation30_spill]] %s3007_s2 }
   0x4   :  { %3038 = sst [smem:[#allocation31_spill]] %s3008_s3 }
   0x5   :  { %3039 = sst [smem:[#allocation32_spill]] %s3009_s4 }
   0x6   :  { %3040 = sst [smem:[#allocation33_spill]] %s3010_s5 }
   0x7   :  { %3041 = sst [smem:[#allocation34_spill]] %s3011_s6 }
   0x8   :  { %3042 = sst [smem:[#allocation35_spill]] %s3012_s7 }
   0x9   :  { %3043 = sst [smem:[#allocation36_spill]] %s3015_s10 }
   0xa   :  { %3044 = sst [smem:[#allocation37_spill]] %s3016_s11 }
   0xb   :  { %3045 = sst [smem:[#allocation38_spill]] %s3018_s13 }
   0xc   :  { %18 = vsyncpa [#allocation3], 0 }
   0xd   :  { %20 = vsyncpa [#allocation3 + $0x1], 0 }
   0xe   :  { %21 = vsyncpa [#allocation6], 0 }
   0xf   :  { %22 = vsyncpa [#allocation9], 0 }
  0x10   :  { %23 = vsyncpa [#allocation12], 0 }
  0x11   :  { %24 = vsyncpa [#allocation15], 0 }
  0x12   :  { %25 = vsyncpa [#allocation4], 0 }
  0x13   :  { %27 = vsyncpa [#allocation4 + $0x1], 0  ;;  %s2469_s25 = smov 0   ;;  %s2471_s26 = smov 0  }
  0x14   :  { %s2473_s27 = smov 0   ;;  %s2475_s28 = smov 0  }
  0x15   :  { %s2477_s29 = smov 0   ;;  %s2479_s30 = smov 0  }
  0x16   :  { %s2481_s14 = smov 0   ;;  %s2483_s15 = smov 0  }
  0x17   :  { %s2485_s16 = smov 0   ;;  %s2487_s17 = smov 0  }
  0x18   :  { %s2489_s18 = smov 0  }
  0x19 LB: > { %3046 = sst [smem:[#allocation23_spill]] %s2332_s25  ;;  %s3019_s19 = sadd.s32 4294967295, %s2372_s18   ;;  %s2372_s18 = sphi %s2489_s18, %s33_s18   ;;  %s2368_s17 = sphi %s2487_s17, %s3096_s17   ;;  %s2364_s16 = sphi %s2485_s16, %s3095_s16   ;;  %s2360_s15 = sphi %s2483_s15, %s3094_s15   ;;  %s2356_s14 = sphi %s2481_s14, %s3093_s14   ;;  %s2352_s30 = sphi %s2479_s30, %s3092_s30   ;;  %s2348_s29 = sphi %s2477_s29, %s3091_s29   ;;  %s2344_s28 = sphi %s2475_s28, %s3090_s28   ;;  %s2340_s27 = sphi %s2473_s27, %s3089_s27   ;;  %s2336_s26 = sphi %s2471_s26, %s3088_s26   ;;  %s2332_s25 = sphi %s2469_s25, %s3087_s25  }
  0x1a   : > { %3047 = sst [smem:[#allocation24_spill]] %s2336_s26  ;;  %p1607_p0 = scmp.ge.s32.totalorder %s2372_s18, 1 }
  0x1b   : > { %3048 = sst [smem:[#allocation25_spill]] %s2356_s14  ;;  %p2528_p1 = scmp.eq.s32.totalorder %s3019_s19, 0 }
  0x1c   : > { %3049 = sst [smem:[#allocation26_spill]] %s2360_s15  ;;  %p356_p2 = scmp.lt.s32.totalorder %s2372_s18, 5 }
  0x1d   : > { %s3050_s20 = scalar_select %p2528_p1, 1, 0 }
  0x1e   : > { %p2533_p3 = pnand %p1607_p0, %p356_p2  ;;  %s2374_s22 = smov [#allocation5]  }
  0x1f   : > { %s368_s23 = sshll.u32 %s2374_s22, 4  ;;  %s2375_s19 = smov [#allocation8]   ;;  %s2537_s23 = int_to_ptr.vmem [resolvable:$true] %s368_s23 }
  0x20   : > { %s3051_s21 = scalar_select %p2533_p3, 1, 0 }
  0x21   : > { %p1817_p4 = pneg %p2533_p3  ;;  %s404_s13 = sshll.u32 %s2375_s19, 4  ;;  %s2547_s13 = int_to_ptr.vmem [resolvable:$true] %s404_s13 }
  0x22   : > { %3052 = sst [smem:[#allocation27_spill]] %s3051_s21  ;;  %s2376_s15 = smov [#allocation11]  }
  0x23   : > { %p2543_p5 = pnand %p1817_p4, %p2528_p1  ;;  %s2549_s10 = sshll.u32 %s2376_s15, 4  ;;  %s427_s10 = int_to_ptr.vmem [resolvable:$true] %s2549_s10 }
  0x24   : > { %s3054_s1 = sld [smem:[#allocation29_spill]] }
  0x25   : > { %p2559_p7 = pneg %p2543_p5 }
  0x2a   : > { %s2008_s22 = scalar_lea.hbm %s3054_s1, 256 }
  0x2b   : > { %p2009_p6 = scmp.ne.s32.totalorder %s3054_s1, %s2008_s22  ;;  %p2015_p10 = scmp.lt.u32.totalorder %s2008_s22, %s3054_s1 }
  0x2d   : > { %p2011_p8 = pnand %p2559_p7, %p2009_p6 }
  0x2f   : > { %p2012_p9 = pneg %p2011_p8 }
  0x31   : > { %p2017_p11 = pnand %p2015_p10, %p2012_p9 }
  0x33   : > { %2020 = shalt.err (!%p2017_p11)
}
  0x34   : > { %s2021_s2 = scalar_lea.vmem %s2537_s23, 256  ;;  %p2029_p2 = scmp.lt.s32.totalorder %s2537_s23, %s2537_s23 }
  0x35   : > { %p2022_p12 = scmp.ne.s32.totalorder %s2537_s23, %s2021_s2  ;;  %p2030_p4 = scmp.lt.s32.totalorder %s2021_s2, %s2021_s2 }
  0x37   : > { %p2024_p13 = pnand %p2022_p12, %p2559_p7  ;;  %p2031_p6 = por %p2030_p4, %p2029_p2 }
  0x39   : > { %p2025_p0 = pneg %p2024_p13 }
  0x3b   : > { %p2032_p8 = pnand %p2031_p6, %p2025_p0 }
  0x3d   : > { %2035 = shalt.err (!%p2032_p8)
}
  0x3e   : > { %s3030_s4 = smov 64   ;;  %s3032_s5 = smov 4  }
  0x3f   : > { %1820 = dma.hbm_to_vmem [thread:$0]  (!%p2543_p5), %s3054_s1, 256, %s2537_s23, [#allocation6], %s3030_s4, %s3030_s4, %s3032_s5  }
  0x40   : > { %s3056_s6 = sld [smem:[#allocation34_spill]] }
  0x46   : > { %s2036_s2 = scalar_lea.hbm %s3056_s6, 16 }
  0x47   : > { %p2037_p9 = scmp.ne.s32.totalorder %s3056_s6, %s2036_s2  ;;  %p2043_p12 = scmp.lt.u32.totalorder %s2036_s2, %s3056_s6 }
  0x49   : > { %p2039_p10 = pnand %p2037_p9, %p2559_p7 }
  0x4b   : > { %p2040_p11 = pneg %p2039_p10 }
  0x4d   : > { %p2045_p13 = pnand %p2043_p12, %p2040_p11 }
  0x4f   : > { %2048 = shalt.err (!%p2045_p13)
}
  0x50   : > { %s2049_s23 = scalar_lea.vmem %s2547_s13, 16  ;;  %s2056_s0 = scalar_lea.vmem %s2547_s13, 32 }
  0x51   : > { %p2050_p0 = scmp.ne.s32.totalorder %s2547_s13, %s2049_s23  ;;  %p2057_p6 = scmp.lt.s32.totalorder %s2547_s13, %s2547_s13 }
  0x52   : > { %p2058_p8 = scmp.lt.s32.totalorder %s2056_s0, %s2049_s23 }
  0x53   : > { %p2052_p2 = pnand %p2050_p0, %p2559_p7 }
  0x54   : > { %p2059_p9 = por %p2058_p8, %p2057_p6 }
  0x55   : > { %p2053_p4 = pneg %p2052_p2 }
  0x57   : > { %p2060_p10 = pnand %p2059_p9, %p2053_p4 }
  0x59   : > { %2063 = shalt.err (!%p2060_p10)
}
  0x5a   : > { %1826 = dma.hbm_to_vmem [thread:$0]  (!%p2543_p5), %s3056_s6, 16, %s2547_s13, [#allocation9]  }
  0x5b   : > { %s2064_s22 = scalar_lea.hbm %s3013_s8, 16 }
  0x5c   : > { %p2065_p11 = scmp.ne.s32.totalorder %s3013_s8, %s2064_s22  ;;  %p2071_p0 = scmp.lt.u32.totalorder %s2064_s22, %s3013_s8 }
  0x5e   : > { %p2067_p12 = pnand %p2065_p11, %p2559_p7 }
  0x60   : > { %p2068_p13 = pneg %p2067_p12 }
  0x62   : > { %p2073_p2 = pnand %p2071_p0, %p2068_p13 }
  0x64   : > { %2076 = shalt.err (!%p2073_p2)
}
  0x65   : > { %s2077_s0 = scalar_lea.vmem %s427_s10, 16  ;;  %s2084_s13 = scalar_lea.vmem %s427_s10, 32 }
  0x66   : > { %p2078_p4 = scmp.ne.s32.totalorder %s427_s10, %s2077_s0  ;;  %p2085_p9 = scmp.lt.s32.totalorder %s427_s10, %s427_s10 }
  0x67   : > { %p2086_p10 = scmp.lt.s32.totalorder %s2084_s13, %s2077_s0 }
  0x68   : > { %p2080_p6 = pnand %p2078_p4, %p2559_p7 }
  0x69   : > { %p2087_p3 = por %p2086_p10, %p2085_p9 }
  0x6a   : > { %p2081_p8 = pneg %p2080_p6 }
  0x6c   : > { %p2088_p1 = pnand %p2087_p3, %p2081_p8 }
  0x6e   : > { %2091 = shalt.err (!%p2088_p1)
}
  0x6f   : > { %1832 = dma.hbm_to_vmem [thread:$0]  (!%p2543_p5), %s3013_s8, 16, %s427_s10, [#allocation12]  }
  0x70   : > { %s2379_s21 = smov [#allocation7]   ;;  %s2380_s22 = smov [#allocation10]  }
  0x71   : > { %s384_s11 = sshll.u32 %s2379_s21, 4  ;;  %s415_s19 = sshll.u32 %s2380_s22, 4  ;;  %s385_s11 = int_to_ptr.vmem [resolvable:$true] %s384_s11  ;;  %s416_s19 = int_to_ptr.vmem [resolvable:$true] %s415_s19 }
  0x72   : > { %s3057_s3 = sld [smem:[#allocation31_spill]] }
  0x78   : > { %s2092_s23 = scalar_lea.hbm %s3057_s3, 256 }
  0x79   : > { %p2093_p1 = scmp.ne.s32.totalorder %s3057_s3, %s2092_s23  ;;  %p2099_p12 = scmp.lt.u32.totalorder %s2092_s23, %s3057_s3 }
  0x7b   : > { %p2095_p3 = pnand %p2093_p1, %p2559_p7 }
  0x7d   : > { %p2096_p11 = pneg %p2095_p3 }
  0x7f   : > { %p2101_p13 = pnand %p2099_p12, %p2096_p11 }
  0x81   : > { %2104 = shalt.err (!%p2101_p13)
}
  0x82   : > { %s2105_s10 = scalar_lea.vmem %s385_s11, 256  ;;  %p2113_p6 = scmp.lt.s32.totalorder %s385_s11, %s385_s11 }
  0x83   : > { %p2106_p0 = scmp.ne.s32.totalorder %s385_s11, %s2105_s10  ;;  %p2114_p8 = scmp.lt.s32.totalorder %s2105_s10, %s2105_s10 }
  0x85   : > { %p2108_p2 = pnand %p2106_p0, %p2559_p7  ;;  %p2115_p9 = por %p2114_p8, %p2113_p6 }
  0x87   : > { %p2109_p4 = pneg %p2108_p2 }
  0x89   : > { %p2116_p10 = pnand %p2115_p9, %p2109_p4 }
  0x8b   : > { %2119 = shalt.err (!%p2116_p10)
}
  0x8c   : > { %s3058_s26 = smov 64   ;;  %s3059_s7 = sld [smem:[#allocation35_spill]] }
  0x8d   : > { %1823 = dma.hbm_to_vmem [thread:$0]  (!%p2543_p5), %s3057_s3, 256, %s385_s11, [#allocation6], %s3058_s26, %s3058_s26, %s3032_s5  }
  0x92   : > { %s2120_s2 = scalar_lea.hbm %s3059_s7, 16 }
  0x93   : > { %p2121_p1 = scmp.ne.s32.totalorder %s3059_s7, %s2120_s2  ;;  %p2127_p12 = scmp.lt.u32.totalorder %s2120_s2, %s3059_s7 }
  0x95   : > { %p2123_p3 = pnand %p2121_p1, %p2559_p7 }
  0x97   : > { %p2124_p11 = pneg %p2123_p3 }
  0x99   : > { %p2129_p13 = pnand %p2127_p12, %p2124_p11 }
  0x9b   : > { %2132 = shalt.err (!%p2129_p13)
}
  0x9c   : > { %s2133_s10 = scalar_lea.vmem %s416_s19, 16  ;;  %s2140_s11 = scalar_lea.vmem %s416_s19, 32 }
  0x9d   : > { %p2134_p0 = scmp.ne.s32.totalorder %s416_s19, %s2133_s10  ;;  %p2141_p6 = scmp.lt.s32.totalorder %s416_s19, %s416_s19 }
  0x9e   : > { %p2142_p8 = scmp.lt.s32.totalorder %s2140_s11, %s2133_s10 }
  0x9f   : > { %p2136_p2 = pnand %p2134_p0, %p2559_p7 }
  0xa0   : > { %p2143_p9 = por %p2142_p8, %p2141_p6 }
  0xa1   : > { %p2137_p4 = pneg %p2136_p2 }
  0xa3   : > { %p2144_p10 = pnand %p2143_p9, %p2137_p4 }
  0xa5   : > { %2147 = shalt.err (!%p2144_p10)
}
  0xa6   : > { %1829 = dma.hbm_to_vmem [thread:$0]  (!%p2543_p5), %s3059_s7, 16, %s416_s19, [#allocation9]  }
  0xa7   : > { %s2381_s22 = smov [#allocation13]   ;;  %s2382_s2 = smov [#allocation14]  }
  0xa8   : > { %s437_s15 = sshll.u32 %s2381_s22, 4  ;;  %s453_s23 = sshll.u32 %s2382_s2, 4  ;;  %s438_s15 = int_to_ptr.vmem [resolvable:$true] %s437_s15  ;;  %s454_s23 = int_to_ptr.vmem [resolvable:$true] %s453_s23 }
  0xa9   : > { %s2148_s25 = scalar_lea.hbm %s3014_s9, 16 }
  0xaa   : > { %p2149_p1 = scmp.ne.s32.totalorder %s3014_s9, %s2148_s25  ;;  %p2155_p12 = scmp.lt.u32.totalorder %s2148_s25, %s3014_s9 }
  0xac   : > { %p2151_p3 = pnand %p2149_p1, %p2559_p7 }
  0xae   : > { %p2152_p11 = pneg %p2151_p3 }
  0xb0   : > { %p2157_p13 = pnand %p2155_p12, %p2152_p11 }
  0xb2   : > { %2160 = shalt.err (!%p2157_p13)
}
  0xb3   : > { %s2161_s19 = scalar_lea.vmem %s438_s15, 16  ;;  %s2168_s21 = scalar_lea.vmem %s438_s15, 32 }
  0xb4   : > { %p2162_p0 = scmp.ne.s32.totalorder %s438_s15, %s2161_s19  ;;  %p2169_p6 = scmp.lt.s32.totalorder %s438_s15, %s438_s15 }
  0xb5   : > { %p2170_p8 = scmp.lt.s32.totalorder %s2168_s21, %s2161_s19 }
  0xb6   : > { %p2164_p2 = pnand %p2162_p0, %p2559_p7 }
  0xb7   : > { %p2171_p9 = por %p2170_p8, %p2169_p6 }
  0xb8   : > { %p2165_p4 = pneg %p2164_p2 }
  0xba   : > { %p2172_p10 = pnand %p2171_p9, %p2165_p4 }
  0xbc   : > { %2175 = shalt.err (!%p2172_p10)
}
  0xbd   : > { %1835 = dma.hbm_to_vmem [thread:$0]  (!%p2543_p5), %s3014_s9, 16, %s438_s15, [#allocation12]  }
  0xbe   : > { %s2176_s13 = scalar_lea.hbm %s3017_s12, 256 }
  0xbf   : > { %p2177_p1 = scmp.ne.s32.totalorder %s3017_s12, %s2176_s13  ;;  %p2183_p12 = scmp.lt.u32.totalorder %s2176_s13, %s3017_s12 }
  0xc1   : > { %p2179_p3 = pnand %p2177_p1, %p2559_p7 }
  0xc3   : > { %p2180_p11 = pneg %p2179_p3 }
  0xc5   : > { %p2185_p13 = pnand %p2183_p12, %p2180_p11 }
  0xc7   : > { %2188 = shalt.err (!%p2185_p13)
}
  0xc8   : > { %s2189_s19 = scalar_lea.vmem %s454_s23, 256  ;;  %p2197_p6 = scmp.lt.s32.totalorder %s454_s23, %s454_s23 }
  0xc9   : > { %p2190_p0 = scmp.ne.s32.totalorder %s454_s23, %s2189_s19  ;;  %p2198_p8 = scmp.lt.s32.totalorder %s2189_s19, %s2189_s19 }
  0xcb   : > { %p2192_p2 = pnand %p2190_p0, %p2559_p7  ;;  %p2199_p9 = por %p2198_p8, %p2197_p6 }
  0xcd   : > { %p2193_p4 = pneg %p2192_p2 }
  0xcf   : > { %p2200_p10 = pnand %p2199_p9, %p2193_p4 }
  0xd1   : > { %2203 = shalt.err (!%p2200_p10)
}
  0xd2   : > { %s3060_s15 = smov 4   ;;  %s1606_s14 = sadd.s32 4294967294, %s2372_s18  }
  0xd3   : > { %1838 = dma.hbm_to_vmem [thread:$0]  (!%p2543_p5), %s3017_s12, 256, %s454_s23, [#allocation15], %s3058_s26, %s3058_s26, %s3060_s15  }
  0xd4   : > { %s3061_s24 = sld [smem:[#allocation24_spill]]  ;;  %s42_s2 = sadd.s32 1, %s2364_s16 }
  0xd5   : > { %s45_s5 = sadd.s32 1, %s2368_s17  ;;  %p43_p7 = scmp.ge.s32.totalorder %s42_s2, 2 }
  0xd6   : > { %s3062_s0 = sld [smem:[#allocation23_spill]]  ;;  %s52_s13 = sadd.s32 1, %s2352_s30 }
  0xd7   : > { %p59_p1 = scmp.ne.s32.totalorder %s2352_s30, %s2348_s29  ;;  %p60_p3 = scmp.eq.s32.totalorder %s2372_s18, 0 }
  0xd8   : > { %s3098_s2 = smov (%p43_p7, %s42_s2), 0  ;;  %s3100_s5 = smov (!%p43_p7, %s45_s5), %s2368_s17 }
  0xd9   : > { %p2714_p11 = por %p60_p3, %p59_p1  ;;  %p65_p5 = scmp.ne.s32.totalorder %s2348_s29, %s2344_s28 }
  0xda   : > { %p47_p12 = scmp.ge.s32.totalorder %s3100_s5, 2  ;;  %s328_s23 = ssub.s32 %s2364_s16, %s3098_s2 }
  0xdb   : > { %p3064_p13 = scmp.ne.s32.totalorder %s3050_s20, 0  ;;  %s332_s10 = sadd.s32 1, %s2340_s27 }
  0xdc   : > { %s3102_s5 = smov (%p47_p12, %s3100_s5), 0  ;;  %p342_p2 = scmp.ne.s32.totalorder %s2340_s27, %s3061_s24 }
  0xdd   : > { %p2724_p0 = por %p3064_p13, %p65_p5  ;;  %s3066_s11 = sadd.s32 4294967295, %s2372_s18  }
  0xde   : > { %p343_p4 = scmp.eq.s32.totalorder %s3066_s11, 3  ;;  %s49_s4 = ssub.s32 %s2368_s17, %s3102_s5 }
  0xdf   : > { %p348_p6 = scmp.ne.s32.totalorder %s3061_s24, %s3062_s0  ;;  %p50_p8 = scmp.eq.s32.totalorder %s49_s4, 0 }
  0xe0   : > { %s329_s28 = sor.u32 %s328_s23, %s49_s4  ;;  %p2739_p10 = por %p343_p4, %p342_p2 }
  0xe1   : > { %p330_p9 = scmp.eq.s32.totalorder %s329_s28, 0  ;;  %p349_p7 = scmp.eq.s32.totalorder %s1606_s14, 3 }
  0xe2   : > { %s3067_s19 = scalar_select %p2739_p10, 1, 0 }
  0xe3   : > { %s2744_s15 = scalar_select %p50_p8, %s2352_s30, %s52_s13  }
  0xe4   : > { %s2747_s21 = scalar_select %p330_p9, %s2340_s27, %s332_s10  }
  0xe5   : > { %p1854_p1 = scmp.lt.s32.totalorder %s2372_s18, 4  ;;  %s467_s22 = sand.u32 1, %s2352_s30  }
  0xe6   : > { %s1665_s1 = sshll.u32 %s2368_s17, 8  ;;  %p2752_p3 = por %p349_p7, %p348_p6 }
  0xe7   : > { %s1616_s24 = sshll.u32 %s467_s22, 4  ;;  %s3069_s4 = sld [smem:[#allocation28_spill]] }
  0xe8   : > { %s3068_s11 = scalar_select %p2752_p3, 1, 0 }
  0xe9   : > { %p2763_p5 = pnand %p1854_p1, %p2714_p11  ;;  %s471_s13 = scalar_lea.vmem [#allocation2], %s1616_s24 }
  0xea   : > { %s478_s10 = sshll.u32 %s471_s13, 4  ;;  %s2769_s3 = scalar_lea.sflag [#allocation3], %s467_s22  ;;  %s2767_s10 = int_to_ptr.vmem [resolvable:$true] %s478_s10 }
  0xeb   : > { %p2206_p13 = pneg %p2763_p5 }
  0xed   : > { %s2759_s28 = scalar_lea.hbm %s3069_s4, %s1665_s1  ;;  %s2209_s23 = scalar_lea.hbm %s3069_s4, 512 }
  0xee   : > { %s2204_s0 = scalar_lea.hbm %s2759_s28, 256  ;;  %p2210_p11 = scmp.lt.u32.totalorder %s2759_s28, %s3069_s4 }
  0xef   : > { %p2205_p12 = scmp.ne.s32.totalorder %s2759_s28, %s2204_s0  ;;  %p2211_p6 = scmp.lt.u32.totalorder %s2209_s23, %s2204_s0 }
  0xf0   : > { %p2213_p9 = scmp.lt.u32.totalorder %s2204_s0, %s2759_s28 }
  0xf1   : > { %p2207_p2 = pnand %p2206_p13, %p2205_p12  ;;  %p2212_p8 = por %p2211_p6, %p2210_p11 }
  0xf3   : > { %p2208_p4 = pneg %p2207_p2  ;;  %p2214_p7 = por %p2213_p9, %p2212_p8 }
  0xf5   : > { %p2215_p1 = pnand %p2214_p7, %p2208_p4 }
  0xf7   : > { %2218 = shalt.err (!%p2215_p1)
}
  0xf8   : > { %s2219_s22 = scalar_lea.vmem %s2767_s10, 256  ;;  %s2383_s24 = smov [#allocation2]  }
  0xf9   : > { %p2220_p12 = scmp.ne.s32.totalorder %s2767_s10, %s2219_s22  ;;  %s2224_s13 = sshll.u32 %s2383_s24, 4  ;;  %s2225_s13 = int_to_ptr.vmem [resolvable:$false] %s2224_s13 }
  0xfa   : > { %s2226_s6 = scalar_lea.vmem %s2225_s13, 512  ;;  %p2227_p10 = scmp.lt.s32.totalorder %s2767_s10, %s2225_s13 }
  0xfb   : > { %p2222_p2 = pnand %p2220_p12, %p2206_p13  ;;  %p2228_p11 = scmp.lt.s32.totalorder %s2226_s6, %s2219_s22 }
  0xfd   : > { %p2223_p3 = pneg %p2222_p2  ;;  %p2229_p6 = por %p2228_p11, %p2227_p10 }
  0xff   : > { %p2230_p8 = pnand %p2229_p6, %p2223_p3 }
 0x101   : > { %2233 = shalt.err (!%p2230_p8)
}
 0x102   : > { %s2384_s7 = smov 128   ;;  %s2385_s0 = smov 8  }
 0x103   : > { %1842 = dma.hbm_to_vmem [thread:$0]  (!%p2763_p5), %s2759_s28, 256, %s2767_s10, %s2769_s3, %s2384_s7, %s2384_s7, %s2385_s0  }
 0x104   : > { %s3071_s1 = sld [smem:[#allocation27_spill]] }
 0x10a   : > { %p3072_p13 = scmp.ne.s32.totalorder %s3071_s1, 0 }
 0x10b   : > { %s492_s26 = sand.u32 (!%p3072_p13), 1, %s2348_s29  }
 0x10c   : > { %490 = sbr.rel (%p3072_p13) target bundleno = 2839 (0xb17), region = 72  ;;  %s1620_s23 = sshll.u32 (!%p3072_p13), %s492_s26, 4 }
 0x10d   : > { %s493_s24 = scalar_lea.sflag (!%p3072_p13), [#allocation3], %s492_s26  ;;  %s496_s22 = scalar_lea.vmem (!%p3072_p13), [#allocation2], %s1620_s23 }
 0x113   : > { %2307 = dma.done.wait (%p2724_p0), %s493_s24, 256  }
 0x114   : > { %2309 = vsyncadd (%p2724_p0), %s493_s24, 4294967040  ;;  %p3073_p10 = scmp.ne.s32.totalorder %s3050_s20, 0 }
 0x116   : > { %2311 = dma.done.wait (%p3073_p10), [#allocation6], 512  }
 0x117   : > { %2313 = vsyncadd (%p3073_p10), [#allocation6], 4294966784 }
 0x118   : > { %2315 = dma.done.wait (%p3073_p10), [#allocation9], 32  }
 0x119   : > { %2317 = vsyncadd (%p3073_p10), [#allocation9], 4294967264 }
 0x11a   : > { %2319 = dma.done.wait (%p3073_p10), [#allocation12], 32  }
 0x11b   : > { %2321 = vsyncadd (%p3073_p10), [#allocation12], 4294967264 }
 0x11c   : > { %2323 = dma.done.wait (%p3073_p10), [#allocation15], 256  }
 0x11d   : > { %2325 = vsyncadd (%p3073_p10), [#allocation15], 4294967040  ;;  %s3074_s3 = sld [smem:[#allocation25_spill]]  ;;  %vm573_vm0 = vcmask 261120   ;;  %v569_v0 = vld [vmem:[%s496_s22] sm:$0xff]  ;;  %v570_v2 = vld [vmem:[%s496_s22 + $0x8] sm:$0xff] }
 0x11e   : > { %v574_v3 = vsel %vm573_vm0, %v569_v0, 0.0  ;;  %v577_v5 = vsel %vm573_vm0, %v570_v2, 0.0  ;;  %v1974_v21 = vld [vmem:[#allocation7] sm:$0xff]   ;;  %v1975_v22 = vld [vmem:[#allocation5] sm:$0xff]   ;;  %v2386_v23 = vmov 0.0   ;;  %v1976_v24 = vld [vmem:[#allocation7 + $0x8] sm:$0xff]  }
 0x11f   : > { %575 = vadd.xlane.f32.xlu0 %v574_v3  ;;  %1697 = vmatprep.subr.bf16.mxu0 %v2386_v23  ;;  %v1977_v25 = vld [vmem:[#allocation5 + $0x8] sm:$0xff]   ;;  %vm2387_vm1 = vmmov 0   ;;  %v1630_v37 = vld [vmem:[#allocation10] ss:$0 sm:$0xff]  ;;  %v1631_v43 = vld [vmem:[#allocation11] ss:$0 sm:$0xff] }
 0x120   : > { %1705 = vmatprep.subr.bf16.mxu1 %v2386_v23  ;;  %1698 = vmatpush3.bf16.msra.mxu0 %v1974_v21  ;;  %s3075_s10 = sld [smem:[#allocation30_spill]]  ;;  %s3076_s7 = sld [smem:[#allocation32_spill]]  ;;  %vm771_vm2 = vcmask 64512   ;;  %vm818_vm3 = vcmask 130048   ;;  %vm1217_vm4 = vcmask 195584  }
 0x121   : > { %1706 = vmatpush3.bf16.msra.mxu1 %v1975_v22  ;;  %1699 = vmatprep.subr.bf16.mxu0 %v2386_v23  ;;  %s2388_s0 = smov 120   ;;  %s2389_s1 = smov 112  }
 0x122   : > { %1707 = vmatprep.subr.bf16.mxu1 %v2386_v23  ;;  %1701 = vmatprep.mubr.msk.bf16.mxu0 %vm2387_vm1, %v2386_v23  ;;  %s2390_s26 = smov 104   ;;  %s2391_s23 = smov 88  }
 0x123   : > { %s1629_s25 = sshll.u32 %s3074_s3, 3  ;;  %578 = vadd.xlane.f32.xlu0 %v577_v5  ;;  %1709 = vmatprep.mubr.msk.bf16.mxu1 %vm2387_vm1, %v2386_v23  ;;  %s2392_s24 = smov 80  }
 0x124   : > { %s617_s28 = scalar_lea.vmem %s496_s22, %s1629_s25 [#allocation2]  ;;  %1700 = vmatpush3.bf16.msra.mxu0 %v1976_v24  ;;  %s2393_s22 = smov 96  }
 0x125   : > { %v2821_v1 = vld [vmem:[%s617_s28] sm:$0xff]  ;;  %1708 = vmatpush3.bf16.msra.mxu1 %v1977_v25  ;;  %1713 = vmatprep.subr.bf16.mxu0 %v2386_v23  ;;  %s2394_s25 = smov 72   ;;  %s3077_s14 = sld [smem:[#allocation33_spill]] }
 0x126   : > { %v619_v4 = vsel %vm573_vm0, %v2821_v1, 0.0  ;;  %1719 = vmatprep.subr.bf16.mxu1 %v2386_v23  ;;  %v1636_v51 = vld [vmem:[%s3075_s10] ss:$0 sm:$0xff]  ;;  %s2395_s13 = smov 8   ;;  %s2396_s6 = smov 16  }
 0x127   : > { %620 = vadd.xlane.f32.xlu1 %v619_v4  ;;  %v1632_v53 = vld [vmem:[%s3076_s7] ss:$0 sm:$0xff]  ;;  %s3080_s28 = sld [smem:[#allocation24_spill]]  ;;  %p3084_p3 = scmp.ne.s32.totalorder %s3067_s19, 0 }
 0x12b   : > { %s3078_s10 = smov %s3077_s14 }
 0x12d   : > { %s564_s7 = sand.u32 1, %s3080_s28  }
 0x1ac   : > { %v576_v6 = vpop.xlane.xlu0 %575 }
 0x1ad   : > { %v581_v8 = vmul.f32 0.03125, %v576_v6 }
 0x1af   : > { %v583_v10 = vsub.f32 %v569_v0, %v581_v8 }
 0x1b0   : > { %v579_v12 = vpop.xlane.xlu0 %578 }
 0x1b1   : > { %v582_v13 = vmul.f32 0.03125, %v579_v12  ;;  %v585_v14 = vmul.f32 %v583_v10, %v583_v10 }
 0x1b3   : > { %v584_v16 = vsub.f32 %v570_v2, %v582_v13  ;;  %v587_v17 = vsel %vm573_vm0, %v585_v14, 0.0 }
 0x1b4   : > { %v621_v7 = vpop.xlane.xlu1 %620  ;;  %588 = vadd.xlane.f32.xlu1 %v587_v17 }
 0x1b5   : > { %v622_v9 = vmul.f32 0.03125, %v621_v7  ;;  %v586_v19 = vmul.f32 %v584_v16, %v584_v16 }
 0x1b7   : > { %v623_v11 = vsub.f32 %v2821_v1, %v622_v9  ;;  %v590_v20 = vsel %vm573_vm0, %v586_v19, 0.0 }
 0x1b8   : > { %591 = vadd.xlane.f32.xlu0 %v590_v20 }
 0x1b9   : > { %v624_v15 = vmul.f32 %v623_v11, %v623_v11 }
 0x1bb   : > { %v625_v18 = vsel %vm573_vm0, %v624_v15, 0.0 }
 0x1bc   : > { %626 = vadd.xlane.f32.xlu1 %v625_v18 }
 0x241   : > { %v589_v26 = vpop.xlane.xlu1 %588 }
 0x242   : > { %v593_v27 = vmul.f32 0.03125, %v589_v26 }
 0x244   : > { %v595_v28 = vadd.f32 1e-05, %v593_v27 }
 0x245   : > { %v592_v30 = vpop.xlane.xlu0 %591 }
 0x246   : > { %1984 = vrsqrt.f32 %v595_v28  ;;  %v594_v32 = vmul.f32 0.03125, %v592_v30 }
 0x248   : > { %v596_v34 = vadd.f32 1e-05, %v594_v32 }
 0x249   : > { %v627_v29 = vpop.xlane.xlu1 %626 }
 0x24a   : > { %v628_v31 = vmul.f32 0.03125, %v627_v29 }
 0x24c   : > { %v629_v33 = vadd.f32 1e-05, %v628_v31 }
 0x24e   : > { %1986 = vrsqrt.f32 %v629_v33 }
 0x24f   : > { %1988 = vrsqrt.f32 %v596_v34 }
 0x250   : > { %v1985_v35 = vpop.eup %1984 }
 0x251   : > { %v599_v36 = vmul.f32 %v1985_v35, %v583_v10 }
 0x253   : > { %v607_v42 = vmul.f32 %v1630_v37, %v599_v36 }
 0x255   : > { %v615_v47 = vadd.f32 %v1631_v43, %v607_v42 }
 0x258   : > { %v1987_v38 = vpop.eup %1986 }
 0x259   : > { %v1989_v39 = vpop.eup %1988  ;;  %v631_v40 = vmul.f32 %v1987_v38, %v623_v11 }
 0x25a   : > { %v600_v41 = vmul.f32 %v1989_v39, %v584_v16 }
 0x25b   : > { %v632_v44 = vmul.f32 %v1630_v37, %v631_v40 }
 0x25c   : > { %v608_v45 = vmul.f32 %v1630_v37, %v600_v41 }
 0x25d   : > { %v633_v46 = vadd.f32 %v1631_v43, %v632_v44 }
 0x25e   : > { %v616_v48 = vadd.f32 %v1631_v43, %v608_v45 }
 0x25f   : > { %v702_v49 = vpack.c.bf16 %v633_v46, %v633_v46 }
 0x260   : > { %v634_v50 = vpack.c.bf16 %v616_v48, %v615_v47 }
 0x261   : > { %1710 = vmatmul.mubr.msk.bf16.vlgmr.msra.gmra.mrb[0].mxu1 %vm573_vm0, %v702_v49 }
 0x262   : > { %1702 = vmatmul.mubr.msk.bf16.vlgmr.msra.gmra.mrb[0].mxu0 %vm573_vm0, %v634_v50  ;;  %1721 = vmatprep.mubr.msk.bf16.mxu1 %vm2387_vm1, %v2386_v23 }
 0x263   : > { %1715 = vmatprep.mubr.msk.bf16.mxu0 %vm2387_vm1, %v2386_v23 }
 0x334   : > { %v763_v52 = vpop.f32.mrb[0].mxu1 }
 0x335   : > { %v695_v54 = vpop.f32.mrb[0].mxu0  ;;  %v764_v55 = vadd.f32 %v1636_v51, %v763_v52  ;;  %v1711_v56 = vpop.f32.mrb[1].mxu1 }
 0x336   : > { %v1703_v57 = vpop.f32.mrb[1].mxu0  ;;  %v766_v58 = vpop.f32.mrb[2].mxu1  ;;  %v696_v62 = vadd.f32 %v1632_v53, %v695_v54 }
 0x337   : > { %v769_v59 = vpack.c.bf16 %v764_v55, %v764_v55  ;;  %v698_v60 = vpop.f32.mrb[2].mxu0  ;;  %v1712_v61 = vpop.f32.mrb[3].mxu1 }
 0x338   : > { %v699_v63 = vadd.f32 %v1632_v53, %v698_v60  ;;  %v1704_v0 = vpop.f32.mrb[3].mxu0 }
 0x339   : > { %879 = vrot.lane.b32.xlu1 %v769_v59, %s2388_s0 }
 0x33a   : > { %v2853_v2 = vpack.c.bf16 %v699_v63, %v696_v62 }
 0x33c   : > { %881 = vrot.lane.b32.xlu0 %v2853_v2, %s2388_s0  ;;  %v776_v3 = vsel %vm771_vm2, %v2853_v2, 0  ;;  %s1628_s0 = sshll.u32 %s564_s7, 3 }
 0x33d   : > { %1714 = vmatpush3.bf16.xpose.msra.mxu0 %v776_v3  ;;  %989 = vrot.lane.b32.xlu1 %v2853_v2, %s2389_s1 }
 0x33e   : > { %1725 = vmatprep.subr.bf16.mxu0 %v2386_v23 }
 0x340   : > { %1097 = vrot.lane.b32.xlu0 %v2853_v2, %s2390_s26 }
 0x341   : > { %987 = vrot.lane.b32.xlu1 %v769_v59, %s2389_s1  ;;  %s2397_s1 = smov 24  }
 0x344   : > { %1716 = vmatmul.mubr.msk.bf16.vlgmr.msra.gmra.mrb[4].mxu0 %vm771_vm2, %v769_v59 }
 0x345   : > { %1095 = vrot.lane.b32.xlu1 %v769_v59, %s2390_s26  ;;  %1727 = vmatprep.mubr.msk.bf16.mxu0 %vm2387_vm1, %v2386_v23 }
 0x3ab   : > { %v880_v4 = vpop.permute.xlu1 %879 }
 0x3ae   : > { %v882_v5 = vpop.permute.xlu0 %881 }
 0x3af   : > { %v887_v6 = vsel %vm771_vm2, %v882_v5, 0  ;;  %v990_v7 = vpop.permute.xlu1 %989 }
 0x3b0   : > { %1726 = vmatpush3.bf16.xpose.msra.mxu0 %v887_v6  ;;  %v995_v8 = vsel %vm771_vm2, %v990_v7, 0 }
 0x3b1   : > { %1737 = vmatprep.subr.bf16.mxu0 %v2386_v23 }
 0x3b2   : > { %v1098_v9 = vpop.permute.xlu0 %1097 }
 0x3b3   : > { %v988_v10 = vpop.permute.xlu1 %987  ;;  %v1103_v11 = vsel %vm771_vm2, %v1098_v9, 0 }
 0x3b7   : > { %1728 = vmatmul.mubr.msk.bf16.vlgmr.msra.gmra.mrb[8].mxu0 %vm771_vm2, %v880_v4  ;;  %v1096_v12 = vpop.permute.xlu1 %1095 }
 0x3b8   : > { %1738 = vmatpush3.bf16.xpose.msra.mxu0 %v995_v8  ;;  %1739 = vmatprep.mubr.msk.bf16.mxu0 %vm2387_vm1, %v2386_v23 }
 0x3b9   : > { %1749 = vmatprep.subr.bf16.mxu0 %v2386_v23 }
 0x3bf   : > { %1740 = vmatmul.mubr.msk.bf16.vlgmr.msra.gmra.mrb[12].mxu0 %vm771_vm2, %v988_v10 }
 0x3c0   : > { %1750 = vmatpush3.bf16.xpose.msra.mxu0 %v1103_v11  ;;  %1751 = vmatprep.mubr.msk.bf16.mxu0 %vm2387_vm1, %v2386_v23 }
 0x3c1   : > { %1761 = vmatprep.subr.bf16.mxu0 %v2386_v23 }
 0x3c7   : > { %1752 = vmatmul.mubr.msk.bf16.vlgmr.msra.gmra.mrb[16].mxu0 %vm771_vm2, %v1096_v12 }
 0x3c8   : > { %1765 = vmatprep.mubr.msk.bf16.mxu0 %vm2387_vm1, %v2386_v23 }
 0x417   : > { %v812_v13 = vpop.f32.mrb[4].mxu0 }
 0x418   : > { %v1717_v14 = vpop.f32.mrb[5].mxu0  ;;  %v819_v15 = vsel %vm818_vm3, %v812_v13, -inf }
 0x419   : > { %820 = vmax.xlane.f32.xlu0 %v819_v15  ;;  %v815_v16 = vpop.f32.mrb[6].mxu0  ;;  %v1978_v15 = vld [vmem:[%s3077_s14] sm:$0xff]  }
 0x41a   : > { %v1718_v17 = vpop.f32.mrb[7].mxu0  ;;  %1762 = vmatpush3.bf16.msra.mxu0 %v1978_v15 }
 0x41b   : > { %1763 = vmatprep.subr.bf16.mxu0 %v2386_v23 }
 0x48a   : > { %v923_v18 = vpop.f32.mrb[8].mxu0 }
 0x48b   : > { %v1729_v19 = vpop.f32.mrb[9].mxu0  ;;  %v929_v20 = vsel %vm818_vm3, %v923_v18, -inf }
 0x48c   : > { %930 = vmax.xlane.f32.xlu1 %v929_v20  ;;  %v926_v21 = vpop.f32.mrb[10].mxu0 }
 0x48d   : > { %v1730_v22 = vpop.f32.mrb[11].mxu0 }
 0x492   : > { %v1031_v24 = vpop.f32.mrb[12].mxu0 }
 0x493   : > { %v1741_v25 = vpop.f32.mrb[13].mxu0  ;;  %v1037_v26 = vsel %vm818_vm3, %v1031_v24, -inf }
 0x494   : > { %1038 = vmax.xlane.f32.xlu0 %v1037_v26  ;;  %v1034_v27 = vpop.f32.mrb[14].mxu0  ;;  %v1979_v25 = vld [vmem:[%s3078_s10 + $0x8] sm:$0xff]  }
 0x495   : > { %v1742_v28 = vpop.f32.mrb[15].mxu0  ;;  %1764 = vmatpush3.bf16.msra.mxu0 %v1979_v25 }
 0x496   : > { %1777 = vmatprep.subr.bf16.mxu0 %v2386_v23 }
 0x49a   : > { %v1139_v29 = vpop.f32.mrb[16].mxu0 }
 0x49b   : > { %v1753_v30 = vpop.f32.mrb[17].mxu0  ;;  %v1145_v31 = vsel %vm818_vm3, %v1139_v29, -inf }
 0x49c   : > { %1146 = vmax.xlane.f32.xlu0 %v1145_v31  ;;  %v1142_v32 = vpop.f32.mrb[18].mxu0 }
 0x49d   : > { %v1754_v33 = vpop.f32.mrb[19].mxu0 }
 0x4a6   : > { %v821_v34 = vpop.xlane.xlu0 %820 }
 0x4a7   : > { %v822_v35 = vsub.f32 %v812_v13, %v821_v34 }
 0x4a9   : > { %v823_v36 = vmul.f32 1.442695, %v822_v35 }
 0x4ab   : > { %1990 = vpow2.f32 %v823_v36 }
 0x4b5   : > { %v1991_v37 = vpop.eup %1990 }
 0x4b6   : > { %v825_v38 = vsel %vm818_vm3, %v1991_v37, 0.0 }
 0x4b7   : > { %826 = vadd.xlane.f32.xlu0 %v825_v38 }
 0x519   : > { %v931_v39 = vpop.xlane.xlu1 %930 }
 0x51a   : > { %v932_v40 = vsub.f32 %v923_v18, %v931_v39 }
 0x51c   : > { %v933_v41 = vmul.f32 1.442695, %v932_v40 }
 0x51e   : > { %1992 = vpow2.f32 %v933_v41 }
 0x521   : > { %v1039_v42 = vpop.xlane.xlu0 %1038 }
 0x522   : > { %v1040_v43 = vsub.f32 %v1031_v24, %v1039_v42 }
 0x524   : > { %v1041_v44 = vmul.f32 1.442695, %v1040_v43 }
 0x526   : > { %1994 = vpow2.f32 %v1041_v44 }
 0x528   : > { %v1993_v45 = vpop.eup %1992 }
 0x529   : > { %v935_v46 = vsel %vm818_vm3, %v1993_v45, 0.0  ;;  %v1147_v49 = vpop.xlane.xlu0 %1146 }
 0x52a   : > { %936 = vadd.xlane.f32.xlu1 %v935_v46  ;;  %v1148_v50 = vsub.f32 %v1139_v29, %v1147_v49 }
 0x52c   : > { %v1149_v51 = vmul.f32 1.442695, %v1148_v50 }
 0x52e   : > { %1996 = vpow2.f32 %v1149_v51 }
 0x530   : > { %v1995_v47 = vpop.eup %1994 }
 0x531   : > { %v1043_v48 = vsel %vm818_vm3, %v1995_v47, 0.0 }
 0x532   : > { %1044 = vadd.xlane.f32.xlu0 %v1043_v48 }
 0x538   : > { %v1997_v52 = vpop.eup %1996 }
 0x539   : > { %v1151_v53 = vsel %vm818_vm3, %v1997_v52, 0.0 }
 0x53b   : > { %941 = vrot.lane.b32.xlu1 %v2853_v2, %s2391_s23 }
 0x53f   : > { %1049 = vrot.lane.b32.xlu1 %v2853_v2, %s2392_s24  ;;  %s3079_s24 = sld [smem:[#allocation37_spill]] }
 0x544   : > { %v827_v54 = vpop.xlane.xlu0 %826 }
 0x545   : > { %1998 = vrcp.f32 %v827_v54  ;;  %v1980_v50 = vld [vmem:[%s3079_s24] sm:$0xff]   ;;  %v1981_v51 = vld [vmem:[%s3079_s24 + $0x8] sm:$0xff]  }
 0x548   : > { %832 = vrot.lane.b32.xlu0 %v2853_v2, %s2393_s22  ;;  %s566_s22 = scalar_lea.vmem [#allocation16], %s1628_s0 }
 0x54f   : > { %v1999_v56 = vpop.eup %1998 }
 0x550   : > { %v829_v58 = vmul.f32 %v1999_v56, %v1991_v37  ;;  %v1648_v37 = vld [vmem:[#allocation8] ss:$0 sm:$0xff]  ;;  %v1652_v56 = vld [vmem:[#allocation13] ss:$0 sm:$0xff] }
 0x552   : > { %v830_v60 = vpack.c.bf16 %v829_v58, %v829_v58 }
 0x563   : > { %1152 = vadd.xlane.f32.xlu1 %v1151_v53 }
 0x574   : > { %1157 = vrot.lane.b32.xlu1 %v2853_v2, %s2394_s25  ;;  %s1453_s25 = sshll.u32 %s566_s22, 4  ;;  %s2944_s25 = int_to_ptr.vmem [resolvable:$true] %s1453_s25 }
 0x575   : > { %s2234_s28 = scalar_lea.vmem %s2944_s25, 128 }
 0x576   : > { %p2235_p0 = scmp.ne.s32.totalorder %s2944_s25, %s2234_s28 }
 0x578   : > { %p2236_p5 = pnand %p2235_p0, %p3084_p3 }
 0x57a   : > { %p2237_p4 = pneg %p2236_p5 }
 0x5b7   : > { %v937_v55 = vpop.xlane.xlu1 %936 }
 0x5b8   : > { %2000 = vrcp.f32 %v937_v55 }
 0x5bb   : > { %v942_v62 = vpop.permute.xlu1 %941 }
 0x5bf   : > { %v1045_v57 = vpop.xlane.xlu0 %1044  ;;  %v1050_v3 = vpop.permute.xlu1 %1049 }
 0x5c0   : > { %2002 = vrcp.f32 %v1045_v57 }
 0x5c2   : > { %v2001_v61 = vpop.eup %2000 }
 0x5c3   : > { %v833_v59 = vpop.permute.xlu0 %832  ;;  %v939_v63 = vmul.f32 %v2001_v61, %v1993_v45 }
 0x5c4   : > { %1720 = vmatpush3.bf16.msra.mxu1 %v833_v59 }
 0x5c5   : > { %1731 = vmatprep.subr.bf16.mxu1 %v2386_v23  ;;  %v940_v0 = vpack.c.bf16 %v939_v63, %v939_v63 }
 0x5c7   : > { %1722 = vmatmul.mubr.msk.bf16.vlgmr.msra.gmra.mrb[4].mxu1 %vm818_vm3, %v830_v60 }
 0x5c8   : > { %1732 = vmatpush3.bf16.msra.mxu1 %v942_v62  ;;  %1733 = vmatprep.mubr.msk.bf16.mxu1 %vm2387_vm1, %v2386_v23 }
 0x5c9   : > { %1743 = vmatprep.subr.bf16.mxu1 %v2386_v23 }
 0x5ca   : > { %v2003_v2 = vpop.eup %2002 }
 0x5cb   : > { %v1047_v4 = vmul.f32 %v2003_v2, %v1995_v47 }
 0x5cd   : > { %v1048_v5 = vpack.c.bf16 %v1047_v4, %v1047_v4 }
 0x5cf   : > { %1734 = vmatmul.mubr.msk.bf16.vlgmr.msra.gmra.mrb[8].mxu1 %vm818_vm3, %v940_v0 }
 0x5d0   : > { %1744 = vmatpush3.bf16.msra.mxu1 %v1050_v3  ;;  %1745 = vmatprep.mubr.msk.bf16.mxu1 %vm2387_vm1, %v2386_v23 }
 0x5d1   : > { %1755 = vmatprep.subr.bf16.mxu1 %v2386_v23 }
 0x5d7   : > { %1746 = vmatmul.mubr.msk.bf16.vlgmr.msra.gmra.mrb[12].mxu1 %vm818_vm3, %v1048_v5 }
 0x5d8   : > { %1757 = vmatprep.mubr.msk.bf16.mxu1 %vm2387_vm1, %v2386_v23 }
 0x5f0   : > { %v1153_v6 = vpop.xlane.xlu1 %1152 }
 0x5f1   : > { %2004 = vrcp.f32 %v1153_v6 }
 0x5f4   : > { %v1158_v7 = vpop.permute.xlu1 %1157 }
 0x5f5   : > { %1756 = vmatpush3.bf16.msra.mxu1 %v1158_v7 }
 0x5f6   : > { %1769 = vmatprep.subr.bf16.mxu1 %v2386_v23 }
 0x5fb   : > { %v2005_v8 = vpop.eup %2004 }
 0x5fc   : > { %v1155_v9 = vmul.f32 %v2005_v8, %v1997_v52 }
 0x5fe   : > { %v1156_v10 = vpack.c.bf16 %v1155_v9, %v1155_v9 }
 0x600   : > { %1758 = vmatmul.mubr.msk.bf16.vlgmr.msra.gmra.mrb[16].mxu1 %vm818_vm3, %v1156_v10 }
 0x601   : > { %1773 = vmatprep.mubr.msk.bf16.mxu1 %vm2387_vm1, %v2386_v23  ;;  %1770 = vmatpush3.bf16.msra.mxu1 %v1980_v50 }
 0x602   : > { %1771 = vmatprep.subr.bf16.mxu1 %v2386_v23 }
 0x605   : > { %1772 = vmatpush3.bf16.msra.mxu1 %v1981_v51 }
 0x69a   : > { %v872_v11 = vpop.f32.mrb[4].mxu1 }
 0x69b   : > { %v1723_v12 = vpop.f32.mrb[5].mxu1 }
 0x69c   : > { %v875_v13 = vpop.f32.mrb[6].mxu1 }
 0x69d   : > { %v1724_v14 = vpop.f32.mrb[7].mxu1 }
 0x6a2   : > { %v981_v16 = vpop.f32.mrb[8].mxu1 }
 0x6a3   : > { %1204 = vrot.lane.b32.xlu0 %v981_v16, %s2395_s13  ;;  %v1735_v17 = vpop.f32.mrb[9].mxu1  ;;  %s3081_s13 = sld [smem:[#allocation36_spill]] }
 0x6a4   : > { %v984_v18 = vpop.f32.mrb[10].mxu1 }
 0x6a5   : > { %v1736_v19 = vpop.f32.mrb[11].mxu1 }
 0x6a9   : > { %v1653_v58 = vld [vmem:[%s3081_s13] ss:$0 sm:$0xff]  ;;  %s3083_s13 = sld [smem:[#allocation38_spill]] }
 0x6aa   : > { %v1089_v20 = vpop.f32.mrb[12].mxu1 }
 0x6ab   : > { %1208 = vrot.lane.b32.xlu1 %v1089_v20, %s2396_s6  ;;  %v1747_v21 = vpop.f32.mrb[13].mxu1  ;;  %s3082_s6 = sld [smem:[#allocation26_spill]] }
 0x6ac   : > { %v1092_v22 = vpop.f32.mrb[14].mxu1 }
 0x6ad   : > { %v1748_v24 = vpop.f32.mrb[15].mxu1 }
 0x6d3   : > { %v1197_v26 = vpop.f32.mrb[16].mxu1 }
 0x6d4   : > { %1212 = vrot.lane.b32.xlu0 %v1197_v26, %s2397_s1  ;;  %v1759_v27 = vpop.f32.mrb[17].mxu1  ;;  %s1661_s1 = sshll.u32 %s3082_s6, 1  ;;  %s2398_s6 = smov [#allocation16]  }
 0x6d5   : > { %v1200_v28 = vpop.f32.mrb[18].mxu1  ;;  %s1449_s26 = sadd.s32 %s3074_s3, %s1661_s1  ;;  %s1438_s3 = scalar_lea.sflag [#allocation4], %s564_s7 }
 0x6d6   : > { %v1760_v29 = vpop.f32.mrb[19].mxu1  ;;  %s1662_s23 = sshll.u32 %s1449_s26, 7  ;;  %s2238_s0 = sshll.u32 %s2398_s6, 4  ;;  %s2239_s0 = int_to_ptr.vmem [resolvable:$false] %s2238_s0 }
 0x6d7   : > { %s2942_s4 = scalar_lea.hbm %s3083_s13, %s1662_s23  ;;  %s2240_s1 = scalar_lea.vmem %s2239_s0, 256 }
 0x6d8   : > { %p2241_p9 = scmp.lt.s32.totalorder %s2944_s25, %s2239_s0  ;;  %p2242_p7 = scmp.lt.s32.totalorder %s2240_s1, %s2234_s28 }
 0x6da   : > { %p2243_p1 = por %p2242_p7, %p2241_p9 }
 0x6dc   : > { %p2244_p12 = pnand %p2243_p1, %p2237_p4 }
 0x715   : > { %v1205_v30 = vpop.permute.xlu0 %1204 }
 0x716   : > { %v1215_v32 = vsel %vm771_vm2, %v872_v11, %v1205_v30 }
 0x71d   : > { %v1209_v31 = vpop.permute.xlu1 %1208 }
 0x71e   : > { %v1216_v33 = vsel %vm818_vm3, %v1215_v32, %v1209_v31 }
 0x746   : > { %v1213_v34 = vpop.permute.xlu0 %1212 }
 0x747   : > { %v1218_v35 = vsel %vm1217_vm4, %v1216_v33, %v1213_v34 }
 0x748   : > { %v1219_v36 = vpack.c.bf16 %v1218_v35, %v1218_v35 }
 0x74a   : > { %1766 = vmatmul.mubr.msk.bf16.vlgmr.msra.gmra.mrb[20].mxu0 %vm573_vm0, %v1219_v36 }
 0x74b   : > { %1781 = vmatprep.mubr.msk.bf16.mxu0 %vm2387_vm1, %v2386_v23 }
 0x81d   : > { %v1280_v38 = vpop.f32.mrb[20].mxu0 }
 0x81e   : > { %v1281_v39 = vadd.f32 %v1648_v37, %v1280_v38  ;;  %v1767_v40 = vpop.f32.mrb[21].mxu0 }
 0x81f   : > { %v1283_v41 = vpop.f32.mrb[22].mxu0 }
 0x820   : > { %v1768_v42 = vpop.f32.mrb[23].mxu0  ;;  %v1286_v43 = vadd.f32 %v1281_v39, %v2821_v1  ;;  %v1982_v1 = vld [vmem:[#allocation14] sm:$0xff]  }
 0x821   : > { %1778 = vmatpush3.bf16.msra.mxu0 %v1982_v1 }
 0x822   : > { %v1289_v44 = vsel %vm573_vm0, %v1286_v43, 0.0  ;;  %1779 = vmatprep.subr.bf16.mxu0 %v2386_v23  ;;  %v1983_v23 = vld [vmem:[#allocation14 + $0x8] sm:$0xff]  }
 0x823   : > { %1290 = vadd.xlane.f32.xlu1 %v1289_v44 }
 0x825   : > { %1780 = vmatpush3.bf16.msra.mxu0 %v1983_v23 }
 0x8b0   : > { %v1291_v45 = vpop.xlane.xlu1 %1290 }
 0x8b1   : > { %v1292_v46 = vmul.f32 0.03125, %v1291_v45 }
 0x8b3   : > { %v1293_v47 = vsub.f32 %v1286_v43, %v1292_v46 }
 0x8b5   : > { %v1294_v48 = vmul.f32 %v1293_v47, %v1293_v47 }
 0x8b7   : > { %v1295_v49 = vsel %vm573_vm0, %v1294_v48, 0.0 }
 0x8b8   : > { %1296 = vadd.xlane.f32.xlu0 %v1295_v49 }
 0x945   : > { %v1297_v52 = vpop.xlane.xlu0 %1296 }
 0x946   : > { %v1298_v53 = vmul.f32 0.03125, %v1297_v52 }
 0x948   : > { %v1299_v54 = vadd.f32 1e-05, %v1298_v53 }
 0x94a   : > { %2006 = vrsqrt.f32 %v1299_v54 }
 0x954   : > { %v2007_v55 = vpop.eup %2006 }
 0x955   : > { %v1301_v57 = vmul.f32 %v2007_v55, %v1293_v47 }
 0x957   : > { %v1308_v59 = vmul.f32 %v1652_v56, %v1301_v57 }
 0x959   : > { %v1315_v60 = vadd.f32 %v1653_v58, %v1308_v59 }
 0x95b   : > { %v1316_v61 = vpack.c.bf16 %v1315_v60, %v1315_v60 }
 0x95d   : > { %1774 = vmatmul.mubr.msk.bf16.vlgmr.msra.gmra.mrb[20].mxu1 %vm573_vm0, %v1316_v61 }
 0xa30   : > { %v1370_v62 = vpop.f32.mrb[20].mxu1 }
 0xa31   : > { %v1376_v63 = vpack.c.bf16 %v1370_v62, %v1370_v62  ;;  %v1775_v0 = vpop.f32.mrb[21].mxu1 }
 0xa32   : > { %v1373_v2 = vpop.f32.mrb[22].mxu1 }
 0xa33   : > { %v1776_v3 = vpop.f32.mrb[23].mxu1  ;;  %1782 = vmatmul.mubr.msk.bf16.vlgmr.msra.gmra.mrb[24].mxu0 %vm573_vm0, %v1376_v63 }
 0xb06   : > { %v1430_v4 = vpop.f32.mrb[24].mxu0 }
 0xb07   : > { %v1431_v5 = vadd.f32 %v1430_v4, %v1315_v60  ;;  %v1783_v6 = vpop.f32.mrb[25].mxu0 }
 0xb08   : > { %v1433_v7 = vpop.f32.mrb[26].mxu0 }
 0xb09   : > { %v1784_v8 = vpop.f32.mrb[27].mxu0  ;;  %1436 = vst.msk [vmem:[%s566_s22] sm:$0xff] %vm573_vm0, %v1431_v5 }
 0xb0a   : > { %2247 = shalt.err (!%p2244_p12)
}
 0xb0b   : > { %s2248_s7 = scalar_lea.hbm %s2942_s4, 128  ;;  %s2252_s22 = scalar_lea.hbm %s3083_s13, 512 }
 0xb0c   : > { %p2249_p2 = scmp.ne.s32.totalorder %s2942_s4, %s2248_s7  ;;  %p2253_p8 = scmp.lt.u32.totalorder %s2942_s4, %s3083_s13 }
 0xb0d   : > { %p2254_p13 = scmp.lt.u32.totalorder %s2252_s22, %s2248_s7  ;;  %p2256_p0 = scmp.lt.u32.totalorder %s2248_s7, %s2942_s4 }
 0xb0e   : > { %p2250_p11 = pnand %p2249_p2, %p3084_p3 }
 0xb0f   : > { %p2255_p10 = por %p2254_p13, %p2253_p8 }
 0xb10   : > { %p2251_p6 = pneg %p2250_p11 }
 0xb11   : > { %p2257_p5 = por %p2256_p0, %p2255_p10 }
 0xb13   : > { %p2258_p4 = pnand %p2257_p5, %p2251_p6 }
 0xb15   : > { %2261 = shalt.err (!%p2258_p4)
}
 0xb16   : > { %1815 = dma.vmem_to_hbm [thread:$0]  (%p3084_p3), %s2944_s25, 128, %s2942_s4, %s1438_s3  }
 0xb17 PF: > { %s3085_s28 = sld [smem:[#allocation23_spill]]  ;;  %p1862_p9 = scmp.ge.s32.totalorder %s2372_s18, 2 }
 0xb18   : > { %p3086_p7 = scmp.ne.s32.totalorder %s3068_s11, 0 }
 0xb1a   : > { %p1844_p1 = pnand %p1862_p9, %p3086_p7 }
 0xb1d   : > { %s1465_s6 = sand.u32 1, %s3085_s28  }
 0xb1e   : > { %s1466_s0 = scalar_lea.sflag [#allocation4], %s1465_s6 }
 0xb1f   : > { %2327 = dma.done.wait (!%p1844_p1), %s1466_s0, 128  }
 0xb20   : > { %2329 = vsyncadd (!%p1844_p1), %s1466_s0, 4294967168  ;;  %s33_s18 = sadd.s32 1, %s2372_s18   ;;  %s3087_s25 = sld [smem:[#allocation24_spill]] }
 0xb21   : > { %p30_p12 = scmp.ge.s32.totalorder %s33_s18, 6   ;;  %s3088_s26 = smov %s2340_s27 }
 0xb22   : > { %s3089_s27 = smov %s2747_s21  ;;  %s3090_s28 = smov %s2348_s29 }
 0xb23   : > { %s3091_s29 = smov %s2352_s30  ;;  %s3092_s30 = smov %s2744_s15 }
 0xb24   : > { %s3093_s14 = smov %s2364_s16  ;;  %s3094_s15 = smov %s2368_s17 }
 0xb25   : > { %s3095_s16 = smov %s3098_s2  ;;  %s3096_s17 = smov %s3102_s5 }
 0xb26   :  { %32 = sbr.rel (!%p30_p12) target bundleno = 25 (0x19), region = 146 }
 0xb2d   :  { %1471 = vsyncpa [#allocation3], 1 }
 0xb2e   :  { %1473 = vsyncpa [#allocation3 + $0x1], 1 }
 0xb2f   :  { %1474 = vsyncpa [#allocation6], 1 }
 0xb30   :  { %1475 = vsyncpa [#allocation9], 1 }
 0xb31   :  { %1476 = vsyncpa [#allocation12], 1 }
 0xb32   :  { %1477 = vsyncpa [#allocation15], 1 }
 0xb33   :  { %1478 = vsyncpa [#allocation4], 1 }
 0xb34   :  { %1480 = vsyncpa [#allocation4 + $0x1], 1 }

// kernel: tpu_custom_call.1
= control target key start
LH: loop header
LB: loop body
LE: loop exit
PB: predicated region body
PF: predicated region fallthrough
CT: control target
= control target key end

     0   :  { %s3005_s0 = inlined_call_operand.hbm [shape: f32[2,16,32], index: 0, kind: input, shape index: {}]   ;;  %s3006_s1 = inlined_call_operand.hbm [shape: bf16[32,32], index: 1, kind: input, shape index: {}]   ;;  %s3007_s2 = inlined_call_operand.vmem [shape: f32[1,32], index: 2, kind: input, shape index: {}]   ;;  %s3008_s3 = inlined_call_operand.hbm [shape: bf16[32,64], index: 3, kind: input, shape index: {}]   ;;  %s3009_s4 = inlined_call_operand.vmem [shape: f32[1,64], index: 4, kind: input, shape index: {}]   ;;  %s3010_s5 = inlined_call_operand.vmem [shape: bf16[32,32], index: 5, kind: input, shape index: {}]   ;;  %s3011_s6 = inlined_call_operand.hbm [shape: f32[1,32], index: 6, kind: input, shape index: {}]   ;;  %s3012_s7 = inlined_call_operand.hbm [shape: f32[1,32], index: 7, kind: input, shape index: {}]   ;;  %s3013_s8 = inlined_call_operand.hbm [shape: f32[1,32], index: 8, kind: input, shape index: {}]   ;;  %s3014_s9 = inlined_call_operand.hbm [shape: f32[1,32], index: 9, kind: input, shape index: {}]   ;;  %s3015_s10 = inlined_call_operand.vmem [shape: f32[1,32], index: 10, kind: input, shape index: {}]   ;;  %s3016_s11 = inlined_call_operand.vmem [shape: bf16[32,32], index: 11, kind: input, shape index: {}]   ;;  %s3017_s12 = inlined_call_operand.hbm [shape: bf16[32,32], index: 12, kind: input, shape index: {}]   ;;  %s3018_s13 = inlined_call_operand.hbm [shape: f32[2,16,32], index: 13, kind: output, shape index: {}]  }
   0x1   :  { %3035 = sst [smem:[#allocation28_spill]] %s3005_s0 }
   0x2   :  { %3036 = sst [smem:[#allocation29_spill]] %s3006_s1 }
   0x3   :  { %3037 = sst [smem:[#allocation30_spill]] %s3007_s2 }
   0x4   :  { %3038 = sst [smem:[#allocation31_spill]] %s3008_s3 }
   0x5   :  { %3039 = sst [smem:[#allocation32_spill]] %s3009_s4 }
   0x6   :  { %3040 = sst [smem:[#allocation33_spill]] %s3010_s5 }
   0x7   :  { %3041 = sst [smem:[#allocation34_spill]] %s3011_s6 }
   0x8   :  { %3042 = sst [smem:[#allocation35_spill]] %s3012_s7 }
   0x9   :  { %3043 = sst [smem:[#allocation36_spill]] %s3015_s10 }
   0xa   :  { %3044 = sst [smem:[#allocation37_spill]] %s3016_s11 }
   0xb   :  { %3045 = sst [smem:[#allocation38_spill]] %s3018_s13 }
   0xc   :  { %18 = vsyncpa [#allocation3], 0 }
   0xd   :  { %20 = vsyncpa [#allocation3 + $0x1], 0 }
   0xe   :  { %21 = vsyncpa [#allocation6], 0 }
   0xf   :  { %22 = vsyncpa [#allocation9], 0 }
  0x10   :  { %23 = vsyncpa [#allocation12], 0 }
  0x11   :  { %24 = vsyncpa [#allocation15], 0 }
  0x12   :  { %25 = vsyncpa [#allocation4], 0 }
  0x13   :  { %27 = vsyncpa [#allocation4 + $0x1], 0  ;;  %s2469_s25 = smov 0   ;;  %s2471_s26 = smov 0  }
  0x14   :  { %s2473_s27 = smov 0   ;;  %s2475_s28 = smov 0  }
  0x15   :  { %s2477_s29 = smov 0   ;;  %s2479_s30 = smov 0  }
  0x16   :  { %s2481_s14 = smov 0   ;;  %s2483_s15 = smov 0  }
  0x17   :  { %s2485_s16 = smov 0   ;;  %s2487_s17 = smov 0  }
  0x18   :  { %s2489_s18 = smov 0  }
  0x19 LB: > { %3046 = sst [smem:[#allocation23_spill]] %s2332_s25  ;;  %s3019_s19 = sadd.s32 4294967295, %s2372_s18   ;;  %s2372_s18 = sphi %s2489_s18, %s33_s18   ;;  %s2368_s17 = sphi %s2487_s17, %s3096_s17   ;;  %s2364_s16 = sphi %s2485_s16, %s3095_s16   ;;  %s2360_s15 = sphi %s2483_s15, %s3094_s15   ;;  %s2356_s14 = sphi %s2481_s14, %s3093_s14   ;;  %s2352_s30 = sphi %s2479_s30, %s3092_s30   ;;  %s2348_s29 = sphi %s2477_s29, %s3091_s29   ;;  %s2344_s28 = sphi %s2475_s28, %s3090_s28   ;;  %s2340_s27 = sphi %s2473_s27, %s3089_s27   ;;  %s2336_s26 = sphi %s2471_s26, %s3088_s26   ;;  %s2332_s25 = sphi %s2469_s25, %s3087_s25  }
  0x1a   : > { %3047 = sst [smem:[#allocation24_spill]] %s2336_s26  ;;  %p1607_p0 = scmp.ge.s32.totalorder %s2372_s18, 1 }
  0x1b   : > { %3048 = sst [smem:[#allocation25_spill]] %s2356_s14  ;;  %p2528_p1 = scmp.eq.s32.totalorder %s3019_s19, 0 }
  0x1c   : > { %3049 = sst [smem:[#allocation26_spill]] %s2360_s15  ;;  %p356_p2 = scmp.lt.s32.totalorder %s2372_s18, 5 }
  0x1d   : > { %s3050_s20 = scalar_select %p2528_p1, 1, 0 }
  0x1e   : > { %p2533_p3 = pnand %p1607_p0, %p356_p2  ;;  %s2374_s22 = smov [#allocation5]  }
  0x1f   : > { %s368_s23 = sshll.u32 %s2374_s22, 4  ;;  %s2375_s19 = smov [#allocation8]   ;;  %s2537_s23 = int_to_ptr.vmem [resolvable:$true] %s368_s23 }
  0x20   : > { %s3051_s21 = scalar_select %p2533_p3, 1, 0 }
  0x21   : > { %p1817_p4 = pneg %p2533_p3  ;;  %s404_s13 = sshll.u32 %s2375_s19, 4  ;;  %s2547_s13 = int_to_ptr.vmem [resolvable:$true] %s404_s13 }
  0x22   : > { %3052 = sst [smem:[#allocation27_spill]] %s3051_s21  ;;  %s2376_s15 = smov [#allocation11]  }
  0x23   : > { %p2543_p5 = pnand %p1817_p4, %p2528_p1  ;;  %s2549_s10 = sshll.u32 %s2376_s15, 4  ;;  %s427_s10 = int_to_ptr.vmem [resolvable:$true] %s2549_s10 }
  0x24   : > { %s3054_s1 = sld [smem:[#allocation29_spill]] }
  0x25   : > { %p2559_p7 = pneg %p2543_p5 }
  0x2a   : > { %s2008_s22 = scalar_lea.hbm %s3054_s1, 256 }
  0x2b   : > { %p2009_p6 = scmp.ne.s32.totalorder %s3054_s1, %s2008_s22  ;;  %p2015_p10 = scmp.lt.u32.totalorder %s2008_s22, %s3054_s1 }
  0x2d   : > { %p2011_p8 = pnand %p2559_p7, %p2009_p6 }
  0x2f   : > { %p2012_p9 = pneg %p2011_p8 }
  0x31   : > { %p2017_p11 = pnand %p2015_p10, %p2012_p9 }
  0x33   : > { %2020 = shalt.err (!%p2017_p11)
}
  0x34   : > { %s2021_s2 = scalar_lea.vmem %s2537_s23, 256  ;;  %p2029_p2 = scmp.lt.s32.totalorder %s2537_s23, %s2537_s23 }
  0x35   : > { %p2022_p12 = scmp.ne.s32.totalorder %s2537_s23, %s2021_s2  ;;  %p2030_p4 = scmp.lt.s32.totalorder %s2021_s2, %s2021_s2 }
  0x37   : > { %p2024_p13 = pnand %p2022_p12, %p2559_p7  ;;  %p2031_p6 = por %p2030_p4, %p2029_p2 }
  0x39   : > { %p2025_p0 = pneg %p2024_p13 }
  0x3b   : > { %p2032_p8 = pnand %p2031_p6, %p2025_p0 }
  0x3d   : > { %2035 = shalt.err (!%p2032_p8)
}
  0x3e   : > { %s3030_s4 = smov 64   ;;  %s3032_s5 = smov 4  }
  0x3f   : > { %1820 = dma.hbm_to_vmem [thread:$0]  (!%p2543_p5), %s3054_s1, 256, %s2537_s23, [#allocation6], %s3030_s4, %s3030_s4, %s3032_s5  }
  0x40   : > { %s3056_s6 = sld [smem:[#allocation34_spill]] }
  0x46   : > { %s2036_s2 = scalar_lea.hbm %s3056_s6, 16 }
  0x47   : > { %p2037_p9 = scmp.ne.s32.totalorder %s3056_s6, %s2036_s2  ;;  %p2043_p12 = scmp.lt.u32.totalorder %s2036_s2, %s3056_s6 }
  0x49   : > { %p2039_p10 = pnand %p2037_p9, %p2559_p7 }
  0x4b   : > { %p2040_p11 = pneg %p2039_p10 }
  0x4d   : > { %p2045_p13 = pnand %p2043_p12, %p2040_p11 }
  0x4f   : > { %2048 = shalt.err (!%p2045_p13)
}
  0x50   : > { %s2049_s23 = scalar_lea.vmem %s2547_s13, 16  ;;  %s2056_s0 = scalar_lea.vmem %s2547_s13, 32 }
  0x51   : > { %p2050_p0 = scmp.ne.s32.totalorder %s2547_s13, %s2049_s23  ;;  %p2057_p6 = scmp.lt.s32.totalorder %s2547_s13, %s2547_s13 }
  0x52   : > { %p2058_p8 = scmp.lt.s32.totalorder %s2056_s0, %s2049_s23 }
  0x53   : > { %p2052_p2 = pnand %p2050_p0, %p2559_p7 }
  0x54   : > { %p2059_p9 = por %p2058_p8, %p2057_p6 }
  0x55   : > { %p2053_p4 = pneg %p2052_p2 }
  0x57   : > { %p2060_p10 = pnand %p2059_p9, %p2053_p4 }
  0x59   : > { %2063 = shalt.err (!%p2060_p10)
}
  0x5a   : > { %1826 = dma.hbm_to_vmem [thread:$0]  (!%p2543_p5), %s3056_s6, 16, %s2547_s13, [#allocation9]  }
  0x5b   : > { %s2064_s22 = scalar_lea.hbm %s3013_s8, 16 }
  0x5c   : > { %p2065_p11 = scmp.ne.s32.totalorder %s3013_s8, %s2064_s22  ;;  %p2071_p0 = scmp.lt.u32.totalorder %s2064_s22, %s3013_s8 }
  0x5e   : > { %p2067_p12 = pnand %p2065_p11, %p2559_p7 }
  0x60   : > { %p2068_p13 = pneg %p2067_p12 }
  0x62   : > { %p2073_p2 = pnand %p2071_p0, %p2068_p13 }
  0x64   : > { %2076 = shalt.err (!%p2073_p2)
}
  0x65   : > { %s2077_s0 = scalar_lea.vmem %s427_s10, 16  ;;  %s2084_s13 = scalar_lea.vmem %s427_s10, 32 }
  0x66   : > { %p2078_p4 = scmp.ne.s32.totalorder %s427_s10, %s2077_s0  ;;  %p2085_p9 = scmp.lt.s32.totalorder %s427_s10, %s427_s10 }
  0x67   : > { %p2086_p10 = scmp.lt.s32.totalorder %s2084_s13, %s2077_s0 }
  0x68   : > { %p2080_p6 = pnand %p2078_p4, %p2559_p7 }
  0x69   : > { %p2087_p3 = por %p2086_p10, %p2085_p9 }
  0x6a   : > { %p2081_p8 = pneg %p2080_p6 }
  0x6c   : > { %p2088_p1 = pnand %p2087_p3, %p2081_p8 }
  0x6e   : > { %2091 = shalt.err (!%p2088_p1)
}
  0x6f   : > { %1832 = dma.hbm_to_vmem [thread:$0]  (!%p2543_p5), %s3013_s8, 16, %s427_s10, [#allocation12]  }
  0x70   : > { %s2379_s21 = smov [#allocation7]   ;;  %s2380_s22 = smov [#allocation10]  }
  0x71   : > { %s384_s11 = sshll.u32 %s2379_s21, 4  ;;  %s415_s19 = sshll.u32 %s2380_s22, 4  ;;  %s385_s11 = int_to_ptr.vmem [resolvable:$true] %s384_s11  ;;  %s416_s19 = int_to_ptr.vmem [resolvable:$true] %s415_s19 }
  0x72   : > { %s3057_s3 = sld [smem:[#allocation31_spill]] }
  0x78   : > { %s2092_s23 = scalar_lea.hbm %s3057_s3, 256 }
  0x79   : > { %p2093_p1 = scmp.ne.s32.totalorder %s3057_s3, %s2092_s23  ;;  %p2099_p12 = scmp.lt.u32.totalorder %s2092_s23, %s3057_s3 }
  0x7b   : > { %p2095_p3 = pnand %p2093_p1, %p2559_p7 }
  0x7d   : > { %p2096_p11 = pneg %p2095_p3 }
  0x7f   : > { %p2101_p13 = pnand %p2099_p12, %p2096_p11 }
  0x81   : > { %2104 = shalt.err (!%p2101_p13)
}
  0x82   : > { %s2105_s10 = scalar_lea.vmem %s385_s11, 256  ;;  %p2113_p6 = scmp.lt.s32.totalorder %s385_s11, %s385_s11 }
  0x83   : > { %p2106_p0 = scmp.ne.s32.totalorder %s385_s11, %s2105_s10  ;;  %p2114_p8 = scmp.lt.s32.totalorder %s2105_s10, %s2105_s10 }
  0x85   : > { %p2108_p2 = pnand %p2106_p0, %p2559_p7  ;;  %p2115_p9 = por %p2114_p8, %p2113_p6 }
  0x87   : > { %p2109_p4 = pneg %p2108_p2 }
  0x89   : > { %p2116_p10 = pnand %p2115_p9, %p2109_p4 }
  0x8b   : > { %2119 = shalt.err (!%p2116_p10)
}
  0x8c   : > { %s3058_s26 = smov 64   ;;  %s3059_s7 = sld [smem:[#allocation35_spill]] }
  0x8d   : > { %1823 = dma.hbm_to_vmem [thread:$0]  (!%p2543_p5), %s3057_s3, 256, %s385_s11, [#allocation6], %s3058_s26, %s3058_s26, %s3032_s5  }
  0x92   : > { %s2120_s2 = scalar_lea.hbm %s3059_s7, 16 }
  0x93   : > { %p2121_p1 = scmp.ne.s32.totalorder %s3059_s7, %s2120_s2  ;;  %p2127_p12 = scmp.lt.u32.totalorder %s2120_s2, %s3059_s7 }
  0x95   : > { %p2123_p3 = pnand %p2121_p1, %p2559_p7 }
  0x97   : > { %p2124_p11 = pneg %p2123_p3 }
  0x99   : > { %p2129_p13 = pnand %p2127_p12, %p2124_p11 }
  0x9b   : > { %2132 = shalt.err (!%p2129_p13)
}
  0x9c   : > { %s2133_s10 = scalar_lea.vmem %s416_s19, 16  ;;  %s2140_s11 = scalar_lea.vmem %s416_s19, 32 }
  0x9d   : > { %p2134_p0 = scmp.ne.s32.totalorder %s416_s19, %s2133_s10  ;;  %p2141_p6 = scmp.lt.s32.totalorder %s416_s19, %s416_s19 }
  0x9e   : > { %p2142_p8 = scmp.lt.s32.totalorder %s2140_s11, %s2133_s10 }
  0x9f   : > { %p2136_p2 = pnand %p2134_p0, %p2559_p7 }
  0xa0   : > { %p2143_p9 = por %p2142_p8, %p2141_p6 }
  0xa1   : > { %p2137_p4 = pneg %p2136_p2 }
  0xa3   : > { %p2144_p10 = pnand %p2143_p9, %p2137_p4 }
  0xa5   : > { %2147 = shalt.err (!%p2144_p10)
}
  0xa6   : > { %1829 = dma.hbm_to_vmem [thread:$0]  (!%p2543_p5), %s3059_s7, 16, %s416_s19, [#allocation9]  }
  0xa7   : > { %s2381_s22 = smov [#allocation13]   ;;  %s2382_s2 = smov [#allocation14]  }
  0xa8   : > { %s437_s15 = sshll.u32 %s2381_s22, 4  ;;  %s453_s23 = sshll.u32 %s2382_s2, 4  ;;  %s438_s15 = int_to_ptr.vmem [resolvable:$true] %s437_s15  ;;  %s454_s23 = int_to_ptr.vmem [resolvable:$true] %s453_s23 }
  0xa9   : > { %s2148_s25 = scalar_lea.hbm %s3014_s9, 16 }
  0xaa   : > { %p2149_p1 = scmp.ne.s32.totalorder %s3014_s9, %s2148_s25  ;;  %p2155_p12 = scmp.lt.u32.totalorder %s2148_s25, %s3014_s9 }
  0xac   : > { %p2151_p3 = pnand %p2149_p1, %p2559_p7 }
  0xae   : > { %p2152_p11 = pneg %p2151_p3 }
  0xb0   : > { %p2157_p13 = pnand %p2155_p12, %p2152_p11 }
  0xb2   : > { %2160 = shalt.err (!%p2157_p13)
}
  0xb3   : > { %s2161_s19 = scalar_lea.vmem %s438_s15, 16  ;;  %s2168_s21 = scalar_lea.vmem %s438_s15, 32 }
  0xb4   : > { %p2162_p0 = scmp.ne.s32.totalorder %s438_s15, %s2161_s19  ;;  %p2169_p6 = scmp.lt.s32.totalorder %s438_s15, %s438_s15 }
  0xb5   : > { %p2170_p8 = scmp.lt.s32.totalorder %s2168_s21, %s2161_s19 }
  0xb6   : > { %p2164_p2 = pnand %p2162_p0, %p2559_p7 }
  0xb7   : > { %p2171_p9 = por %p2170_p8, %p2169_p6 }
  0xb8   : > { %p2165_p4 = pneg %p2164_p2 }
  0xba   : > { %p2172_p10 = pnand %p2171_p9, %p2165_p4 }
  0xbc   : > { %2175 = shalt.err (!%p2172_p10)
}
  0xbd   : > { %1835 = dma.hbm_to_vmem [thread:$0]  (!%p2543_p5), %s3014_s9, 16, %s438_s15, [#allocation12]  }
  0xbe   : > { %s2176_s13 = scalar_lea.hbm %s3017_s12, 256 }
  0xbf   : > { %p2177_p1 = scmp.ne.s32.totalorder %s3017_s12, %s2176_s13  ;;  %p2183_p12 = scmp.lt.u32.totalorder %s2176_s13, %s3017_s12 }
  0xc1   : > { %p2179_p3 = pnand %p2177_p1, %p2559_p7 }
  0xc3   : > { %p2180_p11 = pneg %p2179_p3 }
  0xc5   : > { %p2185_p13 = pnand %p2183_p12, %p2180_p11 }
  0xc7   : > { %2188 = shalt.err (!%p2185_p13)
}
  0xc8   : > { %s2189_s19 = scalar_lea.vmem %s454_s23, 256  ;;  %p2197_p6 = scmp.lt.s32.totalorder %s454_s23, %s454_s23 }
  0xc9   : > { %p2190_p0 = scmp.ne.s32.totalorder %s454_s23, %s2189_s19  ;;  %p2198_p8 = scmp.lt.s32.totalorder %s2189_s19, %s2189_s19 }
  0xcb   : > { %p2192_p2 = pnand %p2190_p0, %p2559_p7  ;;  %p2199_p9 = por %p2198_p8, %p2197_p6 }
  0xcd   : > { %p2193_p4 = pneg %p2192_p2 }
  0xcf   : > { %p2200_p10 = pnand %p2199_p9, %p2193_p4 }
  0xd1   : > { %2203 = shalt.err (!%p2200_p10)
}
  0xd2   : > { %s3060_s15 = smov 4   ;;  %s1606_s14 = sadd.s32 4294967294, %s2372_s18  }
  0xd3   : > { %1838 = dma.hbm_to_vmem [thread:$0]  (!%p2543_p5), %s3017_s12, 256, %s454_s23, [#allocation15], %s3058_s26, %s3058_s26, %s3060_s15  }
  0xd4   : > { %s3061_s24 = sld [smem:[#allocation24_spill]]  ;;  %s42_s2 = sadd.s32 1, %s2364_s16 }
  0xd5   : > { %s45_s5 = sadd.s32 1, %s2368_s17  ;;  %p43_p7 = scmp.ge.s32.totalorder %s42_s2, 2 }
  0xd6   : > { %s3062_s0 = sld [smem:[#allocation23_spill]]  ;;  %s52_s13 = sadd.s32 1, %s2352_s30 }
  0xd7   : > { %p59_p1 = scmp.ne.s32.totalorder %s2352_s30, %s2348_s29  ;;  %p60_p3 = scmp.eq.s32.totalorder %s2372_s18, 0 }
  0xd8   : > { %s3098_s2 = smov (%p43_p7, %s42_s2), 0  ;;  %s3100_s5 = smov (!%p43_p7, %s45_s5), %s2368_s17 }
  0xd9   : > { %p2714_p11 = por %p60_p3, %p59_p1  ;;  %p65_p5 = scmp.ne.s32.totalorder %s2348_s29, %s2344_s28 }
  0xda   : > { %p47_p12 = scmp.ge.s32.totalorder %s3100_s5, 2  ;;  %s328_s23 = ssub.s32 %s2364_s16, %s3098_s2 }
  0xdb   : > { %p3064_p13 = scmp.ne.s32.totalorder %s3050_s20, 0  ;;  %s332_s10 = sadd.s32 1, %s2340_s27 }
  0xdc   : > { %s3102_s5 = smov (%p47_p12, %s3100_s5), 0  ;;  %p342_p2 = scmp.ne.s32.totalorder %s2340_s27, %s3061_s24 }
  0xdd   : > { %p2724_p0 = por %p3064_p13, %p65_p5  ;;  %s3066_s11 = sadd.s32 4294967295, %s2372_s18  }
  0xde   : > { %p343_p4 = scmp.eq.s32.totalorder %s3066_s11, 3  ;;  %s49_s4 = ssub.s32 %s2368_s17, %s3102_s5 }
  0xdf   : > { %p348_p6 = scmp.ne.s32.totalorder %s3061_s24, %s3062_s0  ;;  %p50_p8 = scmp.eq.s32.totalorder %s49_s4, 0 }
  0xe0   : > { %s329_s28 = sor.u32 %s328_s23, %s49_s4  ;;  %p2739_p10 = por %p343_p4, %p342_p2 }
  0xe1   : > { %p330_p9 = scmp.eq.s32.totalorder %s329_s28, 0  ;;  %p349_p7 = scmp.eq.s32.totalorder %s1606_s14, 3 }
  0xe2   : > { %s3067_s19 = scalar_select %p2739_p10, 1, 0 }
  0xe3   : > { %s2744_s15 = scalar_select %p50_p8, %s2352_s30, %s52_s13  }
  0xe4   : > { %s2747_s21 = scalar_select %p330_p9, %s2340_s27, %s332_s10  }
  0xe5   : > { %p1854_p1 = scmp.lt.s32.totalorder %s2372_s18, 4  ;;  %s467_s22 = sand.u32 1, %s2352_s30  }
  0xe6   : > { %s1665_s1 = sshll.u32 %s2368_s17, 8  ;;  %p2752_p3 = por %p349_p7, %p348_p6 }
  0xe7   : > { %s1616_s24 = sshll.u32 %s467_s22, 4  ;;  %s3069_s4 = sld [smem:[#allocation28_spill]] }
  0xe8   : > { %s3068_s11 = scalar_select %p2752_p3, 1, 0 }
  0xe9   : > { %p2763_p5 = pnand %p1854_p1, %p2714_p11  ;;  %s471_s13 = scalar_lea.vmem [#allocation2], %s1616_s24 }
  0xea   : > { %s478_s10 = sshll.u32 %s471_s13, 4  ;;  %s2769_s3 = scalar_lea.sflag [#allocation3], %s467_s22  ;;  %s2767_s10 = int_to_ptr.vmem [resolvable:$true] %s478_s10 }
  0xeb   : > { %p2206_p13 = pneg %p2763_p5 }
  0xed   : > { %s2759_s28 = scalar_lea.hbm %s3069_s4, %s1665_s1  ;;  %s2209_s23 = scalar_lea.hbm %s3069_s4, 512 }
  0xee   : > { %s2204_s0 = scalar_lea.hbm %s2759_s28, 256  ;;  %p2210_p11 = scmp.lt.u32.totalorder %s2759_s28, %s3069_s4 }
  0xef   : > { %p2205_p12 = scmp.ne.s32.totalorder %s2759_s28, %s2204_s0  ;;  %p2211_p6 = scmp.lt.u32.totalorder %s2209_s23, %s2204_s0 }
  0xf0   : > { %p2213_p9 = scmp.lt.u32.totalorder %s2204_s0, %s2759_s28 }
  0xf1   : > { %p2207_p2 = pnand %p2206_p13, %p2205_p12  ;;  %p2212_p8 = por %p2211_p6, %p2210_p11 }
  0xf3   : > { %p2208_p4 = pneg %p2207_p2  ;;  %p2214_p7 = por %p2213_p9, %p2212_p8 }
  0xf5   : > { %p2215_p1 = pnand %p2214_p7, %p2208_p4 }
  0xf7   : > { %2218 = shalt.err (!%p2215_p1)
}
  0xf8   : > { %s2219_s22 = scalar_lea.vmem %s2767_s10, 256  ;;  %s2383_s24 = smov [#allocation2]  }
  0xf9   : > { %p2220_p12 = scmp.ne.s32.totalorder %s2767_s10, %s2219_s22  ;;  %s2224_s13 = sshll.u32 %s2383_s24, 4  ;;  %s2225_s13 = int_to_ptr.vmem [resolvable:$false] %s2224_s13 }
  0xfa   : > { %s2226_s6 = scalar_lea.vmem %s2225_s13, 512  ;;  %p2227_p10 = scmp.lt.s32.totalorder %s2767_s10, %s2225_s13 }
  0xfb   : > { %p2222_p2 = pnand %p2220_p12, %p2206_p13  ;;  %p2228_p11 = scmp.lt.s32.totalorder %s2226_s6, %s2219_s22 }
  0xfd   : > { %p2223_p3 = pneg %p2222_p2  ;;  %p2229_p6 = por %p2228_p11, %p2227_p10 }
  0xff   : > { %p2230_p8 = pnand %p2229_p6, %p2223_p3 }
 0x101   : > { %2233 = shalt.err (!%p2230_p8)
}
 0x102   : > { %s2384_s7 = smov 128   ;;  %s2385_s0 = smov 8  }
 0x103   : > { %1842 = dma.hbm_to_vmem [thread:$0]  (!%p2763_p5), %s2759_s28, 256, %s2767_s10, %s2769_s3, %s2384_s7, %s2384_s7, %s2385_s0  }
 0x104   : > { %s3071_s1 = sld [smem:[#allocation27_spill]] }
 0x10a   : > { %p3072_p13 = scmp.ne.s32.totalorder %s3071_s1, 0 }
 0x10b   : > { %s492_s26 = sand.u32 (!%p3072_p13), 1, %s2348_s29  }
 0x10c   : > { %490 = sbr.rel (%p3072_p13) target bundleno = 2839 (0xb17), region = 72  ;;  %s1620_s23 = sshll.u32 (!%p3072_p13), %s492_s26, 4 }
 0x10d   : > { %s493_s24 = scalar_lea.sflag (!%p3072_p13), [#allocation3], %s492_s26  ;;  %s496_s22 = scalar_lea.vmem (!%p3072_p13), [#allocation2], %s1620_s23 }
 0x113   : > { %2307 = dma.done.wait (%p2724_p0), %s493_s24, 256  }
 0x114   : > { %2309 = vsyncadd (%p2724_p0), %s493_s24, 4294967040  ;;  %p3073_p10 = scmp.ne.s32.totalorder %s3050_s20, 0 }
 0x116   : > { %2311 = dma.done.wait (%p3073_p10), [#allocation6], 512  }
 0x117   : > { %2313 = vsyncadd (%p3073_p10), [#allocation6], 4294966784 }
 0x118   : > { %2315 = dma.done.wait (%p3073_p10), [#allocation9], 32  }
 0x119   : > { %2317 = vsyncadd (%p3073_p10), [#allocation9], 4294967264 }
 0x11a   : > { %2319 = dma.done.wait (%p3073_p10), [#allocation12], 32  }
 0x11b   : > { %2321 = vsyncadd (%p3073_p10), [#allocation12], 4294967264 }
 0x11c   : > { %2323 = dma.done.wait (%p3073_p10), [#allocation15], 256  }
 0x11d   : > { %2325 = vsyncadd (%p3073_p10), [#allocation15], 4294967040  ;;  %s3074_s3 = sld [smem:[#allocation25_spill]]  ;;  %vm573_vm0 = vcmask 261120   ;;  %v569_v0 = vld [vmem:[%s496_s22] sm:$0xff]  ;;  %v570_v2 = vld [vmem:[%s496_s22 + $0x8] sm:$0xff] }
 0x11e   : > { %v574_v3 = vsel %vm573_vm0, %v569_v0, 0.0  ;;  %v577_v5 = vsel %vm573_vm0, %v570_v2, 0.0  ;;  %v1974_v21 = vld [vmem:[#allocation7] sm:$0xff]   ;;  %v1975_v22 = vld [vmem:[#allocation5] sm:$0xff]   ;;  %v2386_v23 = vmov 0.0   ;;  %v1976_v24 = vld [vmem:[#allocation7 + $0x8] sm:$0xff]  }
 0x11f   : > { %575 = vadd.xlane.f32.xlu0 %v574_v3  ;;  %1697 = vmatprep.subr.bf16.mxu0 %v2386_v23  ;;  %v1977_v25 = vld [vmem:[#allocation5 + $0x8] sm:$0xff]   ;;  %vm2387_vm1 = vmmov 0   ;;  %v1630_v37 = vld [vmem:[#allocation10] ss:$0 sm:$0xff]  ;;  %v1631_v43 = vld [vmem:[#allocation11] ss:$0 sm:$0xff] }
 0x120   : > { %1705 = vmatprep.subr.bf16.mxu1 %v2386_v23  ;;  %1698 = vmatpush3.bf16.msra.mxu0 %v1974_v21  ;;  %s3075_s10 = sld [smem:[#allocation30_spill]]  ;;  %s3076_s7 = sld [smem:[#allocation32_spill]]  ;;  %vm771_vm2 = vcmask 64512   ;;  %vm818_vm3 = vcmask 130048   ;;  %vm1217_vm4 = vcmask 195584  }
 0x121   : > { %1706 = vmatpush3.bf16.msra.mxu1 %v1975_v22  ;;  %1699 = vmatprep.subr.bf16.mxu0 %v2386_v23  ;;  %s2388_s0 = smov 120   ;;  %s2389_s1 = smov 112  }
 0x122   : > { %1707 = vmatprep.subr.bf16.mxu1 %v2386_v23  ;;  %1701 = vmatprep.mubr.msk.bf16.mxu0 %vm2387_vm1, %v2386_v23  ;;  %s2390_s26 = smov 104   ;;  %s2391_s23 = smov 88  }
 0x123   : > { %s1629_s25 = sshll.u32 %s3074_s3, 3  ;;  %578 = vadd.xlane.f32.xlu0 %v577_v5  ;;  %1709 = vmatprep.mubr.msk.bf16.mxu1 %vm2387_vm1, %v2386_v23  ;;  %s2392_s24 = smov 80  }
 0x124   : > { %s617_s28 = scalar_lea.vmem %s496_s22, %s1629_s25 [#allocation2]  ;;  %1700 = vmatpush3.bf16.msra.mxu0 %v1976_v24  ;;  %s2393_s22 = smov 96  }
 0x125   : > { %v2821_v1 = vld [vmem:[%s617_s28] sm:$0xff]  ;;  %1708 = vmatpush3.bf16.msra.mxu1 %v1977_v25  ;;  %1713 = vmatprep.subr.bf16.mxu0 %v2386_v23  ;;  %s2394_s25 = smov 72   ;;  %s3077_s14 = sld [smem:[#allocation33_spill]] }
 0x126   : > { %v619_v4 = vsel %vm573_vm0, %v2821_v1, 0.0  ;;  %1719 = vmatprep.subr.bf16.mxu1 %v2386_v23  ;;  %v1636_v51 = vld [vmem:[%s3075_s10] ss:$0 sm:$0xff]  ;;  %s2395_s13 = smov 8   ;;  %s2396_s6 = smov 16  }
 0x127   : > { %620 = vadd.xlane.f32.xlu1 %v619_v4  ;;  %v1632_v53 = vld [vmem:[%s3076_s7] ss:$0 sm:$0xff]  ;;  %s3080_s28 = sld [smem:[#allocation24_spill]]  ;;  %p3084_p3 = scmp.ne.s32.totalorder %s3067_s19, 0 }
 0x12b   : > { %s3078_s10 = smov %s3077_s14 }
 0x12d   : > { %s564_s7 = sand.u32 1, %s3080_s28  }
 0x1ac   : > { %v576_v6 = vpop.xlane.xlu0 %575 }
 0x1ad   : > { %v581_v8 = vmul.f32 0.03125, %v576_v6 }
 0x1af   : > { %v583_v10 = vsub.f32 %v569_v0, %v581_v8 }
 0x1b0   : > { %v579_v12 = vpop.xlane.xlu0 %578 }
 0x1b1   : > { %v582_v13 = vmul.f32 0.03125, %v579_v12  ;;  %v585_v14 = vmul.f32 %v583_v10, %v583_v10 }
 0x1b3   : > { %v584_v16 = vsub.f32 %v570_v2, %v582_v13  ;;  %v587_v17 = vsel %vm573_vm0, %v585_v14, 0.0 }
 0x1b4   : > { %v621_v7 = vpop.xlane.xlu1 %620  ;;  %588 = vadd.xlane.f32.xlu1 %v587_v17 }
 0x1b5   : > { %v622_v9 = vmul.f32 0.03125, %v621_v7  ;;  %v586_v19 = vmul.f32 %v584_v16, %v584_v16 }
 0x1b7   : > { %v623_v11 = vsub.f32 %v2821_v1, %v622_v9  ;;  %v590_v20 = vsel %vm573_vm0, %v586_v19, 0.0 }
 0x1b8   : > { %591 = vadd.xlane.f32.xlu0 %v590_v20 }
 0x1b9   : > { %v624_v15 = vmul.f32 %v623_v11, %v623_v11 }
 0x1bb   : > { %v625_v18 = vsel %vm573_vm0, %v624_v15, 0.0 }
 0x1bc   : > { %626 = vadd.xlane.f32.xlu1 %v625_v18 }
 0x241   : > { %v589_v26 = vpop.xlane.xlu1 %588 }
 0x242   : > { %v593_v27 = vmul.f32 0.03125, %v589_v26 }
 0x244   : > { %v595_v28 = vadd.f32 1e-05, %v593_v27 }
 0x245   : > { %v592_v30 = vpop.xlane.xlu0 %591 }
 0x246   : > { %1984 = vrsqrt.f32 %v595_v28  ;;  %v594_v32 = vmul.f32 0.03125, %v592_v30 }
 0x248   : > { %v596_v34 = vadd.f32 1e-05, %v594_v32 }
 0x249   : > { %v627_v29 = vpop.xlane.xlu1 %626 }
 0x24a   : > { %v628_v31 = vmul.f32 0.03125, %v627_v29 }
 0x24c   : > { %v629_v33 = vadd.f32 1e-05, %v628_v31 }
 0x24e   : > { %1986 = vrsqrt.f32 %v629_v33 }
 0x24f   : > { %1988 = vrsqrt.f32 %v596_v34 }
 0x250   : > { %v1985_v35 = vpop.eup %1984 }
 0x251   : > { %v599_v36 = vmul.f32 %v1985_v35, %v583_v10 }
 0x253   : > { %v607_v42 = vmul.f32 %v1630_v37, %v599_v36 }
 0x255   : > { %v615_v47 = vadd.f32 %v1631_v43, %v607_v42 }
 0x258   : > { %v1987_v38 = vpop.eup %1986 }
 0x259   : > { %v1989_v39 = vpop.eup %1988  ;;  %v631_v40 = vmul.f32 %v1987_v38, %v623_v11 }
 0x25a   : > { %v600_v41 = vmul.f32 %v1989_v39, %v584_v16 }
 0x25b   : > { %v632_v44 = vmul.f32 %v1630_v37, %v631_v40 }
 0x25c   : > { %v608_v45 = vmul.f32 %v1630_v37, %v600_v41 }
 0x25d   : > { %v633_v46 = vadd.f32 %v1631_v43, %v632_v44 }
 0x25e   : > { %v616_v48 = vadd.f32 %v1631_v43, %v608_v45 }
 0x25f   : > { %v702_v49 = vpack.c.bf16 %v633_v46, %v633_v46 }
 0x260   : > { %v634_v50 = vpack.c.bf16 %v616_v48, %v615_v47 }
 0x261   : > { %1710 = vmatmul.mubr.msk.bf16.vlgmr.msra.gmra.mrb[0].mxu1 %vm573_vm0, %v702_v49 }
 0x262   : > { %1702 = vmatmul.mubr.msk.bf16.vlgmr.msra.gmra.mrb[0].mxu0 %vm573_vm0, %v634_v50  ;;  %1721 = vmatprep.mubr.msk.bf16.mxu1 %vm2387_vm1, %v2386_v23 }
 0x263   : > { %1715 = vmatprep.mubr.msk.bf16.mxu0 %vm2387_vm1, %v2386_v23 }
 0x334   : > { %v763_v52 = vpop.f32.mrb[0].mxu1 }
 0x335   : > { %v695_v54 = vpop.f32.mrb[0].mxu0  ;;  %v764_v55 = vadd.f32 %v1636_v51, %v763_v52  ;;  %v1711_v56 = vpop.f32.mrb[1].mxu1 }
 0x336   : > { %v1703_v57 = vpop.f32.mrb[1].mxu0  ;;  %v766_v58 = vpop.f32.mrb[2].mxu1  ;;  %v696_v62 = vadd.f32 %v1632_v53, %v695_v54 }
 0x337   : > { %v769_v59 = vpack.c.bf16 %v764_v55, %v764_v55  ;;  %v698_v60 = vpop.f32.mrb[2].mxu0  ;;  %v1712_v61 = vpop.f32.mrb[3].mxu1 }
 0x338   : > { %v699_v63 = vadd.f32 %v1632_v53, %v698_v60  ;;  %v1704_v0 = vpop.f32.mrb[3].mxu0 }
 0x339   : > { %879 = vrot.lane.b32.xlu1 %v769_v59, %s2388_s0 }
 0x33a   : > { %v2853_v2 = vpack.c.bf16 %v699_v63, %v696_v62 }
 0x33c   : > { %881 = vrot.lane.b32.xlu0 %v2853_v2, %s2388_s0  ;;  %v776_v3 = vsel %vm771_vm2, %v2853_v2, 0  ;;  %s1628_s0 = sshll.u32 %s564_s7, 3 }
 0x33d   : > { %1714 = vmatpush3.bf16.xpose.msra.mxu0 %v776_v3  ;;  %989 = vrot.lane.b32.xlu1 %v2853_v2, %s2389_s1 }
 0x33e   : > { %1725 = vmatprep.subr.bf16.mxu0 %v2386_v23 }
 0x340   : > { %1097 = vrot.lane.b32.xlu0 %v2853_v2, %s2390_s26 }
 0x341   : > { %987 = vrot.lane.b32.xlu1 %v769_v59, %s2389_s1  ;;  %s2397_s1 = smov 24  }
 0x344   : > { %1716 = vmatmul.mubr.msk.bf16.vlgmr.msra.gmra.mrb[4].mxu0 %vm771_vm2, %v769_v59 }
 0x345   : > { %1095 = vrot.lane.b32.xlu1 %v769_v59, %s2390_s26  ;;  %1727 = vmatprep.mubr.msk.bf16.mxu0 %vm2387_vm1, %v2386_v23 }
 0x3ab   : > { %v880_v4 = vpop.permute.xlu1 %879 }
 0x3ae   : > { %v882_v5 = vpop.permute.xlu0 %881 }
 0x3af   : > { %v887_v6 = vsel %vm771_vm2, %v882_v5, 0  ;;  %v990_v7 = vpop.permute.xlu1 %989 }
 0x3b0   : > { %1726 = vmatpush3.bf16.xpose.msra.mxu0 %v887_v6  ;;  %v995_v8 = vsel %vm771_vm2, %v990_v7, 0 }
 0x3b1   : > { %1737 = vmatprep.subr.bf16.mxu0 %v2386_v23 }
 0x3b2   : > { %v1098_v9 = vpop.permute.xlu0 %1097 }
 0x3b3   : > { %v988_v10 = vpop.permute.xlu1 %987  ;;  %v1103_v11 = vsel %vm771_vm2, %v1098_v9, 0 }
 0x3b7   : > { %1728 = vmatmul.mubr.msk.bf16.vlgmr.msra.gmra.mrb[8].mxu0 %vm771_vm2, %v880_v4  ;;  %v1096_v12 = vpop.permute.xlu1 %1095 }
 0x3b8   : > { %1738 = vmatpush3.bf16.xpose.msra.mxu0 %v995_v8  ;;  %1739 = vmatprep.mubr.msk.bf16.mxu0 %vm2387_vm1, %v2386_v23 }
 0x3b9   : > { %1749 = vmatprep.subr.bf16.mxu0 %v2386_v23 }
 0x3bf   : > { %1740 = vmatmul.mubr.msk.bf16.vlgmr.msra.gmra.mrb[12].mxu0 %vm771_vm2, %v988_v10 }
 0x3c0   : > { %1750 = vmatpush3.bf16.xpose.msra.mxu0 %v1103_v11  ;;  %1751 = vmatprep.mubr.msk.bf16.mxu0 %vm2387_vm1, %v2386_v23 }
 0x3c1   : > { %1761 = vmatprep.subr.bf16.mxu0 %v2386_v23 }
 0x3c7   : > { %1752 = vmatmul.mubr.msk.bf16.vlgmr.msra.gmra.mrb[16].mxu0 %vm771_vm2, %v1096_v12 }
 0x3c8   : > { %1765 = vmatprep.mubr.msk.bf16.mxu0 %vm2387_vm1, %v2386_v23 }
 0x417   : > { %v812_v13 = vpop.f32.mrb[4].mxu0 }
 0x418   : > { %v1717_v14 = vpop.f32.mrb[5].mxu0  ;;  %v819_v15 = vsel %vm818_vm3, %v812_v13, -inf }
 0x419   : > { %820 = vmax.xlane.f32.xlu0 %v819_v15  ;;  %v815_v16 = vpop.f32.mrb[6].mxu0  ;;  %v1978_v15 = vld [vmem:[%s3077_s14] sm:$0xff]  }
 0x41a   : > { %v1718_v17 = vpop.f32.mrb[7].mxu0  ;;  %1762 = vmatpush3.bf16.msra.mxu0 %v1978_v15 }
 0x41b   : > { %1763 = vmatprep.subr.bf16.mxu0 %v2386_v23 }
 0x48a   : > { %v923_v18 = vpop.f32.mrb[8].mxu0 }
 0x48b   : > { %v1729_v19 = vpop.f32.mrb[9].mxu0  ;;  %v929_v20 = vsel %vm818_vm3, %v923_v18, -inf }
 0x48c   : > { %930 = vmax.xlane.f32.xlu1 %v929_v20  ;;  %v926_v21 = vpop.f32.mrb[10].mxu0 }
 0x48d   : > { %v1730_v22 = vpop.f32.mrb[11].mxu0 }
 0x492   : > { %v1031_v24 = vpop.f32.mrb[12].mxu0 }
 0x493   : > { %v1741_v25 = vpop.f32.mrb[13].mxu0  ;;  %v1037_v26 = vsel %vm818_vm3, %v1031_v24, -inf }
 0x494   : > { %1038 = vmax.xlane.f32.xlu0 %v1037_v26  ;;  %v1034_v27 = vpop.f32.mrb[14].mxu0  ;;  %v1979_v25 = vld [vmem:[%s3078_s10 + $0x8] sm:$0xff]  }
 0x495   : > { %v1742_v28 = vpop.f32.mrb[15].mxu0  ;;  %1764 = vmatpush3.bf16.msra.mxu0 %v1979_v25 }
 0x496   : > { %1777 = vmatprep.subr.bf16.mxu0 %v2386_v23 }
 0x49a   : > { %v1139_v29 = vpop.f32.mrb[16].mxu0 }
 0x49b   : > { %v1753_v30 = vpop.f32.mrb[17].mxu0  ;;  %v1145_v31 = vsel %vm818_vm3, %v1139_v29, -inf }
 0x49c   : > { %1146 = vmax.xlane.f32.xlu0 %v1145_v31  ;;  %v1142_v32 = vpop.f32.mrb[18].mxu0 }
 0x49d   : > { %v1754_v33 = vpop.f32.mrb[19].mxu0 }
 0x4a6   : > { %v821_v34 = vpop.xlane.xlu0 %820 }
 0x4a7   : > { %v822_v35 = vsub.f32 %v812_v13, %v821_v34 }
 0x4a9   : > { %v823_v36 = vmul.f32 1.442695, %v822_v35 }
 0x4ab   : > { %1990 = vpow2.f32 %v823_v36 }
 0x4b5   : > { %v1991_v37 = vpop.eup %1990 }
 0x4b6   : > { %v825_v38 = vsel %vm818_vm3, %v1991_v37, 0.0 }
 0x4b7   : > { %826 = vadd.xlane.f32.xlu0 %v825_v38 }
 0x519   : > { %v931_v39 = vpop.xlane.xlu1 %930 }
 0x51a   : > { %v932_v40 = vsub.f32 %v923_v18, %v931_v39 }
 0x51c   : > { %v933_v41 = vmul.f32 1.442695, %v932_v40 }
 0x51e   : > { %1992 = vpow2.f32 %v933_v41 }
 0x521   : > { %v1039_v42 = vpop.xlane.xlu0 %1038 }
 0x522   : > { %v1040_v43 = vsub.f32 %v1031_v24, %v1039_v42 }
 0x524   : > { %v1041_v44 = vmul.f32 1.442695, %v1040_v43 }
 0x526   : > { %1994 = vpow2.f32 %v1041_v44 }
 0x528   : > { %v1993_v45 = vpop.eup %1992 }
 0x529   : > { %v935_v46 = vsel %vm818_vm3, %v1993_v45, 0.0  ;;  %v1147_v49 = vpop.xlane.xlu0 %1146 }
 0x52a   : > { %936 = vadd.xlane.f32.xlu1 %v935_v46  ;;  %v1148_v50 = vsub.f32 %v1139_v29, %v1147_v49 }
 0x52c   : > { %v1149_v51 = vmul.f32 1.442695, %v1148_v50 }
 0x52e   : > { %1996 = vpow2.f32 %v1149_v51 }
 0x530   : > { %v1995_v47 = vpop.eup %1994 }
 0x531   : > { %v1043_v48 = vsel %vm818_vm3, %v1995_v47, 0.0 }
 0x532   : > { %1044 = vadd.xlane.f32.xlu0 %v1043_v48 }
 0x538   : > { %v1997_v52 = vpop.eup %1996 }
 0x539   : > { %v1151_v53 = vsel %vm818_vm3, %v1997_v52, 0.0 }
 0x53b   : > { %941 = vrot.lane.b32.xlu1 %v2853_v2, %s2391_s23 }
 0x53f   : > { %1049 = vrot.lane.b32.xlu1 %v2853_v2, %s2392_s24  ;;  %s3079_s24 = sld [smem:[#allocation37_spill]] }
 0x544   : > { %v827_v54 = vpop.xlane.xlu0 %826 }
 0x545   : > { %1998 = vrcp.f32 %v827_v54  ;;  %v1980_v50 = vld [vmem:[%s3079_s24] sm:$0xff]   ;;  %v1981_v51 = vld [vmem:[%s3079_s24 + $0x8] sm:$0xff]  }
 0x548   : > { %832 = vrot.lane.b32.xlu0 %v2853_v2, %s2393_s22  ;;  %s566_s22 = scalar_lea.vmem [#allocation16], %s1628_s0 }
 0x54f   : > { %v1999_v56 = vpop.eup %1998 }
 0x550   : > { %v829_v58 = vmul.f32 %v1999_v56, %v1991_v37  ;;  %v1648_v37 = vld [vmem:[#allocation8] ss:$0 sm:$0xff]  ;;  %v1652_v56 = vld [vmem:[#allocation13] ss:$0 sm:$0xff] }
 0x552   : > { %v830_v60 = vpack.c.bf16 %v829_v58, %v829_v58 }
 0x563   : > { %1152 = vadd.xlane.f32.xlu1 %v1151_v53 }
 0x574   : > { %1157 = vrot.lane.b32.xlu1 %v2853_v2, %s2394_s25  ;;  %s1453_s25 = sshll.u32 %s566_s22, 4  ;;  %s2944_s25 = int_to_ptr.vmem [resolvable:$true] %s1453_s25 }
 0x575   : > { %s2234_s28 = scalar_lea.vmem %s2944_s25, 128 }
 0x576   : > { %p2235_p0 = scmp.ne.s32.totalorder %s2944_s25, %s2234_s28 }
 0x578   : > { %p2236_p5 = pnand %p2235_p0, %p3084_p3 }
 0x57a   : > { %p2237_p4 = pneg %p2236_p5 }
 0x5b7   : > { %v937_v55 = vpop.xlane.xlu1 %936 }
 0x5b8   : > { %2000 = vrcp.f32 %v937_v55 }
 0x5bb   : > { %v942_v62 = vpop.permute.xlu1 %941 }
 0x5bf   : > { %v1045_v57 = vpop.xlane.xlu0 %1044  ;;  %v1050_v3 = vpop.permute.xlu1 %1049 }
 0x5c0   : > { %2002 = vrcp.f32 %v1045_v57 }
 0x5c2   : > { %v2001_v61 = vpop.eup %2000 }
 0x5c3   : > { %v833_v59 = vpop.permute.xlu0 %832  ;;  %v939_v63 = vmul.f32 %v2001_v61, %v1993_v45 }
 0x5c4   : > { %1720 = vmatpush3.bf16.msra.mxu1 %v833_v59 }
 0x5c5   : > { %1731 = vmatprep.subr.bf16.mxu1 %v2386_v23  ;;  %v940_v0 = vpack.c.bf16 %v939_v63, %v939_v63 }
 0x5c7   : > { %1722 = vmatmul.mubr.msk.bf16.vlgmr.msra.gmra.mrb[4].mxu1 %vm818_vm3, %v830_v60 }
 0x5c8   : > { %1732 = vmatpush3.bf16.msra.mxu1 %v942_v62  ;;  %1733 = vmatprep.mubr.msk.bf16.mxu1 %vm2387_vm1, %v2386_v23 }
 0x5c9   : > { %1743 = vmatprep.subr.bf16.mxu1 %v2386_v23 }
 0x5ca   : > { %v2003_v2 = vpop.eup %2002 }
 0x5cb   : > { %v1047_v4 = vmul.f32 %v2003_v2, %v1995_v47 }
 0x5cd   : > { %v1048_v5 = vpack.c.bf16 %v1047_v4, %v1047_v4 }
 0x5cf   : > { %1734 = vmatmul.mubr.msk.bf16.vlgmr.msra.gmra.mrb[8].mxu1 %vm818_vm3, %v940_v0 }
 0x5d0   : > { %1744 = vmatpush3.bf16.msra.mxu1 %v1050_v3  ;;  %1745 = vmatprep.mubr.msk.bf16.mxu1 %vm2387_vm1, %v2386_v23 }
 0x5d1   : > { %1755 = vmatprep.subr.bf16.mxu1 %v2386_v23 }
 0x5d7   : > { %1746 = vmatmul.mubr.msk.bf16.vlgmr.msra.gmra.mrb[12].mxu1 %vm818_vm3, %v1048_v5 }
 0x5d8   : > { %1757 = vmatprep.mubr.msk.bf16.mxu1 %vm2387_vm1, %v2386_v23 }
 0x5f0   : > { %v1153_v6 = vpop.xlane.xlu1 %1152 }
 0x5f1   : > { %2004 = vrcp.f32 %v1153_v6 }
 0x5f4   : > { %v1158_v7 = vpop.permute.xlu1 %1157 }
 0x5f5   : > { %1756 = vmatpush3.bf16.msra.mxu1 %v1158_v7 }
 0x5f6   : > { %1769 = vmatprep.subr.bf16.mxu1 %v2386_v23 }
 0x5fb   : > { %v2005_v8 = vpop.eup %2004 }
 0x5fc   : > { %v1155_v9 = vmul.f32 %v2005_v8, %v1997_v52 }
 0x5fe   : > { %v1156_v10 = vpack.c.bf16 %v1155_v9, %v1155_v9 }
 0x600   : > { %1758 = vmatmul.mubr.msk.bf16.vlgmr.msra.gmra.mrb[16].mxu1 %vm818_vm3, %v1156_v10 }
 0x601   : > { %1773 = vmatprep.mubr.msk.bf16.mxu1 %vm2387_vm1, %v2386_v23  ;;  %1770 = vmatpush3.bf16.msra.mxu1 %v1980_v50 }
 0x602   : > { %1771 = vmatprep.subr.bf16.mxu1 %v2386_v23 }
 0x605   : > { %1772 = vmatpush3.bf16.msra.mxu1 %v1981_v51 }
 0x69a   : > { %v872_v11 = vpop.f32.mrb[4].mxu1 }
 0x69b   : > { %v1723_v12 = vpop.f32.mrb[5].mxu1 }
 0x69c   : > { %v875_v13 = vpop.f32.mrb[6].mxu1 }
 0x69d   : > { %v1724_v14 = vpop.f32.mrb[7].mxu1 }
 0x6a2   : > { %v981_v16 = vpop.f32.mrb[8].mxu1 }
 0x6a3   : > { %1204 = vrot.lane.b32.xlu0 %v981_v16, %s2395_s13  ;;  %v1735_v17 = vpop.f32.mrb[9].mxu1  ;;  %s3081_s13 = sld [smem:[#allocation36_spill]] }
 0x6a4   : > { %v984_v18 = vpop.f32.mrb[10].mxu1 }
 0x6a5   : > { %v1736_v19 = vpop.f32.mrb[11].mxu1 }
 0x6a9   : > { %v1653_v58 = vld [vmem:[%s3081_s13] ss:$0 sm:$0xff]  ;;  %s3083_s13 = sld [smem:[#allocation38_spill]] }
 0x6aa   : > { %v1089_v20 = vpop.f32.mrb[12].mxu1 }
 0x6ab   : > { %1208 = vrot.lane.b32.xlu1 %v1089_v20, %s2396_s6  ;;  %v1747_v21 = vpop.f32.mrb[13].mxu1  ;;  %s3082_s6 = sld [smem:[#allocation26_spill]] }
 0x6ac   : > { %v1092_v22 = vpop.f32.mrb[14].mxu1 }
 0x6ad   : > { %v1748_v24 = vpop.f32.mrb[15].mxu1 }
 0x6d3   : > { %v1197_v26 = vpop.f32.mrb[16].mxu1 }
 0x6d4   : > { %1212 = vrot.lane.b32.xlu0 %v1197_v26, %s2397_s1  ;;  %v1759_v27 = vpop.f32.mrb[17].mxu1  ;;  %s1661_s1 = sshll.u32 %s3082_s6, 1  ;;  %s2398_s6 = smov [#allocation16]  }
 0x6d5   : > { %v1200_v28 = vpop.f32.mrb[18].mxu1  ;;  %s1449_s26 = sadd.s32 %s3074_s3, %s1661_s1  ;;  %s1438_s3 = scalar_lea.sflag [#allocation4], %s564_s7 }
 0x6d6   : > { %v1760_v29 = vpop.f32.mrb[19].mxu1  ;;  %s1662_s23 = sshll.u32 %s1449_s26, 7  ;;  %s2238_s0 = sshll.u32 %s2398_s6, 4  ;;  %s2239_s0 = int_to_ptr.vmem [resolvable:$false] %s2238_s0 }
 0x6d7   : > { %s2942_s4 = scalar_lea.hbm %s3083_s13, %s1662_s23  ;;  %s2240_s1 = scalar_lea.vmem %s2239_s0, 256 }
 0x6d8   : > { %p2241_p9 = scmp.lt.s32.totalorder %s2944_s25, %s2239_s0  ;;  %p2242_p7 = scmp.lt.s32.totalorder %s2240_s1, %s2234_s28 }
 0x6da   : > { %p2243_p1 = por %p2242_p7, %p2241_p9 }
 0x6dc   : > { %p2244_p12 = pnand %p2243_p1, %p2237_p4 }
 0x715   : > { %v1205_v30 = vpop.permute.xlu0 %1204 }
 0x716   : > { %v1215_v32 = vsel %vm771_vm2, %v872_v11, %v1205_v30 }
 0x71d   : > { %v1209_v31 = vpop.permute.xlu1 %1208 }
 0x71e   : > { %v1216_v33 = vsel %vm818_vm3, %v1215_v32, %v1209_v31 }
 0x746   : > { %v1213_v34 = vpop.permute.xlu0 %1212 }
 0x747   : > { %v1218_v35 = vsel %vm1217_vm4, %v1216_v33, %v1213_v34 }
 0x748   : > { %v1219_v36 = vpack.c.bf16 %v1218_v35, %v1218_v35 }
 0x74a   : > { %1766 = vmatmul.mubr.msk.bf16.vlgmr.msra.gmra.mrb[20].mxu0 %vm573_vm0, %v1219_v36 }
 0x74b   : > { %1781 = vmatprep.mubr.msk.bf16.mxu0 %vm2387_vm1, %v2386_v23 }
 0x81d   : > { %v1280_v38 = vpop.f32.mrb[20].mxu0 }
 0x81e   : > { %v1281_v39 = vadd.f32 %v1648_v37, %v1280_v38  ;;  %v1767_v40 = vpop.f32.mrb[21].mxu0 }
 0x81f   : > { %v1283_v41 = vpop.f32.mrb[22].mxu0 }
 0x820   : > { %v1768_v42 = vpop.f32.mrb[23].mxu0  ;;  %v1286_v43 = vadd.f32 %v1281_v39, %v2821_v1  ;;  %v1982_v1 = vld [vmem:[#allocation14] sm:$0xff]  }
 0x821   : > { %1778 = vmatpush3.bf16.msra.mxu0 %v1982_v1 }
 0x822   : > { %v1289_v44 = vsel %vm573_vm0, %v1286_v43, 0.0  ;;  %1779 = vmatprep.subr.bf16.mxu0 %v2386_v23  ;;  %v1983_v23 = vld [vmem:[#allocation14 + $0x8] sm:$0xff]  }
 0x823   : > { %1290 = vadd.xlane.f32.xlu1 %v1289_v44 }
 0x825   : > { %1780 = vmatpush3.bf16.msra.mxu0 %v1983_v23 }
 0x8b0   : > { %v1291_v45 = vpop.xlane.xlu1 %1290 }
 0x8b1   : > { %v1292_v46 = vmul.f32 0.03125, %v1291_v45 }
 0x8b3   : > { %v1293_v47 = vsub.f32 %v1286_v43, %v1292_v46 }
 0x8b5   : > { %v1294_v48 = vmul.f32 %v1293_v47, %v1293_v47 }
 0x8b7   : > { %v1295_v49 = vsel %vm573_vm0, %v1294_v48, 0.0 }
 0x8b8   : > { %1296 = vadd.xlane.f32.xlu0 %v1295_v49 }
 0x945   : > { %v1297_v52 = vpop.xlane.xlu0 %1296 }
 0x946   : > { %v1298_v53 = vmul.f32 0.03125, %v1297_v52 }
 0x948   : > { %v1299_v54 = vadd.f32 1e-05, %v1298_v53 }
 0x94a   : > { %2006 = vrsqrt.f32 %v1299_v54 }
 0x954   : > { %v2007_v55 = vpop.eup %2006 }
 0x955   : > { %v1301_v57 = vmul.f32 %v2007_v55, %v1293_v47 }
 0x957   : > { %v1308_v59 = vmul.f32 %v1652_v56, %v1301_v57 }
 0x959   : > { %v1315_v60 = vadd.f32 %v1653_v58, %v1308_v59 }
 0x95b   : > { %v1316_v61 = vpack.c.bf16 %v1315_v60, %v1315_v60 }
 0x95d   : > { %1774 = vmatmul.mubr.msk.bf16.vlgmr.msra.gmra.mrb[20].mxu1 %vm573_vm0, %v1316_v61 }
 0xa30   : > { %v1370_v62 = vpop.f32.mrb[20].mxu1 }
 0xa31   : > { %v1376_v63 = vpack.c.bf16 %v1370_v62, %v1370_v62  ;;  %v1775_v0 = vpop.f32.mrb[21].mxu1 }
 0xa32   : > { %v1373_v2 = vpop.f32.mrb[22].mxu1 }
 0xa33   : > { %v1776_v3 = vpop.f32.mrb[23].mxu1  ;;  %1782 = vmatmul.mubr.msk.bf16.vlgmr.msra.gmra.mrb[24].mxu0 %vm573_vm0, %v1376_v63 }
 0xb06   : > { %v1430_v4 = vpop.f32.mrb[24].mxu0 }
 0xb07   : > { %v1431_v5 = vadd.f32 %v1430_v4, %v1315_v60  ;;  %v1783_v6 = vpop.f32.mrb[25].mxu0 }
 0xb08   : > { %v1433_v7 = vpop.f32.mrb[26].mxu0 }
 0xb09   : > { %v1784_v8 = vpop.f32.mrb[27].mxu0  ;;  %1436 = vst.msk [vmem:[%s566_s22] sm:$0xff] %vm573_vm0, %v1431_v5 }
 0xb0a   : > { %2247 = shalt.err (!%p2244_p12)
}
 0xb0b   : > { %s2248_s7 = scalar_lea.hbm %s2942_s4, 128  ;;  %s2252_s22 = scalar_lea.hbm %s3083_s13, 512 }
 0xb0c   : > { %p2249_p2 = scmp.ne.s32.totalorder %s2942_s4, %s2248_s7  ;;  %p2253_p8 = scmp.lt.u32.totalorder %s2942_s4, %s3083_s13 }
 0xb0d   : > { %p2254_p13 = scmp.lt.u32.totalorder %s2252_s22, %s2248_s7  ;;  %p2256_p0 = scmp.lt.u32.totalorder %s2248_s7, %s2942_s4 }
 0xb0e   : > { %p2250_p11 = pnand %p2249_p2, %p3084_p3 }
 0xb0f   : > { %p2255_p10 = por %p2254_p13, %p2253_p8 }
 0xb10   : > { %p2251_p6 = pneg %p2250_p11 }
 0xb11   : > { %p2257_p5 = por %p2256_p0, %p2255_p10 }
 0xb13   : > { %p2258_p4 = pnand %p2257_p5, %p2251_p6 }
 0xb15   : > { %2261 = shalt.err (!%p2258_p4)
}
 0xb16   : > { %1815 = dma.vmem_to_hbm [thread:$0]  (%p3084_p3), %s2944_s25, 128, %s2942_s4, %s1438_s3  }
 0xb17 PF: > { %s3085_s28 = sld [smem:[#allocation23_spill]]  ;;  %p1862_p9 = scmp.ge.s32.totalorder %s2372_s18, 2 }
 0xb18   : > { %p3086_p7 = scmp.ne.s32.totalorder %s3068_s11, 0 }
 0xb1a   : > { %p1844_p1 = pnand %p1862_p9, %p3086_p7 }
 0xb1d   : > { %s1465_s6 = sand.u32 1, %s3085_s28  }
 0xb1e   : > { %s1466_s0 = scalar_lea.sflag [#allocation4], %s1465_s6 }
 0xb1f   : > { %2327 = dma.done.wait (!%p1844_p1), %s1466_s0, 128  }
 0xb20   : > { %2329 = vsyncadd (!%p1844_p1), %s1466_s0, 4294967168  ;;  %s33_s18 = sadd.s32 1, %s2372_s18   ;;  %s3087_s25 = sld [smem:[#allocation24_spill]] }
 0xb21   : > { %p30_p12 = scmp.ge.s32.totalorder %s33_s18, 6   ;;  %s3088_s26 = smov %s2340_s27 }
 0xb22   : > { %s3089_s27 = smov %s2747_s21  ;;  %s3090_s28 = smov %s2348_s29 }
 0xb23   : > { %s3091_s29 = smov %s2352_s30  ;;  %s3092_s30 = smov %s2744_s15 }
 0xb24   : > { %s3093_s14 = smov %s2364_s16  ;;  %s3094_s15 = smov %s2368_s17 }
 0xb25   : > { %s3095_s16 = smov %s3098_s2  ;;  %s3096_s17 = smov %s3102_s5 }
 0xb26   :  { %32 = sbr.rel (!%p30_p12) target bundleno = 25 (0x19), region = 146 }
 0xb2d   :  { %1471 = vsyncpa [#allocation3], 1 }
 0xb2e   :  { %1473 = vsyncpa [#allocation3 + $0x1], 1 }
 0xb2f   :  { %1474 = vsyncpa [#allocation6], 1 }
 0xb30   :  { %1475 = vsyncpa [#allocation9], 1 }
 0xb31   :  { %1476 = vsyncpa [#allocation12], 1 }
 0xb32   :  { %1477 = vsyncpa [#allocation15], 1 }
 0xb33   :  { %1478 = vsyncpa [#allocation4], 1 }
 0xb34   :  { %1480 = vsyncpa [#allocation4 + $0x1], 1 }

</bundles_post_ra>
